<compile_context>
chip_gen: v5e
topology: v5e:2x2
jax: 0.10.0
libtpu: 0.0.40
codegen_flags: <defaults>
</compile_context>

<pallas_src>
import jax
import jax.numpy as jnp
from jax import lax
from jax.experimental import pallas as pl
from jax.experimental.pallas import tpu as pltpu

EPS = 1e-5
NEG_SLOPE = 0.1
LANE = 128  # channel axes padded to one full lane row


def _down_kernel(x00_ref, x01_ref, x10_ref, x11_ref,
                 w1_ref, g1_ref, b1_ref,
                 w2_ref, g2_ref, b2_ref,
                 o_ref, pad_ref):
    """Fused MaxPool2d(2) -> (Conv3x3 -> BN(train) -> LeakyReLU(0.1)) x2.

    x00..x11 : (N, H, W, C)  the four 2x2-pool taps, channels padded to C=128
    w1_ref   : (9*C, C)      conv1 im2col weights (tap-major, zero padded)
    g1/b1    : (1, C)        BN1 gamma / beta (pad lanes: gamma=1, beta=0)
    w2_ref   : (9*C, C)      conv2 im2col weights
    g2/b2    : (1, C)
    o_ref    : (N, H, W, C)  output, NHWC, lane-dense (pad lanes stay 0)
    pad_ref  : scratch (N, H+2, W+2, C), reused for both padded feature maps
    """
    N, H, W, C = o_ref.shape
    Hp, Wp = H + 2, W + 2
    inv_n = 1.0 / float(N * H * W)

    # ---- MaxPool2d(kernel=2, stride=2): elementwise max of the four taps ----
    pooled = jnp.maximum(jnp.maximum(x00_ref[...], x01_ref[...]),
                         jnp.maximum(x10_ref[...], x11_ref[...]))

    # ---- zero ONLY the 1-pixel halo ring (interior is always overwritten) ----
    pad_ref[:, 0:1, :, :] = jnp.zeros((N, 1, Wp, C), jnp.float32)
    pad_ref[:, Hp - 1:Hp, :, :] = jnp.zeros((N, 1, Wp, C), jnp.float32)
    pad_ref[:, :, 0:1, :] = jnp.zeros((N, Hp, 1, C), jnp.float32)
    pad_ref[:, :, Wp - 1:Wp, :] = jnp.zeros((N, Hp, 1, C), jnp.float32)

    def conv_bn_lrelu(interior, w_ref, g_ref, b_ref):
        # Write the interior (halo already zero) and read the padded map once.
        pad_ref[:, 1:H + 1, 1:W + 1, :] = interior
        xp = pad_ref[...]                                       # (N, Hp, Wp, C)

        # im2col: nine shifted taps concatenated on the lane axis -> ONE MXU
        # contraction with K = 9*C (instead of nine small dots).
        patch = jnp.concatenate(
            [xp[:, ky:ky + H, kx:kx + W, :]
             for ky in range(3) for kx in range(3)],
            axis=-1)                                            # (N, H, W, 9*C)
        acc = jnp.dot(patch, w_ref[...],
                      preferred_element_type=jnp.float32)       # (N, H, W, C)

        # One-pass BatchNorm statistics over (N, H, W) per channel.
        s = jnp.sum(acc, axis=(0, 1, 2), keepdims=True)         # (1,1,1,C)
        ss = jnp.sum(acc * acc, axis=(0, 1, 2), keepdims=True)  # (1,1,1,C)
        mean = s * inv_n
        var = jnp.maximum(ss * inv_n - mean * mean, 0.0)

        g = g_ref[...].reshape(1, 1, 1, C)
        b = b_ref[...].reshape(1, 1, 1, C)
        y = (acc - mean) * lax.rsqrt(var + EPS) * g + b
        return jnp.where(y >= 0, y, NEG_SLOPE * y)              # LeakyReLU(0.1)

    y1 = conv_bn_lrelu(pooled, w1_ref, g1_ref, b1_ref)
    y2 = conv_bn_lrelu(y1, w2_ref, g2_ref, b2_ref)
    o_ref[...] = y2


def down_forward(x_nchw, w1_oihw, g1, b1, w2_oihw, g2, b2):
    """Down forward.  x_nchw: (N, Cin, H, W) -> (N, Cout, H//2, W//2)."""
    N, Cin, H, W = x_nchw.shape
    Cmid = w1_oihw.shape[0]
    Cout = w2_oihw.shape[0]
    assert H % 2 == 0 and W % 2 == 0
    assert max(Cin, Cmid, Cout) <= LANE
    H2, W2 = H // 2, W // 2
    C = LANE

    # ---- wrapper-side layout plumbing (no compute) ----
    # NCHW -> NHWC, channels zero-padded to a full lane row (128).
    x = jnp.transpose(x_nchw, (0, 2, 3, 1)).astype(jnp.float32)
    x = jnp.pad(x, ((0, 0), (0, 0), (0, 0), (0, C - Cin)))
    # The four 2x2-pool taps (strided views; the max itself is done in-kernel).
    x00 = x[:, 0::2, 0::2, :]
    x01 = x[:, 0::2, 1::2, :]
    x10 = x[:, 1::2, 0::2, :]
    x11 = x[:, 1::2, 1::2, :]

    def pack_w(w_oihw):
        # OIHW -> HWIO, pad both channel axes to C, flatten to the im2col slab
        # (9*C, C) with row index = ((ky*3 + kx)*C + cin) to match the kernel's
        # lane-axis concatenation order.
        w = jnp.transpose(w_oihw, (2, 3, 1, 0)).astype(jnp.float32)
        w = jnp.pad(w, ((0, 0), (0, 0),
                        (0, C - w.shape[2]), (0, C - w.shape[3])))
        return w.reshape(9 * C, C)

    def pack_gb(g, b):
        c = g.shape[0]
        gp = jnp.concatenate([g.astype(jnp.float32),
                              jnp.ones((C - c,), jnp.float32)])
        bp = jnp.concatenate([b.astype(jnp.float32),
                              jnp.zeros((C - c,), jnp.float32)])
        return gp.reshape(1, C), bp.reshape(1, C)

    w1p = pack_w(w1_oihw)
    w2p = pack_w(w2_oihw)
    g1p, b1p = pack_gb(g1, b1)
    g2p, b2p = pack_gb(g2, b2)

    flops = 2 * 2 * N * H2 * W2 * (9 * C) * C          # two im2col matmuls
    bytes_accessed = 4 * (5 * N * H2 * W2 * C + 2 * 9 * C * C + 4 * C)

    out = pl.pallas_call(
        _down_kernel,
        out_shape=jax.ShapeDtypeStruct((N, H2, W2, C), jnp.float32),
        in_specs=[pl.BlockSpec(memory_space=pltpu.MemorySpace.VMEM)] * 10,
        out_specs=pl.BlockSpec(memory_space=pltpu.MemorySpace.VMEM),
        scratch_shapes=[pltpu.VMEM((N, H2 + 2, W2 + 2, C), jnp.float32)],
        compiler_params=pltpu.CompilerParams(
            vmem_limit_bytes=48 * 1024 * 1024),
        cost_estimate=pl.CostEstimate(flops=flops,
                                      transcendentals=2 * C,
                                      bytes_accessed=bytes_accessed),
    )(x00, x01, x10, x11, w1p, g1p, b1p, w2p, g2p, b2p)

    # Strip channel padding and return to NCHW.
    return jnp.transpose(out[..., :Cout], (0, 3, 1, 2))


def _reference_down(x_nchw, w1_oihw, g1, b1, w2_oihw, g2, b2):
    """Pure-JAX reference matching PyTorch Down (training-mode BN) forward."""
    x = lax.reduce_window(x_nchw, -jnp.inf, lax.max,
                          window_dimensions=(1, 1, 2, 2),
                          window_strides=(1, 1, 2, 2),
                          padding='VALID')

    def conv(x, w):
        return lax.conv_general_dilated(
            x, w, window_strides=(1, 1), padding=((1, 1), (1, 1)),
            dimension_numbers=('NCHW', 'OIHW', 'NCHW'))

    def bn_lrelu(x, g, b):
        mean = jnp.mean(x, axis=(0, 2, 3), keepdims=True)
        var = jnp.mean((x - mean) ** 2, axis=(0, 2, 3), keepdims=True)
        y = (x - mean) * lax.rsqrt(var + EPS)
        y = y * g.reshape(1, -1, 1, 1) + b.reshape(1, -1, 1, 1)
        return jnp.where(y >= 0, y, NEG_SLOPE * y)

    h = bn_lrelu(conv(x, w1_oihw), g1, b1)
    return bn_lrelu(conv(h, w2_oihw), g2, b2)


if __name__ == "__main__":
    # Down(in_channels=4, out_channels=8)  -> mid_channels = 8
    N, Cin, H, W = 2, 4, 16, 16
    Cmid, Cout = 8, 8

    key = jax.random.PRNGKey(0)
    kx, kw1, kw2 = jax.random.split(key, 3)

    x = jax.random.normal(kx, (N, Cin, H, W), dtype=jnp.float32)
    # Conv2d weights (PyTorch OIHW layout), deterministic init.
    w1 = jax.random.normal(kw1, (Cmid, Cin, 3, 3), dtype=jnp.float32) * 0.1
    w2 = jax.random.normal(kw2, (Cout, Cmid, 3, 3), dtype=jnp.float32) * 0.1
    # BatchNorm affine params at PyTorch defaults (weight=1, bias=0).
    g1 = jnp.ones((Cmid,), jnp.float32)
    b1 = jnp.zeros((Cmid,), jnp.float32)
    g2 = jnp.ones((Cout,), jnp.float32)
    b2 = jnp.zeros((Cout,), jnp.float32)

    out = jax.block_until_ready(down_forward(x, w1, g1, b1, w2, g2, b2))
    ref = jax.block_until_ready(_reference_down(x, w1, g1, b1, w2, g2, b2))

    assert out.shape == (N, Cout, H // 2, W // 2), out.shape
    err = float(jnp.max(jnp.abs(out - ref)))
    assert jnp.allclose(out, ref, atol=2e-3, rtol=2e-3), err

    print("KERNEL_OK")
</pallas_src>

<mosaic_0001>
module attributes {stable_mosaic.version = 11 : i64} {
  func.func @_down_kernel(%arg0: memref<2x8x8x128xf32, #tpu.memory_space<vmem>>, %arg1: memref<2x8x8x128xf32, #tpu.memory_space<vmem>>, %arg2: memref<2x8x8x128xf32, #tpu.memory_space<vmem>>, %arg3: memref<2x8x8x128xf32, #tpu.memory_space<vmem>>, %arg4: memref<1152x128xf32, #tpu.memory_space<vmem>>, %arg5: memref<1x128xf32, #tpu.memory_space<vmem>>, %arg6: memref<1x128xf32, #tpu.memory_space<vmem>>, %arg7: memref<1152x128xf32, #tpu.memory_space<vmem>>, %arg8: memref<1x128xf32, #tpu.memory_space<vmem>>, %arg9: memref<1x128xf32, #tpu.memory_space<vmem>>, %arg10: memref<2x8x8x128xf32, #tpu.memory_space<vmem>>, %arg11: memref<2x10x10x128xf32, #tpu.memory_space<vmem>>) attributes {dimension_semantics = [], scalar_prefetch = 0 : i64, scratch_operands = 1 : i64, tpu.core_type = #tpu.core_type<tc>} {
    %c0 = arith.constant 0 : index
    %c0_0 = arith.constant 0 : index
    %c0_1 = arith.constant 0 : index
    %c0_2 = arith.constant 0 : index
    %0 = vector.load %arg0[%c0, %c0_0, %c0_1, %c0_2] : memref<2x8x8x128xf32, #tpu.memory_space<vmem>>, vector<2x8x8x128xf32>
    %c0_3 = arith.constant 0 : index
    %c0_4 = arith.constant 0 : index
    %c0_5 = arith.constant 0 : index
    %c0_6 = arith.constant 0 : index
    %1 = vector.load %arg1[%c0_3, %c0_4, %c0_5, %c0_6] : memref<2x8x8x128xf32, #tpu.memory_space<vmem>>, vector<2x8x8x128xf32>
    %2 = arith.maximumf %0, %1 : vector<2x8x8x128xf32>
    %c0_7 = arith.constant 0 : index
    %c0_8 = arith.constant 0 : index
    %c0_9 = arith.constant 0 : index
    %c0_10 = arith.constant 0 : index
    %3 = vector.load %arg2[%c0_7, %c0_8, %c0_9, %c0_10] : memref<2x8x8x128xf32, #tpu.memory_space<vmem>>, vector<2x8x8x128xf32>
    %c0_11 = arith.constant 0 : index
    %c0_12 = arith.constant 0 : index
    %c0_13 = arith.constant 0 : index
    %c0_14 = arith.constant 0 : index
    %4 = vector.load %arg3[%c0_11, %c0_12, %c0_13, %c0_14] : memref<2x8x8x128xf32, #tpu.memory_space<vmem>>, vector<2x8x8x128xf32>
    %5 = arith.maximumf %3, %4 : vector<2x8x8x128xf32>
    %6 = arith.maximumf %2, %5 : vector<2x8x8x128xf32>
    %cst = arith.constant 0.000000e+00 : f32
    %7 = vector.broadcast %cst : f32 to vector<2x1x10x128xf32>
    %c0_15 = arith.constant 0 : index
    %c0_16 = arith.constant 0 : index
    %c0_17 = arith.constant 0 : index
    %c0_18 = arith.constant 0 : index
    %8 = vector.load %arg11[%c0_15, %c0_16, %c0_17, %c0_18] : memref<2x10x10x128xf32, #tpu.memory_space<vmem>>, vector<2x1x10x128xf32>
    tpu.vector_store %arg11[%c0_15, %c0_16, %c0_17, %c0_18], %7 {strides = array<i32>} : memref<2x10x10x128xf32, #tpu.memory_space<vmem>>, vector<2x1x10x128xf32>,
    %cst_19 = arith.constant 0.000000e+00 : f32
    %9 = vector.broadcast %cst_19 : f32 to vector<2x1x10x128xf32>
    %c0_20 = arith.constant 0 : index
    %c9 = arith.constant 9 : index
    %c0_21 = arith.constant 0 : index
    %c0_22 = arith.constant 0 : index
    %10 = vector.load %arg11[%c0_20, %c9, %c0_21, %c0_22] : memref<2x10x10x128xf32, #tpu.memory_space<vmem>>, vector<2x1x10x128xf32>
    tpu.vector_store %arg11[%c0_20, %c9, %c0_21, %c0_22], %9 {strides = array<i32>} : memref<2x10x10x128xf32, #tpu.memory_space<vmem>>, vector<2x1x10x128xf32>,
    %cst_23 = arith.constant 0.000000e+00 : f32
    %11 = vector.broadcast %cst_23 : f32 to vector<2x10x1x128xf32>
    %c0_24 = arith.constant 0 : index
    %c0_25 = arith.constant 0 : index
    %c0_26 = arith.constant 0 : index
    %c0_27 = arith.constant 0 : index
    %12 = vector.load %arg11[%c0_24, %c0_25, %c0_26, %c0_27] : memref<2x10x10x128xf32, #tpu.memory_space<vmem>>, vector<2x10x1x128xf32>
    tpu.vector_store %arg11[%c0_24, %c0_25, %c0_26, %c0_27], %11 {strides = array<i32>} : memref<2x10x10x128xf32, #tpu.memory_space<vmem>>, vector<2x10x1x128xf32>,
    %cst_28 = arith.constant 0.000000e+00 : f32
    %13 = vector.broadcast %cst_28 : f32 to vector<2x10x1x128xf32>
    %c0_29 = arith.constant 0 : index
    %c0_30 = arith.constant 0 : index
    %c9_31 = arith.constant 9 : index
    %c0_32 = arith.constant 0 : index
    %14 = vector.load %arg11[%c0_29, %c0_30, %c9_31, %c0_32] : memref<2x10x10x128xf32, #tpu.memory_space<vmem>>, vector<2x10x1x128xf32>
    tpu.vector_store %arg11[%c0_29, %c0_30, %c9_31, %c0_32], %13 {strides = array<i32>} : memref<2x10x10x128xf32, #tpu.memory_space<vmem>>, vector<2x10x1x128xf32>,
    %c0_33 = arith.constant 0 : index
    %c1 = arith.constant 1 : index
    %c1_34 = arith.constant 1 : index
    %c0_35 = arith.constant 0 : index
    %15 = vector.load %arg11[%c0_33, %c1, %c1_34, %c0_35] : memref<2x10x10x128xf32, #tpu.memory_space<vmem>>, vector<2x8x8x128xf32>
    tpu.vector_store %arg11[%c0_33, %c1, %c1_34, %c0_35], %6 {strides = array<i32>} : memref<2x10x10x128xf32, #tpu.memory_space<vmem>>, vector<2x8x8x128xf32>,
    %c0_36 = arith.constant 0 : index
    %c0_37 = arith.constant 0 : index
    %c0_38 = arith.constant 0 : index
    %c0_39 = arith.constant 0 : index
    %16 = vector.load %arg11[%c0_36, %c0_37, %c0_38, %c0_39] : memref<2x10x10x128xf32, #tpu.memory_space<vmem>>, vector<2x10x10x128xf32>
    %17 = vector.extract_strided_slice %16 {offsets = [0, 0, 0, 0], sizes = [2, 8, 8, 128], strides = [1, 1, 1, 1]} : vector<2x10x10x128xf32> to vector<2x8x8x128xf32>
    %18 = vector.extract_strided_slice %16 {offsets = [0, 0, 1, 0], sizes = [2, 8, 8, 128], strides = [1, 1, 1, 1]} : vector<2x10x10x128xf32> to vector<2x8x8x128xf32>
    %19 = vector.extract_strided_slice %16 {offsets = [0, 0, 2, 0], sizes = [2, 8, 8, 128], strides = [1, 1, 1, 1]} : vector<2x10x10x128xf32> to vector<2x8x8x128xf32>
    %20 = vector.extract_strided_slice %16 {offsets = [0, 1, 0, 0], sizes = [2, 8, 8, 128], strides = [1, 1, 1, 1]} : vector<2x10x10x128xf32> to vector<2x8x8x128xf32>
    %21 = vector.extract_strided_slice %16 {offsets = [0, 1, 1, 0], sizes = [2, 8, 8, 128], strides = [1, 1, 1, 1]} : vector<2x10x10x128xf32> to vector<2x8x8x128xf32>
    %22 = vector.extract_strided_slice %16 {offsets = [0, 1, 2, 0], sizes = [2, 8, 8, 128], strides = [1, 1, 1, 1]} : vector<2x10x10x128xf32> to vector<2x8x8x128xf32>
    %23 = vector.extract_strided_slice %16 {offsets = [0, 2, 0, 0], sizes = [2, 8, 8, 128], strides = [1, 1, 1, 1]} : vector<2x10x10x128xf32> to vector<2x8x8x128xf32>
    %24 = vector.extract_strided_slice %16 {offsets = [0, 2, 1, 0], sizes = [2, 8, 8, 128], strides = [1, 1, 1, 1]} : vector<2x10x10x128xf32> to vector<2x8x8x128xf32>
    %25 = vector.extract_strided_slice %16 {offsets = [0, 2, 2, 0], sizes = [2, 8, 8, 128], strides = [1, 1, 1, 1]} : vector<2x10x10x128xf32> to vector<2x8x8x128xf32>
    %26 = tpu.concatenate %17, %18, %19, %20, %21, %22, %23, %24, %25 in 3 : vector<2x8x8x128xf32>, vector<2x8x8x128xf32>, vector<2x8x8x128xf32>, vector<2x8x8x128xf32>, vector<2x8x8x128xf32>, vector<2x8x8x128xf32>, vector<2x8x8x128xf32>, vector<2x8x8x128xf32>, vector<2x8x8x128xf32> -> vector<2x8x8x1152xf32>
    %c0_40 = arith.constant 0 : index
    %c0_41 = arith.constant 0 : index
    %27 = vector.load %arg4[%c0_40, %c0_41] : memref<1152x128xf32, #tpu.memory_space<vmem>>, vector<1152x128xf32>
    %cst_42 = arith.constant dense<0.000000e+00> : vector<2x8x8x128xf32>
    %28 = tpu.matmul %26, %27, %cst_42 {dimension_numbers = #tpu.dot_dimension_numbers<[3], [0], [0, 1, 2], [1], [0, 0, 0, 1, 0, 2, 1, 1], [], []>} : vector<2x8x8x1152xf32>, vector<1152x128xf32>, vector<2x8x8x128xf32> -> vector<2x8x8x128xf32>
    %cst_43 = arith.constant dense<0.000000e+00> : vector<128xf32>
    %29 = vector.multi_reduction <add>, %28, %cst_43 [0, 1, 2] : vector<2x8x8x128xf32> to vector<128xf32>
    %30 = vector.shape_cast %29 : vector<128xf32> to vector<1x1x1x128xf32>
    %31 = arith.mulf %28, %28 : vector<2x8x8x128xf32>
    %cst_44 = arith.constant dense<0.000000e+00> : vector<128xf32>
    %32 = vector.multi_reduction <add>, %31, %cst_44 [0, 1, 2] : vector<2x8x8x128xf32> to vector<128xf32>
    %33 = vector.shape_cast %32 : vector<128xf32> to vector<1x1x1x128xf32>
    %cst_45 = arith.constant 7.812500e-03 : f32
    %34 = vector.broadcast %cst_45 : f32 to vector<1x1x1x128xf32>
    %35 = arith.mulf %30, %34 : vector<1x1x1x128xf32>
    %cst_46 = arith.constant 7.812500e-03 : f32
    %36 = vector.broadcast %cst_46 : f32 to vector<1x1x1x128xf32>
    %37 = arith.mulf %33, %36 : vector<1x1x1x128xf32>
    %38 = arith.mulf %35, %35 : vector<1x1x1x128xf32>
    %39 = arith.subf %37, %38 : vector<1x1x1x128xf32>
    %cst_47 = arith.constant 0.000000e+00 : f32
    %40 = vector.broadcast %cst_47 : f32 to vector<1x1x1x128xf32>
    %41 = arith.maximumf %39, %40 : vector<1x1x1x128xf32>
    %c0_48 = arith.constant 0 : index
    %c0_49 = arith.constant 0 : index
    %42 = vector.load %arg5[%c0_48, %c0_49] : memref<1x128xf32, #tpu.memory_space<vmem>>, vector<1x128xf32>
    %43 = vector.shape_cast %42 : vector<1x128xf32> to vector<1x1x1x128xf32>
    %c0_50 = arith.constant 0 : index
    %c0_51 = arith.constant 0 : index
    %44 = vector.load %arg6[%c0_50, %c0_51] : memref<1x128xf32, #tpu.memory_space<vmem>>, vector<1x128xf32>
    %45 = vector.shape_cast %44 : vector<1x128xf32> to vector<1x1x1x128xf32>
    %46 = vector.broadcast %35 : vector<1x1x1x128xf32> to vector<2x8x8x128xf32>
    %47 = arith.subf %28, %46 : vector<2x8x8x128xf32>
    %cst_52 = arith.constant 9.99999974E-6 : f32
    %48 = vector.broadcast %cst_52 : f32 to vector<1x1x1x128xf32>
    %49 = arith.addf %41, %48 : vector<1x1x1x128xf32>
    %50 = math.rsqrt %49 : vector<1x1x1x128xf32>
    %51 = vector.broadcast %50 : vector<1x1x1x128xf32> to vector<2x8x8x128xf32>
    %52 = arith.mulf %47, %51 : vector<2x8x8x128xf32>
    %53 = vector.broadcast %43 : vector<1x1x1x128xf32> to vector<2x8x8x128xf32>
    %54 = arith.mulf %52, %53 : vector<2x8x8x128xf32>
    %55 = vector.broadcast %45 : vector<1x1x1x128xf32> to vector<2x8x8x128xf32>
    %56 = arith.addf %54, %55 : vector<2x8x8x128xf32>
    %cst_53 = arith.constant 0.000000e+00 : f32
    %57 = vector.broadcast %cst_53 : f32 to vector<2x8x8x128xf32>
    %58 = arith.cmpf oge, %56, %57 : vector<2x8x8x128xf32>
    %cst_54 = arith.constant 1.000000e-01 : f32
    %59 = vector.broadcast %cst_54 : f32 to vector<2x8x8x128xf32>
    %60 = arith.mulf %59, %56 : vector<2x8x8x128xf32>
    %61 = arith.select %58, %56, %60 : vector<2x8x8x128xi1>, vector<2x8x8x128xf32>
    %c0_55 = arith.constant 0 : index
    %c1_56 = arith.constant 1 : index
    %c1_57 = arith.constant 1 : index
    %c0_58 = arith.constant 0 : index
    %62 = vector.load %arg11[%c0_55, %c1_56, %c1_57, %c0_58] : memref<2x10x10x128xf32, #tpu.memory_space<vmem>>, vector<2x8x8x128xf32>
    tpu.vector_store %arg11[%c0_55, %c1_56, %c1_57, %c0_58], %61 {strides = array<i32>} : memref<2x10x10x128xf32, #tpu.memory_space<vmem>>, vector<2x8x8x128xf32>,
    %c0_59 = arith.constant 0 : index
    %c0_60 = arith.constant 0 : index
    %c0_61 = arith.constant 0 : index
    %c0_62 = arith.constant 0 : index
    %63 = vector.load %arg11[%c0_59, %c0_60, %c0_61, %c0_62] : memref<2x10x10x128xf32, #tpu.memory_space<vmem>>, vector<2x10x10x128xf32>
    %64 = vector.extract_strided_slice %63 {offsets = [0, 0, 0, 0], sizes = [2, 8, 8, 128], strides = [1, 1, 1, 1]} : vector<2x10x10x128xf32> to vector<2x8x8x128xf32>
    %65 = vector.extract_strided_slice %63 {offsets = [0, 0, 1, 0], sizes = [2, 8, 8, 128], strides = [1, 1, 1, 1]} : vector<2x10x10x128xf32> to vector<2x8x8x128xf32>
    %66 = vector.extract_strided_slice %63 {offsets = [0, 0, 2, 0], sizes = [2, 8, 8, 128], strides = [1, 1, 1, 1]} : vector<2x10x10x128xf32> to vector<2x8x8x128xf32>
    %67 = vector.extract_strided_slice %63 {offsets = [0, 1, 0, 0], sizes = [2, 8, 8, 128], strides = [1, 1, 1, 1]} : vector<2x10x10x128xf32> to vector<2x8x8x128xf32>
    %68 = vector.extract_strided_slice %63 {offsets = [0, 1, 1, 0], sizes = [2, 8, 8, 128], strides = [1, 1, 1, 1]} : vector<2x10x10x128xf32> to vector<2x8x8x128xf32>
    %69 = vector.extract_strided_slice %63 {offsets = [0, 1, 2, 0], sizes = [2, 8, 8, 128], strides = [1, 1, 1, 1]} : vector<2x10x10x128xf32> to vector<2x8x8x128xf32>
    %70 = vector.extract_strided_slice %63 {offsets = [0, 2, 0, 0], sizes = [2, 8, 8, 128], strides = [1, 1, 1, 1]} : vector<2x10x10x128xf32> to vector<2x8x8x128xf32>
    %71 = vector.extract_strided_slice %63 {offsets = [0, 2, 1, 0], sizes = [2, 8, 8, 128], strides = [1, 1, 1, 1]} : vector<2x10x10x128xf32> to vector<2x8x8x128xf32>
    %72 = vector.extract_strided_slice %63 {offsets = [0, 2, 2, 0], sizes = [2, 8, 8, 128], strides = [1, 1, 1, 1]} : vector<2x10x10x128xf32> to vector<2x8x8x128xf32>
    %73 = tpu.concatenate %64, %65, %66, %67, %68, %69, %70, %71, %72 in 3 : vector<2x8x8x128xf32>, vector<2x8x8x128xf32>, vector<2x8x8x128xf32>, vector<2x8x8x128xf32>, vector<2x8x8x128xf32>, vector<2x8x8x128xf32>, vector<2x8x8x128xf32>, vector<2x8x8x128xf32>, vector<2x8x8x128xf32> -> vector<2x8x8x1152xf32>
    %c0_63 = arith.constant 0 : index
    %c0_64 = arith.constant 0 : index
    %74 = vector.load %arg7[%c0_63, %c0_64] : memref<1152x128xf32, #tpu.memory_space<vmem>>, vector<1152x128xf32>
    %cst_65 = arith.constant dense<0.000000e+00> : vector<2x8x8x128xf32>
    %75 = tpu.matmul %73, %74, %cst_65 {dimension_numbers = #tpu.dot_dimension_numbers<[3], [0], [0, 1, 2], [1], [0, 0, 0, 1, 0, 2, 1, 1], [], []>} : vector<2x8x8x1152xf32>, vector<1152x128xf32>, vector<2x8x8x128xf32> -> vector<2x8x8x128xf32>
    %cst_66 = arith.constant dense<0.000000e+00> : vector<128xf32>
    %76 = vector.multi_reduction <add>, %75, %cst_66 [0, 1, 2] : vector<2x8x8x128xf32> to vector<128xf32>
    %77 = vector.shape_cast %76 : vector<128xf32> to vector<1x1x1x128xf32>
    %78 = arith.mulf %75, %75 : vector<2x8x8x128xf32>
    %cst_67 = arith.constant dense<0.000000e+00> : vector<128xf32>
    %79 = vector.multi_reduction <add>, %78, %cst_67 [0, 1, 2] : vector<2x8x8x128xf32> to vector<128xf32>
    %80 = vector.shape_cast %79 : vector<128xf32> to vector<1x1x1x128xf32>
    %cst_68 = arith.constant 7.812500e-03 : f32
    %81 = vector.broadcast %cst_68 : f32 to vector<1x1x1x128xf32>
    %82 = arith.mulf %77, %81 : vector<1x1x1x128xf32>
    %cst_69 = arith.constant 7.812500e-03 : f32
    %83 = vector.broadcast %cst_69 : f32 to vector<1x1x1x128xf32>
    %84 = arith.mulf %80, %83 : vector<1x1x1x128xf32>
    %85 = arith.mulf %82, %82 : vector<1x1x1x128xf32>
    %86 = arith.subf %84, %85 : vector<1x1x1x128xf32>
    %cst_70 = arith.constant 0.000000e+00 : f32
    %87 = vector.broadcast %cst_70 : f32 to vector<1x1x1x128xf32>
    %88 = arith.maximumf %86, %87 : vector<1x1x1x128xf32>
    %c0_71 = arith.constant 0 : index
    %c0_72 = arith.constant 0 : index
    %89 = vector.load %arg8[%c0_71, %c0_72] : memref<1x128xf32, #tpu.memory_space<vmem>>, vector<1x128xf32>
    %90 = vector.shape_cast %89 : vector<1x128xf32> to vector<1x1x1x128xf32>
    %c0_73 = arith.constant 0 : index
    %c0_74 = arith.constant 0 : index
    %91 = vector.load %arg9[%c0_73, %c0_74] : memref<1x128xf32, #tpu.memory_space<vmem>>, vector<1x128xf32>
    %92 = vector.shape_cast %91 : vector<1x128xf32> to vector<1x1x1x128xf32>
    %93 = vector.broadcast %82 : vector<1x1x1x128xf32> to vector<2x8x8x128xf32>
    %94 = arith.subf %75, %93 : vector<2x8x8x128xf32>
    %cst_75 = arith.constant 9.99999974E-6 : f32
    %95 = vector.broadcast %cst_75 : f32 to vector<1x1x1x128xf32>
    %96 = arith.addf %88, %95 : vector<1x1x1x128xf32>
    %97 = math.rsqrt %96 : vector<1x1x1x128xf32>
    %98 = vector.broadcast %97 : vector<1x1x1x128xf32> to vector<2x8x8x128xf32>
    %99 = arith.mulf %94, %98 : vector<2x8x8x128xf32>
    %100 = vector.broadcast %90 : vector<1x1x1x128xf32> to vector<2x8x8x128xf32>
    %101 = arith.mulf %99, %100 : vector<2x8x8x128xf32>
    %102 = vector.broadcast %92 : vector<1x1x1x128xf32> to vector<2x8x8x128xf32>
    %103 = arith.addf %101, %102 : vector<2x8x8x128xf32>
    %cst_76 = arith.constant 0.000000e+00 : f32
    %104 = vector.broadcast %cst_76 : f32 to vector<2x8x8x128xf32>
    %105 = arith.cmpf oge, %103, %104 : vector<2x8x8x128xf32>
    %cst_77 = arith.constant 1.000000e-01 : f32
    %106 = vector.broadcast %cst_77 : f32 to vector<2x8x8x128xf32>
    %107 = arith.mulf %106, %103 : vector<2x8x8x128xf32>
    %108 = arith.select %105, %103, %107 : vector<2x8x8x128xi1>, vector<2x8x8x128xf32>
    %c0_78 = arith.constant 0 : index
    %c0_79 = arith.constant 0 : index
    %c0_80 = arith.constant 0 : index
    %c0_81 = arith.constant 0 : index
    %109 = vector.load %arg10[%c0_78, %c0_79, %c0_80, %c0_81] : memref<2x8x8x128xf32, #tpu.memory_space<vmem>>, vector<2x8x8x128xf32>
    tpu.vector_store %arg10[%c0_78, %c0_79, %c0_80, %c0_81], %108 {strides = array<i32>} : memref<2x8x8x128xf32, #tpu.memory_space<vmem>>, vector<2x8x8x128xf32>,
    return
  }
}

</mosaic_0001>

<bundles_post_ra>
// kernel: tpu_custom_call.1
= control target key start
LH: loop header
LB: loop body
LE: loop exit
PB: predicated region body
PF: predicated region fallthrough
CT: control target
= control target key end

     0   :  { %15 = vsyncpa [#allocation4], 0  ;;  %s4379_s0 = inlined_call_operand.hbm [shape: f32[2,8,8,128], index: 0, kind: input, shape index: {}]   ;;  %s4380_s1 = inlined_call_operand.hbm [shape: f32[2,8,8,128], index: 1, kind: input, shape index: {}]   ;;  %s4381_s2 = inlined_call_operand.hbm [shape: f32[2,8,8,128], index: 2, kind: input, shape index: {}]   ;;  %s4382_s3 = inlined_call_operand.hbm [shape: f32[2,8,8,128], index: 3, kind: input, shape index: {}]   ;;  %s4383_s4 = inlined_call_operand.hbm [shape: f32[1152,128], index: 4, kind: input, shape index: {}]   ;;  %s4384_s5 = inlined_call_operand.vmem [shape: f32[1,128], index: 5, kind: input, shape index: {}]   ;;  %s4385_s6 = inlined_call_operand.vmem [shape: f32[1,128], index: 6, kind: input, shape index: {}]   ;;  %s4386_s7 = inlined_call_operand.hbm [shape: f32[1152,128], index: 7, kind: input, shape index: {}]   ;;  %s4387_s8 = inlined_call_operand.vmem [shape: f32[1,128], index: 8, kind: input, shape index: {}]   ;;  %s4388_s9 = inlined_call_operand.vmem [shape: f32[1,128], index: 9, kind: input, shape index: {}]   ;;  %s4389_s10 = inlined_call_operand.hbm [shape: f32[2,8,8,128], index: 10, kind: output, shape index: {}]  }
   0x1   :  { %16 = vsyncpa [#allocation7], 0 }
   0x2   :  { %17 = vsyncpa [#allocation10], 0 }
   0x3   :  { %18 = vsyncpa [#allocation13], 0 }
   0x4   :  { %19 = vsyncpa [#allocation5], 0  ;;  %s37_s15 = sshll.u32 %s4380_s1, 4  ;;  %s2920_s16 = smov [#allocation6]   ;;  %s38_s15 = int_to_ptr.hbm [resolvable:$true] %s37_s15 }
   0x5   :  { %s39_s17 = sshll.u32 %s2920_s16, 4  ;;  %s63_s20 = sshll.u32 %s4382_s3, 4  ;;  %s40_s17 = int_to_ptr.vmem [resolvable:$true] %s39_s17  ;;  %s64_s20 = int_to_ptr.hbm [resolvable:$true] %s63_s20 }
   0x6   :  { %s2921_s21 = smov 128   ;;  %s2922_s22 = smov 8  }
   0x7   :  { %45 = dma.hbm_to_vmem [thread:$0]  %s38_s15, 2048, %s40_s17, [#allocation7], %s2921_s21, %s2921_s21, %s2922_s22  }
   0x8   :  { %s2923_s23 = smov [#allocation9]   ;;  %s24_s1 = sshll.u32 %s4379_s0, 4  ;;  %s25_s1 = int_to_ptr.hbm [resolvable:$true] %s24_s1 }
   0x9   :  { %s65_s24 = sshll.u32 %s2923_s23, 4  ;;  %s50_s28 = sshll.u32 %s4381_s2, 4  ;;  %s66_s24 = int_to_ptr.vmem [resolvable:$true] %s65_s24  ;;  %s51_s28 = int_to_ptr.hbm [resolvable:$true] %s50_s28 }
   0xa   :  { %71 = dma.hbm_to_vmem [thread:$0]  %s64_s20, 2048, %s66_s24, [#allocation10], %s2921_s21, %s2921_s21, %s2922_s22  }
   0xb   :  { %s2924_s29 = smov [#allocation3]   ;;  %s2925_s11 = smov [#allocation8]  }
   0xc   :  { %s26_s30 = sshll.u32 %s2924_s29, 4  ;;  %s52_s0 = sshll.u32 %s2925_s11, 4  ;;  %s27_s30 = int_to_ptr.vmem [resolvable:$true] %s26_s30  ;;  %s53_s0 = int_to_ptr.vmem [resolvable:$true] %s52_s0 }
   0xd   :  { %32 = dma.hbm_to_vmem [thread:$0]  %s25_s1, 2048, %s27_s30, [#allocation4], %s2921_s21, %s2921_s21, %s2922_s22  }
   0xe   :  { %s76_s14 = sshll.u32 %s4383_s4, 4  ;;  %s93_s16 = sshll.u32 %s4386_s7, 4  ;;  %s77_s14 = int_to_ptr.hbm [resolvable:$true] %s76_s14  ;;  %s94_s16 = int_to_ptr.hbm [resolvable:$true] %s93_s16 }
   0xf   :  { %58 = dma.hbm_to_vmem [thread:$0]  %s51_s28, 2048, %s53_s0, [#allocation7], %s2921_s21, %s2921_s21, %s2922_s22  }
  0x10   :  { %s2926_s17 = smov [#allocation11]   ;;  %s2927_s19 = smov [#allocation12]  }
  0x11   :  { %s78_s18 = sshll.u32 %s2926_s17, 4  ;;  %s95_s4 = sshll.u32 %s2927_s19, 4  ;;  %s79_s18 = int_to_ptr.vmem [resolvable:$true] %s78_s18  ;;  %s96_s4 = int_to_ptr.vmem [resolvable:$true] %s95_s4 }
  0x12   :  { %84 = dma.hbm_to_vmem [thread:$0]  %s77_s14, 18432, %s79_s18, [#allocation10], %s2921_s21, %s2921_s21, %s2922_s22  }
  0x13   :  { %101 = dma.hbm_to_vmem [thread:$0]  %s94_s16, 18432, %s96_s4, [#allocation13], %s2921_s21, %s2921_s21, %s2922_s22  }
  0x14   :  { %2910 = dma.done.wait [#allocation4], 2048  }
  0x15   :  { %2911 = vsyncadd [#allocation4], 4294965248 }
  0x16   :  { %2912 = dma.done.wait [#allocation7], 4096  }
  0x17   :  { %2913 = vsyncadd [#allocation7], 4294963200 }
  0x18   :  { %2914 = dma.done.wait [#allocation10], 20480  }
  0x19   :  { %2915 = vsyncadd [#allocation10], 4294946816 }
  0x1a   :  { %2916 = dma.done.wait [#allocation13], 18432  }
  0x1b   :  { %2917 = vsyncadd [#allocation13], 4294948864  ;;  %v2928_v0 = vmov 0.0   ;;  %v565_v1 = vld [vmem:[#allocation11 + $0x78] sm:$0xff]  ;;  %v564_v3 = vld [vmem:[#allocation11 + $0x70] sm:$0xff]  ;;  %vm380_vm0 = vcmask 1046528  }
  0x1c   :  { %244 = vst [vmem:[#allocation2 + $0xa0] sm:$0xff] %v2928_v0  ;;  %v581_v2 = vld [vmem:[#allocation11 + $0xf8] sm:$0xff]  ;;  %2690 = vmatpush.msra.mxu2 %v565_v1  ;;  %v580_v4 = vld [vmem:[#allocation11 + $0xf0] sm:$0xff]  ;;  %v563_v5 = vld [vmem:[#allocation11 + $0x68] sm:$0xff]  ;;  %694 = vmatpush.msra.mxu0 %v565_v1  ;;  %vm445_vm1 = vcmask 1045504   ;;  %s2674_s27 = sshll.u32 %s4389_s10, 4  ;;  %s2675_s27 = int_to_ptr.hbm [resolvable:$true] %s2674_s27 }
  0x1d   :  { %261 = vst [vmem:[#allocation2 + $0xa0] sm:$0x1] %v2928_v0  ;;  %2706 = vmatpush.msra.mxu3 %v581_v2  ;;  %v579_v6 = vld [vmem:[#allocation11 + $0xe8] sm:$0xff]  ;;  %759 = vmatpush.msra.mxu1 %v581_v2  ;;  %v562_v7 = vld [vmem:[#allocation11 + $0x60] sm:$0xff]  ;;  %v561_v9 = vld [vmem:[#allocation11 + $0x58] sm:$0xff] }
  0x1e   :  { %242 = vst [vmem:[#allocation2] sm:$0xff] %v2928_v0  ;;  %2691 = vmatpush.msra.mxu2 %v564_v3  ;;  %v578_v8 = vld [vmem:[#allocation11 + $0xe0] sm:$0xff]  ;;  %695 = vmatpush.msra.mxu0 %v564_v3  ;;  %v577_v10 = vld [vmem:[#allocation11 + $0xd8] sm:$0xff]  ;;  %v560_v11 = vld [vmem:[#allocation11 + $0x50] sm:$0xff] }
  0x1f   :  { %243 = vst [vmem:[#allocation2 + $0x8] sm:$0x3] %v2928_v0  ;;  %2707 = vmatpush.msra.mxu3 %v580_v4  ;;  %760 = vmatpush.msra.mxu1 %v580_v4  ;;  %v576_v12 = vld [vmem:[#allocation11 + $0xd0] sm:$0xff]  ;;  %v559_v13 = vld [vmem:[#allocation11 + $0x48] sm:$0xff]  ;;  %v558_v15 = vld [vmem:[#allocation11 + $0x40] sm:$0xff] }
  0x20   :  { %245 = vst [vmem:[#allocation2 + $0xa8] sm:$0x3] %v2928_v0  ;;  %2692 = vmatpush.msra.mxu2 %v563_v5  ;;  %696 = vmatpush.msra.mxu0 %v563_v5  ;;  %v575_v14 = vld [vmem:[#allocation11 + $0xc8] sm:$0xff]  ;;  %v574_v16 = vld [vmem:[#allocation11 + $0xc0] sm:$0xff]  ;;  %v557_v17 = vld [vmem:[#allocation11 + $0x38] sm:$0xff] }
  0x21   :  { %247 = vst [vmem:[#allocation2 + $0x90] sm:$0xff] %v2928_v0  ;;  %2708 = vmatpush.msra.mxu3 %v579_v6  ;;  %761 = vmatpush.msra.mxu1 %v579_v6  ;;  %v573_v18 = vld [vmem:[#allocation11 + $0xb8] sm:$0xff]  ;;  %v556_v19 = vld [vmem:[#allocation11 + $0x30] sm:$0xff]  ;;  %v555_v21 = vld [vmem:[#allocation11 + $0x28] sm:$0xff] }
  0x22   :  { %248 = vst [vmem:[#allocation2 + $0x98] sm:$0x3] %v2928_v0  ;;  %2693 = vmatpush.msra.mxu2 %v562_v7  ;;  %697 = vmatpush.msra.mxu0 %v562_v7  ;;  %v572_v20 = vld [vmem:[#allocation11 + $0xb0] sm:$0xff]  ;;  %v571_v22 = vld [vmem:[#allocation11 + $0xa8] sm:$0xff]  ;;  %v554_v23 = vld [vmem:[#allocation11 + $0x20] sm:$0xff] }
  0x23   :  { %249 = vst [vmem:[#allocation2 + $0x130] sm:$0xff] %v2928_v0  ;;  %2709 = vmatpush.msra.mxu3 %v578_v8  ;;  %762 = vmatpush.msra.mxu1 %v578_v8  ;;  %v570_v24 = vld [vmem:[#allocation11 + $0xa0] sm:$0xff]  ;;  %v553_v25 = vld [vmem:[#allocation11 + $0x18] sm:$0xff]  ;;  %v552_v27 = vld [vmem:[#allocation11 + $0x10] sm:$0xff] }
  0x24   :  { %250 = vst [vmem:[#allocation2 + $0x138] sm:$0x3] %v2928_v0  ;;  %2694 = vmatpush.msra.mxu2 %v561_v9  ;;  %698 = vmatpush.msra.mxu0 %v561_v9  ;;  %v569_v26 = vld [vmem:[#allocation11 + $0x98] sm:$0xff]  ;;  %v568_v28 = vld [vmem:[#allocation11 + $0x90] sm:$0xff]  ;;  %v551_v29 = vld [vmem:[#allocation11 + $0x8] sm:$0xff] }
  0x25   :  { %252 = vst [vmem:[#allocation2 + $0x10] sm:$0x1] %v2928_v0  ;;  %2710 = vmatpush.msra.mxu3 %v577_v10  ;;  %763 = vmatpush.msra.mxu1 %v577_v10  ;;  %v567_v30 = vld [vmem:[#allocation11 + $0x88] sm:$0xff]  ;;  %v550_v31 = vld [vmem:[#allocation11] sm:$0xff]  ;;  %v597_v34 = vld [vmem:[#allocation11 + $0x178] sm:$0xff] }
  0x26   :  { %253 = vst [vmem:[#allocation2 + $0x20] sm:$0x1] %v2928_v0  ;;  %2695 = vmatpush.msra.mxu2 %v560_v11  ;;  %699 = vmatpush.msra.mxu0 %v560_v11  ;;  %v566_v32 = vld [vmem:[#allocation11 + $0x80] sm:$0xff]  ;;  %v613_v35 = vld [vmem:[#allocation11 + $0x1f8] sm:$0xff]  ;;  %v612_v36 = vld [vmem:[#allocation11 + $0x1f0] sm:$0xff] }
  0x27   :  { %254 = vst [vmem:[#allocation2 + $0x30] sm:$0x1] %v2928_v0  ;;  %2711 = vmatpush.msra.mxu3 %v576_v12  ;;  %764 = vmatpush.msra.mxu1 %v576_v12  ;;  %v3056_v33 = vld [vmem:[#allocation2 + $0xa0] sm:$0xff]  ;;  %v596_v41 = vld [vmem:[#allocation11 + $0x170] sm:$0xff]  ;;  %v3068_v42 = vld [vmem:[#allocation3 + $0x48] sm:$0xff] }
  0x28   :  { %255 = vst [vmem:[#allocation2 + $0x40] sm:$0x1] %v2928_v0  ;;  %2696 = vmatpush.msra.mxu2 %v559_v13  ;;  %700 = vmatpush.msra.mxu0 %v559_v13  ;;  %v3059_v37 = vld [vmem:[#allocation3 + $0x40] sm:$0xff]  ;;  %v3070_v43 = vld [vmem:[#allocation6 + $0x48] sm:$0xff]  ;;  %v629_v47 = vld [vmem:[#allocation11 + $0x278] sm:$0xff] }
  0x29   :  { %256 = vst [vmem:[#allocation2 + $0x50] sm:$0x1] %v2928_v0  ;;  %2712 = vmatpush.msra.mxu3 %v575_v14  ;;  %765 = vmatpush.msra.mxu1 %v575_v14  ;;  %v3061_v38 = vld [vmem:[#allocation6 + $0x40] sm:$0xff]  ;;  %v3072_v44 = vld [vmem:[#allocation8 + $0x48] sm:$0xff]  ;;  %v628_v53 = vld [vmem:[#allocation11 + $0x270] sm:$0xff]  ;;  %v171_v3 = vmax.f32 %v3068_v42, %v3070_v43 }
  0x2a   :  { %257 = vst [vmem:[#allocation2 + $0x60] sm:$0x1] %v2928_v0  ;;  %2697 = vmatpush.msra.mxu2 %v558_v15  ;;  %701 = vmatpush.msra.mxu0 %v558_v15  ;;  %v3063_v39 = vld [vmem:[#allocation8 + $0x40] sm:$0xff]  ;;  %v3074_v45 = vld [vmem:[#allocation9 + $0x48] sm:$0xff]  ;;  %v3087_v54 = vld [vmem:[#allocation3 + $0x50] sm:$0xff]  ;;  %v170_v60 = vmax.f32 %v3059_v37, %v3061_v38 }
  0x2b   :  { %258 = vst [vmem:[#allocation2 + $0x70] sm:$0x1] %v2928_v0  ;;  %2713 = vmatpush.msra.mxu3 %v574_v16  ;;  %766 = vmatpush.msra.mxu1 %v574_v16  ;;  %v3065_v40 = vld [vmem:[#allocation9 + $0x40] sm:$0xff]  ;;  %v611_v46 = vld [vmem:[#allocation11 + $0x1e8] sm:$0xff]  ;;  %v3089_v55 = vld [vmem:[#allocation6 + $0x50] sm:$0xff]  ;;  %v219_v4 = vmax.f32 %v3072_v44, %v3074_v45 }
  0x2c   :  { %259 = vst [vmem:[#allocation2 + $0x80] sm:$0x1] %v2928_v0  ;;  %2698 = vmatpush.msra.mxu2 %v557_v17  ;;  %702 = vmatpush.msra.mxu0 %v557_v17  ;;  %v3077_v48 = vld [vmem:[#allocation3] sm:$0xff]  ;;  %v595_v52 = vld [vmem:[#allocation11 + $0x168] sm:$0xff]  ;;  %v3092_v57 = vld [vmem:[#allocation8 + $0x50] sm:$0xff]  ;;  %v218_v61 = vmax.f32 %v3063_v39, %v3065_v40  ;;  %v172_v14 = vmax.f32 %v3087_v54, %v3089_v55  ;;  %v405_v40 = vrot.slane %v3056_v33, 1 }
  0x2d   :  { %262 = vst [vmem:[#allocation2 + $0xb0] sm:$0x1] %v2928_v0  ;;  %2714 = vmatpush.msra.mxu3 %v573_v18  ;;  %767 = vmatpush.msra.mxu1 %v573_v18  ;;  %v3079_v49 = vld [vmem:[#allocation6] sm:$0xff]  ;;  %v3094_v58 = vld [vmem:[#allocation9 + $0x50] sm:$0xff]  ;;  %v3096_v59 = vld [vmem:[#allocation3 + $0x8] sm:$0xff] }
  0x2e   :  { %263 = vst [vmem:[#allocation2 + $0xc0] sm:$0x1] %v2928_v0  ;;  %2699 = vmatpush.msra.mxu2 %v556_v19  ;;  %703 = vmatpush.msra.mxu0 %v556_v19  ;;  %v3081_v50 = vld [vmem:[#allocation8] sm:$0xff]  ;;  %v3103_v63 = vld [vmem:[#allocation6 + $0x8] sm:$0xff]  ;;  %v609_v5 = vld [vmem:[#allocation11 + $0x1d8] sm:$0xff]  ;;  %v162_v9 = vmax.f32 %v3077_v48, %v3079_v49  ;;  %v220_v15 = vmax.f32 %v3092_v57, %v3094_v58 }
  0x2f   :  { %264 = vst [vmem:[#allocation2 + $0xd0] sm:$0x1] %v2928_v0  ;;  %2715 = vmatpush.msra.mxu3 %v572_v20  ;;  %768 = vmatpush.msra.mxu1 %v572_v20  ;;  %v3083_v51 = vld [vmem:[#allocation9] sm:$0xff]  ;;  %v3105_v1 = vld [vmem:[#allocation8 + $0x8] sm:$0xff]  ;;  %v3114_v7 = vld [vmem:[#allocation3 + $0x58] sm:$0xff]  ;;  %v234_v19 = vmax.f32 %v170_v60, %v218_v61 }
  0x30   :  { %265 = vst [vmem:[#allocation2 + $0xe0] sm:$0x1] %v2928_v0  ;;  %2700 = vmatpush.msra.mxu2 %v555_v21  ;;  %704 = vmatpush.msra.mxu0 %v555_v21  ;;  %v610_v56 = vld [vmem:[#allocation11 + $0x1e0] sm:$0xff]  ;;  %v3107_v2 = vld [vmem:[#allocation9 + $0x8] sm:$0xff]  ;;  %v3116_v8 = vld [vmem:[#allocation6 + $0x58] sm:$0xff]  ;;  %v210_v10 = vmax.f32 %v3081_v50, %v3083_v51 }
  0x31   :  { %266 = vst [vmem:[#allocation2 + $0xf0] sm:$0x1] %v2928_v0  ;;  %2716 = vmatpush.msra.mxu3 %v571_v22  ;;  %769 = vmatpush.msra.mxu1 %v571_v22  ;;  %v594_v62 = vld [vmem:[#allocation11 + $0x160] sm:$0xff]  ;;  %v627_v6 = vld [vmem:[#allocation11 + $0x268] sm:$0xff]  ;;  %v189_v11 = vld [vmem:[#allocation8 + $0x58] sm:$0xff] }
  0x32   :  { %267 = vst [vmem:[#allocation2 + $0x100] sm:$0x1] %v2928_v0  ;;  %2701 = vmatpush.msra.mxu2 %v554_v23  ;;  %705 = vmatpush.msra.mxu0 %v554_v23  ;;  %v205_v12 = vld [vmem:[#allocation9 + $0x58] sm:$0xff]  ;;  %v3123_v13 = vld [vmem:[#allocation3 + $0x10] sm:$0xff]  ;;  %v626_v22 = vld [vmem:[#allocation11 + $0x260] sm:$0xff]  ;;  %v163_v23 = vmax.f32 %v3096_v59, %v3103_v63 }
  0x33   :  { %268 = vst [vmem:[#allocation2 + $0x110] sm:$0x1] %v2928_v0  ;;  %2717 = vmatpush.msra.mxu3 %v570_v24  ;;  %770 = vmatpush.msra.mxu1 %v570_v24  ;;  %v148_v16 = vld [vmem:[#allocation6 + $0x10] sm:$0xff]  ;;  %v593_v20 = vld [vmem:[#allocation11 + $0x158] sm:$0xff]  ;;  %v211_v24 = vmax.f32 %v3105_v1, %v3107_v2  ;;  %v142_v37 = vld [vmem:[#allocation3 + $0x60] sm:$0xff] }
  0x34   :  { %269 = vst [vmem:[#allocation2 + $0x120] sm:$0x1] %v2928_v0  ;;  %2702 = vmatpush.msra.mxu2 %v553_v25  ;;  %706 = vmatpush.msra.mxu0 %v553_v25  ;;  %v180_v17 = vld [vmem:[#allocation8 + $0x10] sm:$0xff]  ;;  %v235_v25 = vmax.f32 %v171_v3, %v219_v4  ;;  %v158_v38 = vld [vmem:[#allocation6 + $0x60] sm:$0xff]  ;;  %v133_v44 = vld [vmem:[#allocation3 + $0x18] sm:$0xff] }
  0x35   :  { %272 = vst [vmem:[#allocation2 + $0x19] sm:$0x1] %v2928_v0  ;;  %2718 = vmatpush.msra.mxu3 %v569_v26  ;;  %771 = vmatpush.msra.mxu1 %v569_v26  ;;  %v196_v18 = vld [vmem:[#allocation9 + $0x10] sm:$0xff]  ;;  %v190_v39 = vld [vmem:[#allocation8 + $0x60] sm:$0xff]  ;;  %v174_v42 = vmax.f32 %v142_v37, %v158_v38  ;;  %v149_v45 = vld [vmem:[#allocation6 + $0x18] sm:$0xff] }
  0x36   :  { %273 = vst [vmem:[#allocation2 + $0x29] sm:$0x1] %v2928_v0  ;;  %2703 = vmatpush.msra.mxu2 %v552_v27  ;;  %707 = vmatpush.msra.mxu0 %v552_v27  ;;  %v592_v21 = vld [vmem:[#allocation11 + $0x150] sm:$0xff]  ;;  %v607_v27 = vld [vmem:[#allocation11 + $0x1c8] sm:$0xff]  ;;  %v206_v43 = vld [vmem:[#allocation9 + $0x60] sm:$0xff]  ;;  %v165_v49 = vmax.f32 %v133_v44, %v149_v45 }
  0x37   :  { %274 = vst [vmem:[#allocation2 + $0x39] sm:$0x1] %v2928_v0  ;;  %2719 = vmatpush.msra.mxu3 %v568_v28  ;;  %772 = vmatpush.msra.mxu1 %v568_v28  ;;  %v608_v26 = vld [vmem:[#allocation11 + $0x1d0] sm:$0xff]  ;;  %v625_v28 = vld [vmem:[#allocation11 + $0x258] sm:$0xff]  ;;  %v222_v48 = vmax.f32 %v190_v39, %v206_v43  ;;  %v590_v55 = vld [vmem:[#allocation11 + $0x140] sm:$0xff] }
  0x38   :  { %275 = vst [vmem:[#allocation2 + $0x49] sm:$0x1] %v2928_v0  ;;  %2704 = vmatpush.msra.mxu2 %v551_v29  ;;  %708 = vmatpush.msra.mxu0 %v551_v29  ;;  %v173_v29 = vmax.f32 %v3114_v7, %v3116_v8  ;;  %v181_v50 = vld [vmem:[#allocation8 + $0x18] sm:$0xff]  ;;  %v623_v3 = vld [vmem:[#allocation11 + $0x248] sm:$0xff]  ;;  %v588_v4 = vld [vmem:[#allocation11 + $0x130] sm:$0xff] }
  0x39   :  { %276 = vst [vmem:[#allocation2 + $0x59] sm:$0x1] %v2928_v0  ;;  %2720 = vmatpush.msra.mxu3 %v567_v30  ;;  %773 = vmatpush.msra.mxu1 %v567_v30  ;;  %v221_v30 = vmax.f32 %v189_v11, %v205_v12  ;;  %v197_v51 = vld [vmem:[#allocation9 + $0x18] sm:$0xff]  ;;  %v238_v60 = vmax.f32 %v174_v42, %v222_v48  ;;  %v159_v7 = vld [vmem:[#allocation6 + $0x68] sm:$0xff]  ;;  %v586_v37 = vld [vmem:[#allocation11 + $0x120] sm:$0xff] }
  0x3a   :  { %277 = vst [vmem:[#allocation2 + $0x69] sm:$0x1] %v2928_v0  ;;  %2705 = vmatpush.msra.mxu2 %v550_v31  ;;  %709 = vmatpush.msra.mxu0 %v550_v31  ;;  %v226_v31 = vmax.f32 %v162_v9, %v210_v10  ;;  %v213_v54 = vmax.f32 %v181_v50, %v197_v51  ;;  %v605_v63 = vld [vmem:[#allocation11 + $0x1b8] sm:$0xff]  ;;  %v191_v11 = vld [vmem:[#allocation8 + $0x68] sm:$0xff]  ;;  %v620_v42 = vld [vmem:[#allocation11 + $0x230] sm:$0xff] }
  0x3b   :  { %278 = vst [vmem:[#allocation2 + $0x79] sm:$0x1] %v2928_v0  ;;  %2721 = vmatpush.msra.mxu3 %v566_v32  ;;  %734 = vmatmul.f32.vlgmr.msra.gmra.mxu2 %v3056_v33  ;;  %v644_v48 = vld [vmem:[#allocation11 + $0x2f0] sm:$0xff]  ;;  %v198_v50 = vld [vmem:[#allocation9 + $0x20] sm:$0xff] }
  0x3c   :  { %279 = vst [vmem:[#allocation2 + $0x89] sm:$0x1] %v2928_v0  ;;  %824 = vmatpush.msrb.mxu2 %v597_v34  ;;  %774 = vmatpush.msra.mxu1 %v566_v32  ;;  %v591_v32 = vld [vmem:[#allocation11 + $0x148] sm:$0xff]  ;;  %v624_v34 = vld [vmem:[#allocation11 + $0x250] sm:$0xff]  ;;  %v229_v1 = vmax.f32 %v165_v49, %v213_v54  ;;  %v182_v49 = vld [vmem:[#allocation8 + $0x20] sm:$0xff] }
  0x3d   :  { %282 = vst [vmem:[#allocation2 + $0xb9] sm:$0x1] %v2928_v0  ;;  %889 = vmatpush.msrb.mxu3 %v613_v35  ;;  %954 = vmatpush.msrb.mxu0 %v629_v47  ;;  %v164_v35 = vmax.f32 %v3123_v13, %v148_v16  ;;  %v227_v47 = vmax.f32 %v163_v23, %v211_v24  ;;  %v192_v54 = vld [vmem:[#allocation8 + $0x70] sm:$0xff] }
  0x3e   :  { %283 = vst [vmem:[#allocation2 + $0xc9] sm:$0x1] %v2928_v0  ;;  %825 = vmatpush.msrb.mxu2 %v596_v41  ;;  %v236_v41 = vmax.f32 %v172_v14, %v220_v15  ;;  %v622_v14 = vld [vmem:[#allocation11 + $0x240] sm:$0xff]  ;;  %v214_v51 = vmax.f32 %v182_v49, %v198_v50  ;;  %v599_v49 = vld [vmem:[#allocation11 + $0x188] sm:$0xff] }
  0x3f   :  { %284 = vst [vmem:[#allocation2 + $0xd9] sm:$0x1] %v2928_v0  ;;  %890 = vmatpush.msrb.mxu3 %v612_v36  ;;  %955 = vmatpush.msrb.mxu0 %v628_v53  ;;  %v212_v36 = vmax.f32 %v180_v17, %v196_v18  ;;  %v237_v53 = vmax.f32 %v173_v29, %v221_v30  ;;  %v207_v18 = vld [vmem:[#allocation9 + $0x68] sm:$0xff] }
  0x40   :  { %285 = vst [vmem:[#allocation2 + $0xe9] sm:$0x1] %v2928_v0  ;;  %826 = vmatpush.msrb.mxu2 %v595_v52  ;;  %v223_v24 = vmax.f32 %v191_v11, %v207_v18  ;;  %v603_v30 = vld [vmem:[#allocation11 + $0x1a8] sm:$0xff]  ;;  %v618_v18 = vld [vmem:[#allocation11 + $0x220] sm:$0xff] }
  0x41   :  { %286 = vst [vmem:[#allocation2 + $0xf9] sm:$0x1] %v2928_v0  ;;  %891 = vmatpush.msrb.mxu3 %v611_v46  ;;  %956 = vmatpush.msrb.mxu0 %v627_v6  ;;  %v228_v57 = vmax.f32 %v164_v35, %v212_v36  ;;  %v143_v6 = vld [vmem:[#allocation3 + $0x68] sm:$0xff]  ;;  %v621_v36 = vld [vmem:[#allocation11 + $0x238] sm:$0xff] }
  0x42   :  { %287 = vst [vmem:[#allocation2 + $0x109] sm:$0x1] %v2928_v0  ;;  %827 = vmatpush.msrb.mxu2 %v594_v62  ;;  %v589_v62 = vld [vmem:[#allocation11 + $0x138] sm:$0xff]  ;;  %v175_v15 = vmax.f32 %v143_v6, %v159_v7  ;;  %v619_v6 = vld [vmem:[#allocation11 + $0x228] sm:$0xff]  ;;  %v642_v7 = vld [vmem:[#allocation11 + $0x2e0] sm:$0xff] }
  0x43   :  { %288 = vst [vmem:[#allocation2 + $0x119] sm:$0x1] %v2928_v0  ;;  %892 = vmatpush.msrb.mxu3 %v610_v56  ;;  %957 = vmatpush.msrb.mxu0 %v626_v22  ;;  %v606_v56 = vld [vmem:[#allocation11 + $0x1c0] sm:$0xff] }
  0x44   :  { %289 = vst [vmem:[#allocation2 + $0x129] sm:$0x1] %v2928_v0  ;;  %828 = vmatpush.msrb.mxu2 %v593_v20 }
  0x45   :  { %281 = vst [vmem:[#allocation2 + $0xa9] sm:$0x1] %v2928_v0  ;;  %893 = vmatpush.msrb.mxu3 %v609_v5  ;;  %958 = vmatpush.msrb.mxu0 %v625_v28  ;;  %v604_v5 = vld [vmem:[#allocation11 + $0x1b0] sm:$0xff] }
  0x46   :  { %251 = vst [vmem:[#allocation2] sm:$0x1] %v2928_v0  ;;  %829 = vmatpush.msrb.mxu2 %v592_v21 }
  0x47   :  { %260 = vst [vmem:[#allocation2 + $0x90] sm:$0x1] %v2928_v0  ;;  %894 = vmatpush.msrb.mxu3 %v608_v26  ;;  %959 = vmatpush.msrb.mxu0 %v624_v34  ;;  %v239_v26 = vmax.f32 %v175_v15, %v223_v24  ;;  %v183_v24 = vld [vmem:[#allocation8 + $0x28] sm:$0xff] }
  0x48   :  { %270 = vst [vmem:[#allocation2 + $0x130] sm:$0x1] %v2928_v0  ;;  %830 = vmatpush.msrb.mxu2 %v591_v32  ;;  %v150_v32 = vld [vmem:[#allocation6 + $0x20] sm:$0xff] }
  0x49   :  { %271 = vst [vmem:[#allocation2 + $0x9] sm:$0x1] %v2928_v0  ;;  %895 = vmatpush.msrb.mxu3 %v607_v27  ;;  %960 = vmatpush.msrb.mxu0 %v623_v3 }
  0x4a   :  { %280 = vst [vmem:[#allocation2 + $0x99] sm:$0x1] %v2928_v0  ;;  %831 = vmatpush.msrb.mxu2 %v590_v55 }
  0x4b   :  { %290 = vst [vmem:[#allocation2 + $0x139] sm:$0x1] %v2928_v0  ;;  %896 = vmatpush.msrb.mxu3 %v606_v56  ;;  %961 = vmatpush.msrb.mxu0 %v622_v14  ;;  %v208_v56 = vld [vmem:[#allocation9 + $0x70] sm:$0xff] }
  0x4c   :  { %v3142_v46 = vld [vmem:[#allocation2 + $0xa8] sm:$0x3]  ;;  %300 = vst [vmem:[#allocation2 + $0xb1] sm:$0xff] %v234_v19  ;;  %832 = vmatpush.msrb.mxu2 %v589_v62 }
  0x4d   :  { %v406_v52 = vrot.slane %v3142_v46, 1  ;;  %v3145_v0 = vld [vmem:[#allocation2] sm:$0xff]  ;;  %301 = vst [vmem:[#allocation2 + $0xc1] sm:$0xff] %v235_v25  ;;  %897 = vmatpush.msrb.mxu3 %v605_v63  ;;  %v587_v25 = vld [vmem:[#allocation11 + $0x128] sm:$0xff]  ;;  %962 = vmatpush.msrb.mxu0 %v621_v36  ;;  %v184_v36 = vld [vmem:[#allocation8 + $0x30] sm:$0xff] }
  0x4e   :  { %710 = vmatmul.f32.vlgmr.msra.gmra.mxu0 %v3145_v0  ;;  %292 = vst [vmem:[#allocation2 + $0x11] sm:$0xff] %v226_v31  ;;  %v381_v59 = vrot.slane %v3145_v0, 1  ;;  %833 = vmatpush.msrb.mxu2 %v588_v4  ;;  %v134_v31 = vld [vmem:[#allocation3 + $0x20] sm:$0xff]  ;;  %v643_v62 = vld [vmem:[#allocation11 + $0x2e8] sm:$0xff] }
  0x4f   :  { %v407_v58 = vsel %vm380_vm0, %v405_v40, %v406_v52  ;;  %302 = vst [vmem:[#allocation2 + $0xd1] sm:$0xff] %v236_v41  ;;  %898 = vmatpush.msrb.mxu3 %v604_v5  ;;  %v645_v40 = vld [vmem:[#allocation11 + $0x2f8] sm:$0xff]  ;;  %v602_v41 = vld [vmem:[#allocation11 + $0x1a0] sm:$0xff]  ;;  %v166_v43 = vmax.f32 %v134_v31, %v150_v32  ;;  %v144_v52 = vld [vmem:[#allocation3 + $0x70] sm:$0xff]  ;;  %963 = vmatpush.msrb.mxu0 %v620_v42 }
  0x50   :  { %799 = vmatmul.f32.vlgmr.msra.gmra.mxu3 %v407_v58  ;;  %v3150_v61 = vld [vmem:[#allocation2 + $0x8] sm:$0x3]  ;;  %293 = vst [vmem:[#allocation2 + $0x21] sm:$0xff] %v227_v47  ;;  %834 = vmatpush.msrb.mxu2 %v587_v25  ;;  %v152_v32 = vld [vmem:[#allocation6 + $0x30] sm:$0xff] }
  0x51   :  { %v382_v2 = vrot.slane %v3150_v61, 1  ;;  %303 = vst [vmem:[#allocation2 + $0xe1] sm:$0xff] %v237_v53  ;;  %899 = vmatpush.msrb.mxu3 %v603_v30  ;;  %1019 = vmatpush.msrb.mxu1 %v645_v40  ;;  %v160_v53 = vld [vmem:[#allocation6 + $0x70] sm:$0xff]  ;;  %v151_v58 = vld [vmem:[#allocation6 + $0x28] sm:$0xff]  ;;  %v230_v63 = vmax.f32 %v166_v43, %v214_v51 }
  0x52   :  { %294 = vst [vmem:[#allocation2 + $0x31] sm:$0xff] %v228_v57  ;;  %835 = vmatpush.msrb.mxu2 %v586_v37  ;;  %v176_v55 = vmax.f32 %v144_v52, %v160_v53  ;;  %v135_v57 = vld [vmem:[#allocation3 + $0x28] sm:$0xff]  ;;  %964 = vmatpush.msrb.mxu0 %v619_v6  ;;  %v200_v37 = vld [vmem:[#allocation9 + $0x30] sm:$0xff] }
  0x53   :  { %v3153_v8 = vld [vmem:[#allocation2 + $0xb0] sm:$0xff]  ;;  %v3155_v9 = vld [vmem:[#allocation2 + $0xb8] sm:$0x3]  ;;  %v383_v10 = vsel %vm380_vm0, %v381_v59, %v382_v2  ;;  %304 = vst [vmem:[#allocation2 + $0xf1] sm:$0xff] %v238_v60  ;;  %900 = vmatpush.msrb.mxu3 %v602_v41  ;;  %1020 = vmatpush.msrb.mxu1 %v644_v48  ;;  %v224_v2 = vmax.f32 %v192_v54, %v208_v56  ;;  %v199_v25 = vld [vmem:[#allocation9 + $0x28] sm:$0xff] }
  0x54   :  { %737 = vmatmul.f32.gmra.mxu2 %v3153_v8  ;;  %v408_v12 = vrot.slane %v3153_v8, 1  ;;  %v409_v13 = vrot.slane %v3155_v9, 1  ;;  %775 = vmatmul.f32.vlgmr.msra.gmra.mxu1 %v383_v10  ;;  %295 = vst [vmem:[#allocation2 + $0x41] sm:$0xff] %v229_v1  ;;  %v3168_v20 = vld [vmem:[#allocation2 + $0xc0] sm:$0xff]  ;;  %v3170_v21 = vld [vmem:[#allocation2 + $0xc8] sm:$0x3]  ;;  %v215_v31 = vmax.f32 %v183_v24, %v199_v25  ;;  %v216_v42 = vmax.f32 %v184_v36, %v200_v37 }
  0x55   :  { %v3161_v16 = vld [vmem:[#allocation2 + $0x10] sm:$0xff]  ;;  %v3163_v17 = vld [vmem:[#allocation2 + $0x18] sm:$0x3]  ;;  %v411_v27 = vrot.slane %v3168_v20, 1  ;;  %v412_v28 = vrot.slane %v3170_v21, 1  ;;  %305 = vst [vmem:[#allocation2 + $0x101] sm:$0xff] %v239_v26  ;;  %1021 = vmatpush.msrb.mxu1 %v643_v62  ;;  %v240_v14 = vmax.f32 %v176_v55, %v224_v2  ;;  %965 = vmatpush.msrb.mxu0 %v618_v18 }
  0x56   :  { %v3166_v19 = vsel %vm380_vm0, %v408_v12, %v409_v13  ;;  %713 = vmatmul.f32.gmra.mxu0 %v3161_v16  ;;  %v384_v22 = vrot.slane %v3161_v16, 1  ;;  %v385_v23 = vrot.slane %v3163_v17, 1  ;;  %v3187_v38 = vld [vmem:[#allocation2 + $0xd0] sm:$0xff]  ;;  %v3189_v39 = vld [vmem:[#allocation2 + $0xd8] sm:$0x3]  ;;  %296 = vst [vmem:[#allocation2 + $0x51] sm:$0xff] %v230_v63 }
  0x57   :  { %v3181_v34 = vld [vmem:[#allocation2 + $0x20] sm:$0xff]  ;;  %v3183_v35 = vld [vmem:[#allocation2 + $0x28] sm:$0x3]  ;;  %v3192_v44 = vsel %vm380_vm0, %v411_v27, %v412_v28  ;;  %v585_v60 = vld [vmem:[#allocation11 + $0x118] sm:$0xff]  ;;  %v414_v3 = vrot.slane %v3187_v38, 1  ;;  %v415_v4 = vrot.slane %v3189_v39, 1  ;;  %1022 = vmatpush.msrb.mxu1 %v642_v7 }
  0x58   :  { %802 = vmatmul.f32.gmra.mxu3 %v3166_v19  ;;  %v3179_v29 = vsel %vm380_vm0, %v384_v22, %v385_v23  ;;  %v387_v45 = vrot.slane %v3181_v34, 1  ;;  %v388_v47 = vrot.slane %v3183_v35, 1  ;;  %v601_v1 = vld [vmem:[#allocation11 + $0x198] sm:$0xff]  ;;  %836 = vmatpush.msrb.mxu2 %v585_v60  ;;  %v584_v10 = vld [vmem:[#allocation11 + $0x110] sm:$0xff]  ;;  %v3207_v15 = vld [vmem:[#allocation2 + $0xe0] sm:$0xff]  ;;  %v167_v23 = vmax.f32 %v135_v57, %v151_v58  ;;  %306 = vst [vmem:[#allocation2 + $0x111] sm:$0xff] %v240_v14 }
  0x59   :  { %v3198_v59 = vld [vmem:[#allocation2 + $0x30] sm:$0xff]  ;;  %v3205_v11 = vld [vmem:[#allocation2 + $0x38] sm:$0x3]  ;;  %901 = vmatpush.msrb.mxu3 %v601_v1  ;;  %v3212_v27 = vsel %vm380_vm0, %v414_v3, %v415_v4  ;;  %v3216_v40 = vld [vmem:[#allocation2 + $0xe8] sm:$0x3] }
  0x5a   :  { %v3203_v5 = vsel %vm380_vm0, %v387_v45, %v388_v47  ;;  %v641_v12 = vld [vmem:[#allocation11 + $0x2d8] sm:$0xff]  ;;  %v600_v13 = vld [vmem:[#allocation11 + $0x190] sm:$0xff]  ;;  %837 = vmatpush.msrb.mxu2 %v584_v10  ;;  %v390_v28 = vrot.slane %v3198_v59, 1  ;;  %v391_v30 = vrot.slane %v3205_v11, 1  ;;  %v231_v43 = vmax.f32 %v167_v23, %v215_v31  ;;  %v583_v47 = vld [vmem:[#allocation11 + $0x108] sm:$0xff] }
  0x5b   :  { %v640_v22 = vld [vmem:[#allocation11 + $0x2d0] sm:$0xff]  ;;  %1023 = vmatpush.msrb.mxu1 %v641_v12  ;;  %902 = vmatpush.msrb.mxu3 %v600_v13  ;;  %v417_v45 = vrot.slane %v3207_v15, 1  ;;  %v639_v48 = vld [vmem:[#allocation11 + $0x2c8] sm:$0xff]  ;;  %v418_v51 = vrot.slane %v3216_v40, 1  ;;  %v3225_v53 = vld [vmem:[#allocation2 + $0x40] sm:$0xff] }
  0x5c   :  { %740 = vmatmul.f32.gmra.mxu2 %v3168_v20  ;;  %778 = vmatmul.f32.gmra.mxu1 %v3179_v29  ;;  %v136_v26 = vld [vmem:[#allocation3 + $0x30] sm:$0xff]  ;;  %v3223_v52 = vsel %vm380_vm0, %v390_v28, %v391_v30  ;;  %v3227_v54 = vld [vmem:[#allocation2 + $0x48] sm:$0x3]  ;;  %297 = vst [vmem:[#allocation2 + $0x61] sm:$0xff] %v231_v43  ;;  %v617_v55 = vld [vmem:[#allocation11 + $0x218] sm:$0xff]  ;;  %v393_v3 = vrot.slane %v3225_v53, 1 }
  0x5d   :  { %v168_v41 = vmax.f32 %v136_v26, %v152_v32  ;;  %1024 = vmatpush.msrb.mxu1 %v640_v22  ;;  %838 = vmatpush.msrb.mxu2 %v583_v47  ;;  %v638_v56 = vld [vmem:[#allocation11 + $0x2c0] sm:$0xff]  ;;  %v637_v58 = vld [vmem:[#allocation11 + $0x2b8] sm:$0xff]  ;;  %v616_v62 = vld [vmem:[#allocation11 + $0x210] sm:$0xff]  ;;  %v3232_v2 = vsel %vm380_vm0, %v417_v45, %v418_v51  ;;  %v394_v4 = vrot.slane %v3227_v54, 1 }
  0x5e   :  { %716 = vmatmul.f32.gmra.mxu0 %v3181_v34  ;;  %903 = vmatpush.msrb.mxu3 %v599_v49  ;;  %v582_v57 = vld [vmem:[#allocation11 + $0x100] sm:$0xff]  ;;  %v636_v63 = vld [vmem:[#allocation11 + $0x2b0] sm:$0xff]  ;;  %v661_v1 = vld [vmem:[#allocation11 + $0x378] sm:$0xff] }
  0x5f   :  { %v232_v50 = vmax.f32 %v168_v41, %v216_v42  ;;  %1025 = vmatpush.msrb.mxu1 %v639_v48  ;;  %966 = vmatpush.msrb.mxu0 %v617_v55  ;;  %v598_v60 = vld [vmem:[#allocation11 + $0x180] sm:$0xff]  ;;  %v3236_v6 = vld [vmem:[#allocation2 + $0xf0] sm:$0xff]  ;;  %v3238_v7 = vld [vmem:[#allocation2 + $0xf8] sm:$0x3]  ;;  %v3245_v18 = vsel %vm380_vm0, %v393_v3, %v394_v4 }
  0x60   :  { %805 = vmatmul.f32.gmra.mxu3 %v3192_v44  ;;  %839 = vmatpush.msrb.mxu2 %v582_v57  ;;  %v635_v10 = vld [vmem:[#allocation11 + $0x2a8] sm:$0xff]  ;;  %v420_v13 = vrot.slane %v3236_v6, 1  ;;  %v421_v14 = vrot.slane %v3238_v7, 1  ;;  %v3247_v22 = vld [vmem:[#allocation2 + $0x50] sm:$0xff]  ;;  %v3249_v23 = vld [vmem:[#allocation2 + $0x58] sm:$0x3] }
  0x61   :  { %298 = vst [vmem:[#allocation2 + $0x71] sm:$0xff] %v232_v50  ;;  %1026 = vmatpush.msrb.mxu1 %v638_v56  ;;  %904 = vmatpush.msrb.mxu3 %v598_v60  ;;  %v615_v12 = vld [vmem:[#allocation11 + $0x208] sm:$0xff]  ;;  %v677_v24 = vld [vmem:[#allocation11 + $0x3f8] sm:$0xff]  ;;  %v634_v25 = vld [vmem:[#allocation11 + $0x2a0] sm:$0xff]  ;;  %v396_v36 = vrot.slane %v3247_v22, 1  ;;  %v397_v37 = vrot.slane %v3249_v23, 1 }
  0x62   :  { %1084 = vmatpush.msra.mxu2 %v661_v1  ;;  %967 = vmatpush.msrb.mxu0 %v616_v62  ;;  %v633_v26 = vld [vmem:[#allocation11 + $0x298] sm:$0xff]  ;;  %v614_v28 = vld [vmem:[#allocation11 + $0x200] sm:$0xff]  ;;  %v632_v30 = vld [vmem:[#allocation11 + $0x290] sm:$0xff]  ;;  %v3254_v32 = vsel %vm380_vm0, %v420_v13, %v421_v14 }
  0x63   :  { %1027 = vmatpush.msrb.mxu1 %v637_v58  ;;  %1149 = vmatpush.msra.mxu3 %v677_v24  ;;  %v660_v31 = vld [vmem:[#allocation11 + $0x370] sm:$0xff]  ;;  %v3258_v41 = vld [vmem:[#allocation2 + $0x100] sm:$0xff]  ;;  %v3260_v42 = vld [vmem:[#allocation2 + $0x108] sm:$0x3]  ;;  %v3267_v51 = vsel %vm380_vm0, %v396_v36, %v397_v37 }
  0x64   :  { %743 = vmatmul.f32.gmra.mxu2 %v3187_v38  ;;  %781 = vmatmul.f32.gmra.mxu1 %v3203_v5  ;;  %v631_v43 = vld [vmem:[#allocation11 + $0x288] sm:$0xff]  ;;  %v676_v45 = vld [vmem:[#allocation11 + $0x3f0] sm:$0xff]  ;;  %v693_v47 = vld [vmem:[#allocation11 + $0x478] sm:$0xff]  ;;  %v423_v49 = vrot.slane %v3258_v41, 1  ;;  %v424_v50 = vrot.slane %v3260_v42, 1 }
  0x65   :  { %1028 = vmatpush.msrb.mxu1 %v636_v63  ;;  %968 = vmatpush.msrb.mxu0 %v615_v12  ;;  %v630_v48 = vld [vmem:[#allocation11 + $0x280] sm:$0xff]  ;;  %v3271_v56 = vld [vmem:[#allocation2 + $0x68] sm:$0x3]  ;;  %v3280_v63 = vld [vmem:[#allocation2 + $0x110] sm:$0xff] }
  0x66   :  { %719 = vmatmul.f32.gmra.mxu0 %v3198_v59  ;;  %1085 = vmatpush.msra.mxu2 %v660_v31  ;;  %v3269_v55 = vld [vmem:[#allocation2 + $0x60] sm:$0xff]  ;;  %v659_v57 = vld [vmem:[#allocation11 + $0x368] sm:$0xff]  ;;  %v3276_v58 = vsel %vm380_vm0, %v423_v49, %v424_v50  ;;  %v400_v62 = vrot.slane %v3271_v56, 1  ;;  %v3282_v1 = vld [vmem:[#allocation2 + $0x118] sm:$0x3] }
  0x67   :  { %1029 = vmatpush.msrb.mxu1 %v635_v10  ;;  %969 = vmatpush.msrb.mxu0 %v614_v28  ;;  %v399_v60 = vrot.slane %v3269_v55, 1  ;;  %v675_v3 = vld [vmem:[#allocation11 + $0x3e8] sm:$0xff]  ;;  %v692_v4 = vld [vmem:[#allocation11 + $0x470] sm:$0xff]  ;;  %v426_v10 = vrot.slane %v3280_v63, 1  ;;  %v427_v12 = vrot.slane %v3282_v1, 1  ;;  %v673_v49 = vld [vmem:[#allocation11 + $0x3d8] sm:$0xff] }
  0x68   :  { %808 = vmatmul.f32.gmra.mxu3 %v3212_v27  ;;  %1086 = vmatpush.msra.mxu2 %v659_v57  ;;  %v3291_v14 = vld [vmem:[#allocation2 + $0x70] sm:$0xff]  ;;  %v3293_v24 = vld [vmem:[#allocation2 + $0x78] sm:$0x3]  ;;  %v691_v37 = vld [vmem:[#allocation11 + $0x468] sm:$0xff] }
  0x69   :  { %1030 = vmatpush.msrb.mxu1 %v634_v25  ;;  %1150 = vmatpush.msra.mxu3 %v676_v45  ;;  %v3289_v13 = vsel %vm380_vm0, %v399_v60, %v400_v62  ;;  %v446_v25 = vrot.slane %v3145_v0, 2  ;;  %v3299_v28 = vsel %vm380_vm0, %v426_v10, %v427_v12  ;;  %v402_v31 = vrot.slane %v3291_v14, 1  ;;  %v674_v0 = vld [vmem:[#allocation11 + $0x3e0] sm:$0xff]  ;;  %v656_v60 = vld [vmem:[#allocation11 + $0x350] sm:$0xff]  ;;  %v137_v12 = vld [vmem:[#allocation3 + $0x38] sm:$0xff] }
  0x6a   :  { %1214 = vmatpush.msra.mxu0 %v693_v47  ;;  %v403_v36 = vrot.slane %v3293_v24, 1  ;;  %v449_v47 = vrot.slane %v3161_v16, 2  ;;  %v690_v50 = vld [vmem:[#allocation11 + $0x460] sm:$0xff]  ;;  %v452_v62 = vrot.slane %v3181_v34, 2  ;;  %v455_v10 = vrot.slane %v3198_v59, 2 }
  0x6b   :  { %1031 = vmatpush.msrb.mxu1 %v633_v26  ;;  %1151 = vmatpush.msra.mxu3 %v675_v3  ;;  %v658_v26 = vld [vmem:[#allocation11 + $0x360] sm:$0xff]  ;;  %v453_v3 = vrot.slane %v3183_v35, 2  ;;  %v456_v35 = vrot.slane %v3205_v11, 2 }
  0x6c   :  { %746 = vmatmul.f32.gmra.mxu2 %v3207_v15  ;;  %784 = vmatmul.f32.gmra.mxu1 %v3223_v52  ;;  %v3308_v45 = vsel %vm380_vm0, %v402_v31, %v403_v36  ;;  %v201_v31 = vld [vmem:[#allocation9 + $0x38] sm:$0xff]  ;;  %v654_v11 = vld [vmem:[#allocation11 + $0x340] sm:$0xff] }
  0x6d   :  { %1032 = vmatpush.msrb.mxu1 %v632_v30  ;;  %1215 = vmatpush.msra.mxu0 %v692_v4  ;;  %v447_v30 = vrot.slane %v3150_v61, 2  ;;  %v657_v61 = vld [vmem:[#allocation11 + $0x358] sm:$0xff]  ;;  %v655_v4 = vld [vmem:[#allocation11 + $0x348] sm:$0xff] }
  0x6e   :  { %722 = vmatmul.f32.gmra.mxu0 %v3225_v53  ;;  %1087 = vmatpush.msra.mxu2 %v658_v26  ;;  %v185_v26 = vld [vmem:[#allocation8 + $0x38] sm:$0xff] }
  0x6f   :  { %1033 = vmatpush.msrb.mxu1 %v631_v43  ;;  %v448_v43 = vsel %vm445_vm1, %v446_v25, %v447_v30  ;;  %1152 = vmatpush.msra.mxu3 %v674_v0  ;;  %v153_v25 = vld [vmem:[#allocation6 + $0x38] sm:$0xff]  ;;  %v217_v36 = vmax.f32 %v185_v26, %v201_v31  ;;  %v671_v0 = vld [vmem:[#allocation11 + $0x3c8] sm:$0xff]  ;;  %v468_v31 = vrot.slane %v3293_v24, 2  ;;  %v650_v24 = vld [vmem:[#allocation11 + $0x320] sm:$0xff] }
  0x70   :  { %811 = vmatmul.f32.gmra.mxu3 %v3232_v2  ;;  %1216 = vmatpush.msra.mxu0 %v691_v37  ;;  %v169_v30 = vmax.f32 %v137_v12, %v153_v25  ;;  %v688_v37 = vld [vmem:[#allocation11 + $0x450] sm:$0xff]  ;;  %v685_v12 = vld [vmem:[#allocation11 + $0x438] sm:$0xff] }
  0x71   :  { %1034 = vmatpush.msrb.mxu1 %v630_v48  ;;  %v450_v48 = vrot.slane %v3163_v17, 2  ;;  %1088 = vmatpush.msra.mxu2 %v657_v61  ;;  %v672_v17 = vld [vmem:[#allocation11 + $0x3d0] sm:$0xff] }
  0x72   :  { %1153 = vmatpush.msra.mxu3 %v673_v49  ;;  %1217 = vmatpush.msra.mxu0 %v690_v50  ;;  %v233_v61 = vmax.f32 %v169_v30, %v217_v36  ;;  %v670_v49 = vld [vmem:[#allocation11 + $0x3c0] sm:$0xff]  ;;  %v687_v50 = vld [vmem:[#allocation11 + $0x448] sm:$0xff] }
  0x73   :  { %v451_v57 = vsel %vm445_vm1, %v449_v47, %v450_v48  ;;  %1089 = vmatpush.msra.mxu2 %v656_v60  ;;  %v458_v47 = vrot.slane %v3225_v53, 2  ;;  %v459_v48 = vrot.slane %v3227_v54, 2  ;;  %v653_v60 = vld [vmem:[#allocation11 + $0x338] sm:$0xff]  ;;  %v462_v54 = vrot.slane %v3249_v23, 2  ;;  %v651_v30 = vld [vmem:[#allocation11 + $0x328] sm:$0xff] }
  0x74   :  { %749 = vmatmul.f32.gmra.mxu2 %v3236_v6  ;;  %787 = vmatmul.f32.gmra.mxu1 %v3245_v18  ;;  %299 = vst [vmem:[#allocation2 + $0x81] sm:$0xff] %v233_v61  ;;  %v465_v23 = vrot.slane %v3271_v56, 2  ;;  %v467_v56 = vrot.slane %v3291_v14, 2  ;;  %v667_v61 = vld [vmem:[#allocation11 + $0x3a8] sm:$0xff] }
  0x75   :  { %1154 = vmatpush.msra.mxu3 %v672_v17  ;;  %1090 = vmatpush.msra.mxu2 %v655_v4  ;;  %v686_v17 = vld [vmem:[#allocation11 + $0x440] sm:$0xff]  ;;  %v652_v4 = vld [vmem:[#allocation11 + $0x330] sm:$0xff] }
  0x76   :  { %725 = vmatmul.f32.gmra.mxu0 %v3247_v22 }
  0x77   :  { %1155 = vmatpush.msra.mxu3 %v671_v0  ;;  %1091 = vmatpush.msra.mxu2 %v654_v11  ;;  %v684_v11 = vld [vmem:[#allocation11 + $0x430] sm:$0xff] }
  0x78   :  { %814 = vmatmul.f32.gmra.mxu3 %v3254_v32 }
  0x79   :  { %1156 = vmatpush.msra.mxu3 %v670_v49  ;;  %1092 = vmatpush.msra.mxu2 %v653_v60  ;;  %v470_v49 = vrot.slane %v3056_v33, 2 }
  0x7b   :  { %1093 = vmatpush.msra.mxu2 %v652_v4  ;;  %v325_v26 = vld [vmem:[#allocation2 + $0x88] sm:$0x3]  ;;  %v3363_v36 = vld [vmem:[#allocation2 + $0x80] sm:$0xff] }
  0x7c   :  { %752 = vmatmul.f32.gmra.mxu2 %v3258_v41  ;;  %790 = vmatmul.f32.gmra.mxu1 %v3267_v51  ;;  %v514_v0 = vrot.slane %v3363_v36, 1  ;;  %v522_v60 = vrot.slane %v3363_v36, 2 }
  0x7d   :  { %1094 = vmatpush.msra.mxu2 %v651_v30 }
  0x7e   :  { %728 = vmatmul.f32.gmra.mxu0 %v3269_v55 }
  0x7f   :  { %1095 = vmatpush.msra.mxu2 %v650_v24 }
  0x80   :  { %817 = vmatmul.f32.gmra.mxu3 %v3276_v58 }
  0x84   :  { %755 = vmatmul.f32.gmra.mxu2 %v3280_v63  ;;  %793 = vmatmul.f32.gmra.mxu1 %v3289_v13 }
  0x86   :  { %731 = vmatmul.f32.gmra.mxu0 %v3291_v14 }
  0x88   :  { %820 = vmatmul.f32.gmra.mxu3 %v3299_v28 }
  0x8c   :  { %840 = vmatmul.f32.vlgmr.msrb.gmra.mxu2 %v448_v43  ;;  %796 = vmatmul.f32.gmra.mxu1 %v3308_v45  ;;  %v3330_v43 = vsel %vm445_vm1, %v455_v10, %v456_v35  ;;  %v464_v10 = vrot.slane %v3269_v55, 2  ;;  %v668_v35 = vld [vmem:[#allocation11 + $0x3b0] sm:$0xff] }
  0x8e   :  { %970 = vmatmul.f32.vlgmr.msrb.gmra.mxu0 %v3179_v29  ;;  %v3321_v29 = vsel %vm445_vm1, %v452_v62, %v453_v3  ;;  %v461_v62 = vrot.slane %v3247_v22, 2  ;;  %v669_v3 = vld [vmem:[#allocation11 + $0x3b8] sm:$0xff]  ;;  %v3357_v25 = vsel %vm445_vm1, %v464_v10, %v465_v23  ;;  %v473_v23 = vrot.slane %v3153_v8, 2 }
  0x8f   :  { %1157 = vmatpush.msra.mxu3 %v669_v3  ;;  %v683_v3 = vld [vmem:[#allocation11 + $0x428] sm:$0xff] }
  0x90   :  { %905 = vmatmul.f32.vlgmr.msrb.gmra.mxu3 %v3161_v16  ;;  %v689_v16 = vld [vmem:[#allocation11 + $0x458] sm:$0xff] }
  0x91   :  { %1218 = vmatpush.msra.mxu0 %v689_v16  ;;  %v3348_v16 = vsel %vm445_vm1, %v461_v62, %v462_v54  ;;  %1158 = vmatpush.msra.mxu3 %v668_v35  ;;  %v523_v62 = vrot.slane %v325_v26, 2  ;;  %v666_v54 = vld [vmem:[#allocation11 + $0x3a0] sm:$0xff]  ;;  %v474_v35 = vrot.slane %v3155_v9, 2  ;;  %v476_v9 = vrot.slane %v3168_v20, 2 }
  0x93   :  { %1219 = vmatpush.msra.mxu0 %v688_v37  ;;  %v515_v37 = vrot.slane %v325_v26, 1  ;;  %1159 = vmatpush.msra.mxu3 %v667_v61  ;;  %v3383_v4 = vsel %vm445_vm1, %v522_v60, %v523_v62  ;;  %v682_v26 = vld [vmem:[#allocation11 + $0x420] sm:$0xff]  ;;  %v475_v30 = vsel %vm445_vm1, %v473_v23, %v474_v35  ;;  %v664_v61 = vld [vmem:[#allocation11 + $0x390] sm:$0xff]  ;;  %v479_v62 = vrot.slane %v3187_v38, 2 }
  0x94   :  { %843 = vmatmul.f32.gmra.mxu2 %v451_v57  ;;  %1035 = vmatmul.f32.vlgmr.msrb.gmra.mxu1 %v451_v57  ;;  %v3339_v57 = vsel %vm445_vm1, %v458_v47, %v459_v48  ;;  %v3369_v47 = vsel %vm445_vm1, %v467_v56, %v468_v31 }
  0x95   :  { %1220 = vmatpush.msra.mxu0 %v687_v50  ;;  %v3372_v48 = vsel %vm380_vm0, %v514_v0, %v515_v37  ;;  %v471_v50 = vrot.slane %v3142_v46, 2  ;;  %1160 = vmatpush.msra.mxu3 %v666_v54  ;;  %v649_v46 = vld [vmem:[#allocation11 + $0x318] sm:$0xff]  ;;  %v648_v37 = vld [vmem:[#allocation11 + $0x310] sm:$0xff] }
  0x96   :  { %973 = vmatmul.f32.gmra.mxu0 %v3203_v5  ;;  %1096 = vmatpush.msra.mxu2 %v649_v46  ;;  %v145_v54 = vld [vmem:[#allocation3 + $0x78] sm:$0xff] }
  0x97   :  { %1221 = vmatpush.msra.mxu0 %v686_v17  ;;  %v472_v17 = vsel %vm445_vm1, %v470_v49, %v471_v50 }
  0x98   :  { %908 = vmatmul.f32.gmra.mxu3 %v3181_v34  ;;  %1097 = vmatpush.msra.mxu2 %v648_v37 }
  0x99   :  { %1222 = vmatpush.msra.mxu0 %v685_v12  ;;  %v665_v12 = vld [vmem:[#allocation11 + $0x398] sm:$0xff] }
  0x9a   :  { %1161 = vmatpush.msra.mxu3 %v665_v12  ;;  %v663_v12 = vld [vmem:[#allocation11 + $0x388] sm:$0xff] }
  0x9b   :  { %1223 = vmatpush.msra.mxu0 %v684_v11  ;;  %v681_v11 = vld [vmem:[#allocation11 + $0x418] sm:$0xff] }
  0x9c   :  { %846 = vmatmul.f32.gmra.mxu2 %v3321_v29  ;;  %1038 = vmatmul.f32.gmra.mxu1 %v3321_v29 }
  0x9d   :  { %1224 = vmatpush.msra.mxu0 %v683_v3  ;;  %1162 = vmatpush.msra.mxu3 %v664_v61  ;;  %v161_v3 = vld [vmem:[#allocation6 + $0x78] sm:$0xff] }
  0x9e   :  { %976 = vmatmul.f32.gmra.mxu0 %v3223_v52  ;;  %v177_v46 = vmax.f32 %v145_v54, %v161_v3  ;;  %v486_v3 = vrot.slane %v3238_v7, 2  ;;  %v488_v7 = vrot.slane %v3258_v41, 2 }
  0x9f   :  { %1225 = vmatpush.msra.mxu0 %v682_v26  ;;  %v680_v26 = vld [vmem:[#allocation11 + $0x410] sm:$0xff]  ;;  %1163 = vmatpush.msra.mxu3 %v663_v12 }
  0xa0   :  { %911 = vmatmul.f32.gmra.mxu3 %v3198_v59 }
  0xa1   :  { %1226 = vmatpush.msra.mxu0 %v681_v11  ;;  %v662_v11 = vld [vmem:[#allocation11 + $0x380] sm:$0xff] }
  0xa2   :  { %1164 = vmatpush.msra.mxu3 %v662_v11 }
  0xa3   :  { %1227 = vmatpush.msra.mxu0 %v680_v26  ;;  %v489_v26 = vrot.slane %v3260_v42, 2  ;;  %v491_v42 = vrot.slane %v3280_v63, 2 }
  0xa4   :  { %849 = vmatmul.f32.gmra.mxu2 %v3330_v43  ;;  %1041 = vmatmul.f32.gmra.mxu1 %v3330_v43 }
  0xa6   :  { %979 = vmatmul.f32.gmra.mxu0 %v3245_v18 }
  0xa8   :  { %914 = vmatmul.f32.gmra.mxu3 %v3225_v53 }
  0xac   :  { %852 = vmatmul.f32.gmra.mxu2 %v3339_v57  ;;  %1044 = vmatmul.f32.gmra.mxu1 %v3339_v57 }
  0xae   :  { %982 = vmatmul.f32.gmra.mxu0 %v3267_v51 }
  0xb0   :  { %917 = vmatmul.f32.gmra.mxu3 %v3247_v22 }
  0xb4   :  { %855 = vmatmul.f32.gmra.mxu2 %v3348_v16  ;;  %1047 = vmatmul.f32.gmra.mxu1 %v3348_v16 }
  0xb6   :  { %985 = vmatmul.f32.gmra.mxu0 %v3289_v13 }
  0xb8   :  { %920 = vmatmul.f32.gmra.mxu3 %v3269_v55 }
  0xbc   :  { %858 = vmatmul.f32.gmra.mxu2 %v3357_v25  ;;  %1050 = vmatmul.f32.gmra.mxu1 %v3357_v25 }
  0xbe   :  { %988 = vmatmul.f32.gmra.mxu0 %v3308_v45  ;;  %v735_v10 = vpop.f32.mrf.mxu2 }
  0xc0   :  { %923 = vmatmul.f32.gmra.mxu3 %v3291_v14 }
  0xc4   :  { %861 = vmatmul.f32.gmra.mxu2 %v3369_v47  ;;  %1053 = vmatmul.f32.gmra.mxu1 %v3369_v47 }
  0xc6   :  { %991 = vmatmul.f32.gmra.mxu0 %v3372_v48 }
  0xc8   :  { %926 = vmatmul.f32.gmra.mxu3 %v3363_v36 }
  0xcb   :  { %v3385_v33 = vpop.f32.mrf.mxu0 }
  0xcc   :  { %864 = vmatmul.f32.gmra.mxu2 %v472_v17  ;;  %1056 = vmatmul.f32.gmra.mxu1 %v3383_v4  ;;  %v193_v17 = vld [vmem:[#allocation8 + $0x78] sm:$0xff] }
  0xce   :  { %994 = vmatmul.f32.gmra.mxu0 %v3166_v19  ;;  %v477_v19 = vrot.slane %v3170_v21, 2  ;;  %v647_v21 = vld [vmem:[#allocation11 + $0x308] sm:$0xff] }
  0xcf   :  { %1098 = vmatpush.msra.mxu2 %v647_v21 }
  0xd0   :  { %929 = vmatmul.f32.gmra.mxu3 %v3153_v8  ;;  %v3402_v24 = vsel %vm445_vm1, %v476_v9, %v477_v19  ;;  %v646_v19 = vld [vmem:[#allocation11 + $0x300] sm:$0xff] }
  0xd1   :  { %1099 = vmatpush.msra.mxu2 %v646_v19 }
  0xd3   :  { %v800_v56 = vpop.f32.mrf.mxu3  ;;  %v3393_v31 = vpop.f32.mrf.mxu0 }
  0xd4   :  { %v3395_v0 = vadd.f32 %v800_v56, %v735_v10  ;;  %867 = vmatmul.f32.gmra.mxu2 %v475_v30  ;;  %1059 = vmatmul.f32.gmra.mxu1 %v475_v30  ;;  %v209_v10 = vld [vmem:[#allocation9 + $0x78] sm:$0xff] }
  0xd5   :  { %v225_v35 = vmax.f32 %v193_v17, %v209_v10 }
  0xd6   :  { %997 = vmatmul.f32.gmra.mxu0 %v3192_v44 }
  0xd7   :  { %v738_v8 = vpop.f32.mrf.mxu2 }
  0xd8   :  { %932 = vmatmul.f32.gmra.mxu3 %v3168_v20  ;;  %v480_v20 = vrot.slane %v3189_v39, 2  ;;  %v241_v39 = vmax.f32 %v177_v46, %v225_v35  ;;  %v678_v46 = vld [vmem:[#allocation11 + $0x400] sm:$0xff] }
  0xda   :  { %v3415_v30 = vsel %vm445_vm1, %v479_v62, %v480_v20  ;;  %307 = vst [vmem:[#allocation2 + $0x121] sm:$0xff] %v241_v39 }
  0xdb   :  { %v803_v49 = vpop.f32.mrf.mxu3  ;;  %v3404_v50 = vpop.f32.mrf.mxu0 }
  0xdc   :  { %v3406_v60 = vadd.f32 %v803_v49, %v738_v8  ;;  %870 = vmatmul.f32.gmra.mxu2 %v3402_v24  ;;  %1062 = vmatmul.f32.gmra.mxu1 %v3402_v24  ;;  %v483_v8 = vrot.slane %v3216_v40, 2  ;;  %v679_v49 = vld [vmem:[#allocation11 + $0x408] sm:$0xff]  ;;  %v485_v40 = vrot.slane %v3236_v6, 2 }
  0xdd   :  { %1228 = vmatpush.msra.mxu0 %v679_v49  ;;  %v492_v49 = vrot.slane %v3282_v1, 2 }
  0xde   :  { %1000 = vmatmul.f32.gmra.mxu0 %v3212_v27  ;;  %v3441_v10 = vsel %vm445_vm1, %v485_v40, %v486_v3 }
  0xdf   :  { %v741_v23 = vpop.f32.mrf.mxu2  ;;  %1229 = vmatpush.msra.mxu0 %v678_v46  ;;  %v3470_v46 = vsel %vm445_vm1, %v491_v42, %v492_v49 }
  0xe0   :  { %935 = vmatmul.f32.gmra.mxu3 %v3187_v38  ;;  %v482_v38 = vrot.slane %v3207_v15, 2 }
  0xe1   :  { %v345_v11 = vld [vmem:[#allocation2 + $0x128] sm:$0x3] }
  0xe2   :  { %v3428_v21 = vsel %vm445_vm1, %v482_v38, %v483_v8  ;;  %v776_v8 = vpop.f32.mrf.mxu1 }
  0xe3   :  { %v806_v56 = vpop.f32.mrf.mxu3  ;;  %v3417_v37 = vpop.f32.mrf.mxu0 }
  0xe4   :  { %v3419_v9 = vadd.f32 %v806_v56, %v741_v23  ;;  %873 = vmatmul.f32.gmra.mxu2 %v3415_v30  ;;  %1065 = vmatmul.f32.gmra.mxu1 %v3415_v30  ;;  %v3454_v56 = vsel %vm445_vm1, %v488_v7, %v489_v26 }
  0xe6   :  { %1003 = vmatmul.f32.gmra.mxu0 %v3232_v2 }
  0xe7   :  { %v744_v61 = vpop.f32.mrf.mxu2 }
  0xe8   :  { %938 = vmatmul.f32.gmra.mxu3 %v3207_v15 }
  0xeb   :  { %v809_v62 = vpop.f32.mrf.mxu3  ;;  %v3430_v20 = vpop.f32.mrf.mxu0 }
  0xec   :  { %v3432_v54 = vadd.f32 %v809_v62, %v744_v61  ;;  %876 = vmatmul.f32.gmra.mxu2 %v3428_v21  ;;  %1068 = vmatmul.f32.gmra.mxu1 %v3428_v21  ;;  %v3464_v62 = vld [vmem:[#allocation2 + $0x120] sm:$0xff] }
  0xed   :  { %v517_v3 = vrot.slane %v3464_v62, 1 }
  0xee   :  { %4390 = vst [vmem:[#allocation20_spill] sm:$0xff] %v3432_v54  ;;  %1006 = vmatmul.f32.gmra.mxu0 %v3254_v32 }
  0xef   :  { %v747_v17 = vpop.f32.mrf.mxu2 }
  0xf0   :  { %941 = vmatmul.f32.gmra.mxu3 %v3236_v6 }
  0xf3   :  { %v812_v23 = vpop.f32.mrf.mxu3  ;;  %v3443_v35 = vpop.f32.mrf.mxu0 }
  0xf4   :  { %v3445_v12 = vadd.f32 %v812_v23, %v747_v17  ;;  %879 = vmatmul.f32.gmra.mxu2 %v3441_v10  ;;  %1071 = vmatmul.f32.gmra.mxu1 %v3441_v10  ;;  %v518_v17 = vrot.slane %v345_v11, 1 }
  0xf6   :  { %4391 = vst [vmem:[#allocation21_spill] sm:$0xff] %v3445_v12  ;;  %1009 = vmatmul.f32.gmra.mxu0 %v3276_v58  ;;  %v3475_v26 = vsel %vm380_vm0, %v517_v3, %v518_v17 }
  0xf7   :  { %v750_v39 = vpop.f32.mrf.mxu2 }
  0xf8   :  { %944 = vmatmul.f32.gmra.mxu3 %v3258_v41 }
  0xfb   :  { %v815_v19 = vpop.f32.mrf.mxu3  ;;  %v3456_v38 = vpop.f32.mrf.mxu0 }
  0xfc   :  { %v3458_v61 = vadd.f32 %v815_v19, %v750_v39  ;;  %882 = vmatmul.f32.gmra.mxu2 %v3454_v56  ;;  %1074 = vmatmul.f32.gmra.mxu1 %v3454_v56  ;;  %v525_v39 = vrot.slane %v3464_v62, 2  ;;  %v526_v19 = vrot.slane %v345_v11, 2 }
  0xfe   :  { %4392 = vst [vmem:[#allocation22_spill] sm:$0xff] %v3458_v61  ;;  %1012 = vmatmul.f32.gmra.mxu0 %v3299_v28  ;;  %v779_v61 = vpop.f32.mrf.mxu1  ;;  %v3485_v49 = vsel %vm445_vm1, %v525_v39, %v526_v19 }
  0xff   :  { %v753_v40 = vpop.f32.mrf.mxu2 }
 0x100   :  { %947 = vmatmul.f32.gmra.mxu3 %v3280_v63 }
 0x103   :  { %v818_v23 = vpop.f32.mrf.mxu3  ;;  %v3472_v7 = vpop.f32.mrf.mxu0 }
 0x104   :  { %v3477_v1 = vadd.f32 %v818_v23, %v753_v40  ;;  %885 = vmatmul.f32.gmra.mxu2 %v3470_v46  ;;  %1077 = vmatmul.f32.gmra.mxu1 %v3470_v46  ;;  %v777_v23 = vadd.f32 %v776_v8, %v3385_v33 }
 0x106   :  { %4393 = vst [vmem:[#allocation23_spill] sm:$0xff] %v3477_v1  ;;  %1015 = vmatmul.f32.gmra.mxu0 %v3475_v26  ;;  %v782_v1 = vpop.f32.mrf.mxu1 }
 0x107   :  { %v756_v42 = vpop.f32.mrf.mxu2 }
 0x108   :  { %950 = vmatmul.f32.gmra.mxu3 %v3464_v62 }
 0x10b   :  { %v821_v3 = vpop.f32.mrf.mxu3  ;;  %v971_v17 = vpop.f32.mrf.mxu0 }
 0x10c   :  { %v3487_v40 = vadd.f32 %v821_v3, %v756_v42  ;;  %1100 = vmatmul.f32.vlgmr.msra.gmra.mxu2 %v3181_v34  ;;  %1080 = vmatmul.f32.gmra.mxu1 %v3485_v49  ;;  %v780_v42 = vadd.f32 %v779_v61, %v3393_v31 }
 0x10e   :  { %4394 = vst [vmem:[#allocation24_spill] sm:$0xff] %v3487_v40  ;;  %1230 = vmatmul.f32.vlgmr.msra.gmra.mxu0 %v3321_v29  ;;  %v785_v33 = vpop.f32.mrf.mxu1 }
 0x10f   :  { %v841_v11 = vpop.f32.mrf.mxu2 }
 0x110   :  { %1165 = vmatmul.f32.vlgmr.msra.gmra.mxu3 %v3203_v5  ;;  %v842_v12 = vadd.f32 %v841_v11, %v777_v23  ;;  %v786_v23 = vadd.f32 %v785_v33, %v3417_v37 }
 0x113   :  { %v906_v54 = vpop.f32.mrf.mxu3  ;;  %v974_v39 = vpop.f32.mrf.mxu0 }
 0x114   :  { %v907_v19 = vadd.f32 %v906_v54, %v842_v12  ;;  %1103 = vmatmul.f32.gmra.mxu2 %v3198_v59  ;;  %v783_v54 = vadd.f32 %v782_v1, %v3404_v50 }
 0x116   :  { %v3496_v3 = vadd.f32 %v971_v17, %v907_v19  ;;  %1233 = vmatmul.f32.gmra.mxu0 %v3330_v43 }
 0x117   :  { %v844_v34 = vpop.f32.mrf.mxu2 }
 0x118   :  { %1168 = vmatmul.f32.gmra.mxu3 %v3223_v52  ;;  %v845_v29 = vadd.f32 %v844_v34, %v780_v42  ;;  %v788_v52 = vpop.f32.mrf.mxu1 }
 0x11b   :  { %v909_v8 = vpop.f32.mrf.mxu3  ;;  %v977_v40 = vpop.f32.mrf.mxu0 }
 0x11c   :  { %v910_v5 = vadd.f32 %v909_v8, %v845_v29  ;;  %1106 = vmatmul.f32.gmra.mxu2 %v3225_v53 }
 0x11e   :  { %v3502_v12 = vadd.f32 %v974_v39, %v910_v5  ;;  %1236 = vmatmul.f32.gmra.mxu0 %v3339_v57  ;;  %v789_v39 = vadd.f32 %v788_v52, %v3430_v20 }
 0x11f   :  { %v847_v59 = vpop.f32.mrf.mxu2 }
 0x120   :  { %1171 = vmatmul.f32.gmra.mxu3 %v3245_v18  ;;  %v848_v43 = vadd.f32 %v847_v59, %v783_v54  ;;  %v791_v19 = vpop.f32.mrf.mxu1 }
 0x121   :  { %v792_v34 = vadd.f32 %v791_v19, %v3443_v35  ;;  %v327_v35 = vld [vmem:[#allocation2 + $0x98] sm:$0x3]  ;;  %v2740_v19 = vld [vmem:[#allocation2 + $0xc0] sm:$0xff] }
 0x123   :  { %v912_v31 = vpop.f32.mrf.mxu3  ;;  %v980_v61 = vpop.f32.mrf.mxu0 }
 0x124   :  { %v913_v17 = vadd.f32 %v912_v31, %v848_v43  ;;  %1109 = vmatmul.f32.gmra.mxu2 %v3247_v22  ;;  %v543_v43 = vrot.slane %v327_v35, 2 }
 0x126   :  { %v3508_v11 = vadd.f32 %v977_v40, %v913_v17  ;;  %1239 = vmatmul.f32.gmra.mxu0 %v3348_v16 }
 0x127   :  { %v850_v53 = vpop.f32.mrf.mxu2 }
 0x128   :  { %1174 = vmatmul.f32.gmra.mxu3 %v3267_v51  ;;  %v851_v57 = vadd.f32 %v850_v53, %v786_v23  ;;  %v794_v20 = vpop.f32.mrf.mxu1 }
 0x129   :  { %v795_v5 = vadd.f32 %v794_v20, %v3456_v38 }
 0x12b   :  { %v915_v50 = vpop.f32.mrf.mxu3  ;;  %v983_v1 = vpop.f32.mrf.mxu0 }
 0x12c   :  { %v916_v18 = vadd.f32 %v915_v50, %v851_v57  ;;  %1112 = vmatmul.f32.gmra.mxu2 %v3269_v55 }
 0x12e   :  { %v3514_v42 = vadd.f32 %v980_v61, %v916_v18  ;;  %1242 = vmatmul.f32.gmra.mxu0 %v3357_v25  ;;  %v535_v61 = vrot.slane %v327_v35, 1 }
 0x12f   :  { %v853_v22 = vpop.f32.mrf.mxu2 }
 0x130   :  { %1177 = vmatmul.f32.gmra.mxu3 %v3289_v13  ;;  %v854_v16 = vadd.f32 %v853_v22, %v789_v39  ;;  %v797_v52 = vpop.f32.mrf.mxu1 }
 0x131   :  { %v798_v57 = vadd.f32 %v797_v52, %v3472_v7 }
 0x133   :  { %v918_v37 = vpop.f32.mrf.mxu3  ;;  %v986_v40 = vpop.f32.mrf.mxu0 }
 0x134   :  { %v919_v51 = vadd.f32 %v918_v37, %v854_v16  ;;  %1115 = vmatmul.f32.gmra.mxu2 %v3291_v14  ;;  %v326_v14 = vld [vmem:[#allocation2 + $0x90] sm:$0xff] }
 0x135   :  { %v534_v31 = vrot.slane %v326_v14, 1 }
 0x136   :  { %v3520_v29 = vadd.f32 %v983_v1, %v919_v51  ;;  %1245 = vmatmul.f32.gmra.mxu0 %v3369_v47  ;;  %v542_v47 = vrot.slane %v326_v14, 2 }
 0x137   :  { %v856_v55 = vpop.f32.mrf.mxu2  ;;  %v536_v53 = vsel %vm380_vm0, %v534_v31, %v535_v61 }
 0x138   :  { %1180 = vmatmul.f32.gmra.mxu3 %v3308_v45  ;;  %v857_v25 = vadd.f32 %v856_v55, %v792_v34 }
 0x13b   :  { %v921_v33 = vpop.f32.mrf.mxu3  ;;  %v989_v8 = vpop.f32.mrf.mxu0 }
 0x13c   :  { %v922_v13 = vadd.f32 %v921_v33, %v857_v25  ;;  %1118 = vmatmul.f32.gmra.mxu2 %v3363_v36  ;;  %v544_v36 = vsel %vm445_vm1, %v542_v47, %v543_v43  ;;  %v347_v33 = vld [vmem:[#allocation2 + $0x138] sm:$0x3] }
 0x13e   :  { %v3526_v54 = vadd.f32 %v986_v40, %v922_v13  ;;  %1248 = vmatmul.f32.gmra.mxu0 %v3383_v4  ;;  %v2741_v40 = vld [vmem:[#allocation2 + $0xd0] sm:$0xff]  ;;  %v546_v13 = vrot.slane %v347_v33, 2 }
 0x13f   :  { %v859_v59 = vpop.f32.mrf.mxu2 }
 0x140   :  { %1183 = vmatmul.f32.gmra.mxu3 %v3372_v48  ;;  %v860_v45 = vadd.f32 %v859_v59, %v795_v5 }
 0x143   :  { %v924_v17 = vpop.f32.mrf.mxu3  ;;  %v992_v23 = vpop.f32.mrf.mxu0 }
 0x144   :  { %v925_v38 = vadd.f32 %v924_v17, %v860_v45  ;;  %1121 = vmatmul.f32.gmra.mxu2 %v326_v14  ;;  %v538_v14 = vrot.slane %v347_v33, 1 }
 0x146   :  { %v3533_v4 = vadd.f32 %v989_v8, %v925_v38  ;;  %1251 = vmatmul.f32.gmra.mxu0 %v544_v36 }
 0x147   :  { %v862_v50 = vpop.f32.mrf.mxu2 }
 0x148   :  { %1186 = vmatmul.f32.gmra.mxu3 %v536_v53  ;;  %v863_v48 = vadd.f32 %v862_v50, %v798_v57 }
 0x14b   :  { %v927_v1 = vpop.f32.mrf.mxu3  ;;  %v3535_v18 = vpop.f32.mrf.mxu0 }
 0x14c   :  { %v928_v39 = vadd.f32 %v927_v1, %v863_v48  ;;  %1124 = vmatmul.f32.gmra.mxu2 %v2740_v19  ;;  %v1744_v48 = vld [vmem:[#allocation12 + $0x78] sm:$0xff] }
 0x14d   :  { %1873 = vmatpush.msra.mxu1 %v1744_v48  ;;  %v1741_v48 = vld [vmem:[#allocation12 + $0x60] sm:$0xff] }
 0x14e   :  { %v3537_v22 = vadd.f32 %v992_v23, %v928_v39  ;;  %1254 = vmatmul.f32.gmra.mxu0 %v3402_v24 }
 0x14f   :  { %v3540_v16 = vpop.f32.mrf.mxu2 }
 0x150   :  { %1189 = vmatmul.f32.gmra.mxu3 %v3192_v44 }
 0x153   :  { %v3543_v7 = vpop.f32.mrf.mxu3  ;;  %v3545_v37 = vpop.f32.mrf.mxu0 }
 0x154   :  { %1127 = vmatmul.f32.gmra.mxu2 %v2741_v40 }
 0x156   :  { %1257 = vmatmul.f32.gmra.mxu0 %v3415_v30 }
 0x157   :  { %v3548_v51 = vpop.f32.mrf.mxu2 }
 0x158   :  { %1192 = vmatmul.f32.gmra.mxu3 %v3212_v27 }
 0x15b   :  { %v3551_v34 = vpop.f32.mrf.mxu3  ;;  %v3553_v55 = vpop.f32.mrf.mxu0 }
 0x15c   :  { %1130 = vmatmul.f32.gmra.mxu2 %v3207_v15 }
 0x15e   :  { %1260 = vmatmul.f32.gmra.mxu0 %v3428_v21  ;;  %v3573_v21 = vpop.f32.mrf.mxu1 }
 0x15f   :  { %v3557_v44 = vpop.f32.mrf.mxu2 }
 0x160   :  { %1195 = vmatmul.f32.gmra.mxu3 %v3232_v2 }
 0x163   :  { %v3560_v24 = vpop.f32.mrf.mxu3  ;;  %v3562_v20 = vpop.f32.mrf.mxu0 }
 0x164   :  { %4395 = vst [vmem:[#allocation25_spill] sm:$0xff] %v3562_v20  ;;  %1133 = vmatmul.f32.gmra.mxu2 %v3236_v6 }
 0x166   :  { %1263 = vmatmul.f32.gmra.mxu0 %v3441_v10 }
 0x167   :  { %v3566_v27 = vpop.f32.mrf.mxu2 }
 0x168   :  { %1198 = vmatmul.f32.gmra.mxu3 %v3254_v32  ;;  %v3585_v32 = vpop.f32.mrf.mxu1 }
 0x16b   :  { %v3569_v30 = vpop.f32.mrf.mxu3  ;;  %v3571_v15 = vpop.f32.mrf.mxu0 }
 0x16c   :  { %4396 = vst [vmem:[#allocation26_spill] sm:$0xff] %v3571_v15  ;;  %1136 = vmatmul.f32.gmra.mxu2 %v3258_v41  ;;  %v1739_v15 = vld [vmem:[#allocation12 + $0x50] sm:$0xff] }
 0x16e   :  { %1266 = vmatmul.f32.gmra.mxu0 %v3454_v56 }
 0x16f   :  { %v3577_v2 = vpop.f32.mrf.mxu2 }
 0x170   :  { %4397 = vst [vmem:[#allocation27_spill] sm:$0xff] %v3577_v2  ;;  %1201 = vmatmul.f32.gmra.mxu3 %v3276_v58  ;;  %v346_v58 = vld [vmem:[#allocation2 + $0x130] sm:$0xff]  ;;  %v1042_v5 = vpop.f32.mrf.mxu1 }
 0x173   :  { %v3580_v6 = vpop.f32.mrf.mxu3  ;;  %v3582_v10 = vpop.f32.mrf.mxu0 }
 0x174   :  { %4398 = vst [vmem:[#allocation28_spill] sm:$0xff] %v3580_v6  ;;  %1139 = vmatmul.f32.gmra.mxu2 %v3280_v63  ;;  %v545_v63 = vrot.slane %v346_v58, 2  ;;  %v1037_v6 = vadd.f32 %v3573_v21, %v3496_v3  ;;  %v872_v3 = vadd.f32 %v3557_v44, %v3419_v9 }
 0x175   :  { %4399 = vst [vmem:[#allocation29_spill] sm:$0xff] %v3582_v10 }
 0x176   :  { %1269 = vmatmul.f32.gmra.mxu0 %v3470_v46  ;;  %v537_v46 = vrot.slane %v346_v58, 1  ;;  %v547_v59 = vsel %vm445_vm1, %v545_v63, %v546_v13 }
 0x177   :  { %v3588_v25 = vpop.f32.mrf.mxu2 }
 0x178   :  { %4400 = vst [vmem:[#allocation30_spill] sm:$0xff] %v3588_v25  ;;  %1204 = vmatmul.f32.gmra.mxu3 %v3299_v28  ;;  %v1045_v47 = vpop.f32.mrf.mxu1 }
 0x17b   :  { %v3591_v41 = vpop.f32.mrf.mxu3  ;;  %v3593_v56 = vpop.f32.mrf.mxu0 }
 0x17c   :  { %4401 = vst [vmem:[#allocation31_spill] sm:$0xff] %v3591_v41  ;;  %1142 = vmatmul.f32.gmra.mxu2 %v3464_v62  ;;  %v539_v62 = vsel %vm380_vm0, %v537_v46, %v538_v14  ;;  %v1742_v14 = vld [vmem:[#allocation12 + $0x68] sm:$0xff]  ;;  %v1040_v41 = vadd.f32 %v3585_v32, %v3502_v12  ;;  %v869_v32 = vadd.f32 %v3548_v51, %v3406_v60 }
 0x17d   :  { %4402 = vst [vmem:[#allocation32_spill] sm:$0xff] %v3593_v56 }
 0x17e   :  { %1272 = vmatmul.f32.gmra.mxu0 %v3485_v49  ;;  %v934_v51 = vadd.f32 %v3551_v34, %v869_v32  ;;  %v4416_v32 = vld [vmem:[#allocation27_spill] sm:$0xff] }
 0x17f   :  { %v3597_v8 = vpop.f32.mrf.mxu2 }
 0x180   :  { %4403 = vst [vmem:[#allocation33_spill] sm:$0xff] %v3597_v8  ;;  %1207 = vmatmul.f32.gmra.mxu3 %v3475_v26  ;;  %v1048_v52 = vpop.f32.mrf.mxu1  ;;  %v1740_v8 = vld [vmem:[#allocation12 + $0x58] sm:$0xff] }
 0x183   :  { %v3600_v28 = vpop.f32.mrf.mxu3  ;;  %v3602_v35 = vpop.f32.mrf.mxu0 }
 0x184   :  { %4404 = vst [vmem:[#allocation34_spill] sm:$0xff] %v3600_v28  ;;  %1145 = vmatmul.f32.gmra.mxu2 %v346_v58  ;;  %v1743_v58 = vld [vmem:[#allocation12 + $0x70] sm:$0xff] }
 0x185   :  { %4405 = vst [vmem:[#allocation35_spill] sm:$0xff] %v3602_v35  ;;  %1874 = vmatpush.msra.mxu1 %v1743_v58 }
 0x186   :  { %1275 = vmatmul.f32.gmra.mxu0 %v547_v59 }
 0x187   :  { %v3606_v49 = vpop.f32.mrf.mxu2  ;;  %1875 = vmatpush.msra.mxu1 %v1742_v14 }
 0x188   :  { %4406 = vst [vmem:[#allocation36_spill] sm:$0xff] %v3606_v49  ;;  %1210 = vmatmul.f32.gmra.mxu3 %v539_v62  ;;  %v1051_v38 = vpop.f32.mrf.mxu1 }
 0x189   :  { %1876 = vmatpush.msra.mxu1 %v1741_v48  ;;  %v1043_v48 = vadd.f32 %v1042_v5, %v3508_v11 }
 0x18b   :  { %v3608_v43 = vpop.f32.mrf.mxu3  ;;  %v3610_v45 = vpop.f32.mrf.mxu0  ;;  %1877 = vmatpush.msra.mxu1 %v1740_v8  ;;  %v866_v8 = vadd.f32 %v3540_v16, %v3395_v0  ;;  %v1052_v0 = vadd.f32 %v1051_v38, %v3526_v54 }
 0x18c   :  { %4407 = vst [vmem:[#allocation37_spill] sm:$0xff] %v3608_v43 }
 0x18d   :  { %1878 = vmatpush.msra.mxu1 %v1739_v15  ;;  %v931_v15 = vadd.f32 %v3543_v7, %v866_v8 }
 0x18f   :  { %v1101_v26 = vpop.f32.mrf.mxu2  ;;  %v996_v54 = vadd.f32 %v3535_v18, %v931_v15 }
 0x190   :  { %v1054_v39 = vpop.f32.mrf.mxu1  ;;  %v1102_v2 = vadd.f32 %v1101_v26, %v1037_v6 }
 0x191   :  { %v1055_v60 = vadd.f32 %v1054_v39, %v3533_v4 }
 0x193   :  { %v1166_v31 = vpop.f32.mrf.mxu3  ;;  %v3612_v61 = vpop.f32.mrf.mxu0 }
 0x194   :  { %v1167_v16 = vadd.f32 %v1166_v31, %v1102_v2 }
 0x197   :  { %v1104_v17 = vpop.f32.mrf.mxu2 }
 0x198   :  { %v1057_v63 = vpop.f32.mrf.mxu1  ;;  %v1105_v20 = vadd.f32 %v1104_v17, %v1040_v41 }
 0x19b   :  { %v1169_v23 = vpop.f32.mrf.mxu3  ;;  %v3614_v36 = vpop.f32.mrf.mxu0 }
 0x19c   :  { %v1170_v11 = vadd.f32 %v1169_v23, %v1105_v20  ;;  %v3655_v20 = vadd.f32 %v3610_v45, %v1167_v16 }
 0x19e   :  { %v3651_v9 = vadd.f32 %v3612_v61, %v1170_v11  ;;  %v4412_v61 = vld [vmem:[#allocation20_spill] sm:$0xff] }
 0x19f   :  { %v1107_v53 = vpop.f32.mrf.mxu2 }
 0x1a0   :  { %v1060_v43 = vpop.f32.mrf.mxu1  ;;  %v1301_v26 = vmul.f32 %v3651_v9, %v3651_v9 }
 0x1a1   :  { %v1061_v31 = vadd.f32 %v1060_v43, %v996_v54  ;;  %v1279_v43 = vadd.f32 %v3651_v9, %v3655_v20 }
 0x1a3   :  { %v1172_v57 = vpop.f32.mrf.mxu3  ;;  %v3616_v50 = vpop.f32.mrf.mxu0 }
 0x1a7   :  { %v1110_v1 = vpop.f32.mrf.mxu2 }
 0x1a8   :  { %v1063_v58 = vpop.f32.mrf.mxu1 }
 0x1ab   :  { %v1175_v19 = vpop.f32.mrf.mxu3  ;;  %v3618_v40 = vpop.f32.mrf.mxu0 }
 0x1af   :  { %v1113_v33 = vpop.f32.mrf.mxu2 }
 0x1b3   :  { %v1178_v13 = vpop.f32.mrf.mxu3  ;;  %v3620_v46 = vpop.f32.mrf.mxu0 }
 0x1b7   :  { %v1116_v59 = vpop.f32.mrf.mxu2 }
 0x1b8   :  { %v1117_v7 = vadd.f32 %v1116_v59, %v1052_v0 }
 0x1bb   :  { %v1181_v62 = vpop.f32.mrf.mxu3  ;;  %v3622_v35 = vpop.f32.mrf.mxu0 }
 0x1bc   :  { %4408 = vst [vmem:[#allocation38_spill] sm:$0xff] %v3622_v35  ;;  %v1108_v35 = vadd.f32 %v1107_v53, %v1043_v48  ;;  %v1182_v45 = vadd.f32 %v1181_v62, %v1117_v7 }
 0x1be   :  { %v3682_v39 = vadd.f32 %v3620_v46, %v1182_v45 }
 0x1bf   :  { %v1119_v49 = vpop.f32.mrf.mxu2 }
 0x1c0   :  { %v1305_v11 = vmul.f32 %v3682_v39, %v3682_v39 }
 0x1c3   :  { %v1184_v56 = vpop.f32.mrf.mxu3  ;;  %v3624_v28 = vpop.f32.mrf.mxu0  ;;  %v4414_v62 = vld [vmem:[#allocation38_spill] sm:$0xff] }
 0x1c4   :  { %4409 = vst [vmem:[#allocation39_spill] sm:$0xff] %v3624_v28  ;;  %v1046_v28 = vadd.f32 %v1045_v47, %v3514_v42  ;;  %v1173_v42 = vadd.f32 %v1172_v57, %v1108_v35  ;;  %v937_v47 = vadd.f32 %v3560_v24, %v872_v3  ;;  %v999_v24 = vadd.f32 %v3545_v37, %v934_v51 }
 0x1c6   :  { %v1111_v21 = vadd.f32 %v1110_v1, %v1046_v28  ;;  %v3658_v2 = vadd.f32 %v3614_v36, %v1173_v42  ;;  %v1058_v28 = vadd.f32 %v1057_v63, %v3537_v22  ;;  %v1002_v35 = vadd.f32 %v3553_v55, %v937_v47 }
 0x1c7   :  { %v1122_v10 = vpop.f32.mrf.mxu2  ;;  %v1300_v22 = vmul.f32 %v3655_v20, %v3655_v20  ;;  %v1064_v53 = vadd.f32 %v1063_v58, %v999_v24 }
 0x1c8   :  { %v1176_v44 = vadd.f32 %v1175_v19, %v1111_v21  ;;  %v1302_v37 = vmul.f32 %v3658_v2, %v3658_v2  ;;  %v4417_v21 = vld [vmem:[#allocation25_spill] sm:$0xff] }
 0x1ca   :  { %v3666_v18 = vadd.f32 %v3616_v50, %v1176_v44 }
 0x1cb   :  { %v3628_v25 = vpop.f32.mrf.mxu3  ;;  %v3630_v14 = vpop.f32.mrf.mxu0  ;;  %v4418_v16 = vld [vmem:[#allocation39_spill] sm:$0xff] }
 0x1cc   :  { %4410 = vst [vmem:[#allocation40_spill] sm:$0xff] %v3628_v25  ;;  %v1049_v25 = vadd.f32 %v1048_v52, %v3520_v29  ;;  %v1738_v29 = vld [vmem:[#allocation12 + $0x48] sm:$0xff]  ;;  %v875_v52 = vadd.f32 %v3566_v27, %v4412_v61  ;;  %v1737_v27 = vld [vmem:[#allocation12 + $0x40] sm:$0xff]  ;;  %v1303_v1 = vmul.f32 %v3666_v18, %v3666_v18 }
 0x1cd   :  { %4411 = vst [vmem:[#allocation41_spill] sm:$0xff] %v3630_v14  ;;  %v1066_v14 = vpop.f32.mrf.mxu1  ;;  %1879 = vmatpush.msra.mxu1 %v1738_v29 }
 0x1ce   :  { %v1114_v6 = vadd.f32 %v1113_v33, %v1049_v25  ;;  %v1120_v25 = vadd.f32 %v1119_v49, %v1055_v60  ;;  %v1123_v49 = vadd.f32 %v1122_v10, %v1058_v28  ;;  %v1067_v50 = vadd.f32 %v1066_v14, %v1002_v35 }
 0x1cf   :  { %v1125_v12 = vpop.f32.mrf.mxu2  ;;  %v1316_v10 = vadd.f32 %v1301_v26, %v1300_v22  ;;  %1880 = vmatpush.msra.mxu1 %v1737_v27  ;;  %v940_v19 = vadd.f32 %v3569_v30, %v875_v52 }
 0x1d0   :  { %v1179_v4 = vadd.f32 %v1178_v13, %v1114_v6  ;;  %v1185_v23 = vadd.f32 %v1184_v56, %v1120_v25  ;;  %v1126_v57 = vadd.f32 %v1125_v12, %v1061_v31  ;;  %v1280_v56 = vadd.f32 %v1279_v43, %v3658_v2  ;;  %v4415_v12 = vld [vmem:[#allocation21_spill] sm:$0xff]  ;;  %v4420_v25 = vld [vmem:[#allocation28_spill] sm:$0xff]  ;;  %v4423_v43 = vld [vmem:[#allocation30_spill] sm:$0xff] }
 0x1d1   :  { %v1317_v13 = vadd.f32 %v1316_v10, %v1302_v37  ;;  %v878_v30 = vadd.f32 %v4416_v32, %v4415_v12  ;;  %v1005_v15 = vadd.f32 %v4417_v21, %v940_v19 }
 0x1d2   :  { %v3675_v55 = vadd.f32 %v3618_v40, %v1179_v4  ;;  %v3690_v58 = vadd.f32 %v4414_v62, %v1185_v23  ;;  %v1281_v48 = vadd.f32 %v1280_v56, %v3666_v18  ;;  %v1736_v4 = vld [vmem:[#allocation12 + $0x38] sm:$0xff] }
 0x1d3   :  { %v1190_v41 = vpop.f32.mrf.mxu3  ;;  %v3645_v5 = vpop.f32.mrf.mxu0  ;;  %v4413_v40 = vld [vmem:[#allocation40_spill] sm:$0xff]  ;;  %v1318_v3 = vadd.f32 %v1317_v13, %v1303_v1  ;;  %1881 = vmatpush.msra.mxu1 %v1736_v4  ;;  %v4424_v13 = vld [vmem:[#allocation31_spill] sm:$0xff] }
 0x1d4   :  { %v1188_v33 = vadd.f32 %v4413_v40, %v1123_v49  ;;  %v1304_v59 = vmul.f32 %v3675_v55, %v3675_v55  ;;  %v1191_v46 = vadd.f32 %v1190_v41, %v1126_v57  ;;  %v1282_v0 = vadd.f32 %v1281_v48, %v3675_v55  ;;  %v4419_v44 = vld [vmem:[#allocation41_spill] sm:$0xff]  ;;  %v1735_v40 = vld [vmem:[#allocation12 + $0x30] sm:$0xff] }
 0x1d5   :  { %v1069_v17 = vpop.f32.mrf.mxu1  ;;  %v1306_v41 = vmul.f32 %v3690_v58, %v3690_v58  ;;  %1882 = vmatpush.msra.mxu1 %v1735_v40 }
 0x1d6   :  { %v3700_v42 = vadd.f32 %v4418_v16, %v1188_v33  ;;  %v1319_v60 = vadd.f32 %v1318_v3, %v1304_v59  ;;  %v1283_v47 = vadd.f32 %v1282_v0, %v3682_v39  ;;  %v3706_v7 = vadd.f32 %v4419_v44, %v1191_v46  ;;  %v4427_v0 = vld [vmem:[#allocation33_spill] sm:$0xff] }
 0x1d7   :  { %v1128_v34 = vpop.f32.mrf.mxu2  ;;  %v1070_v35 = vadd.f32 %v1069_v17, %v1005_v15  ;;  %v4426_v15 = vld [vmem:[#allocation23_spill] sm:$0xff] }
 0x1d8   :  { %v1129_v63 = vadd.f32 %v1128_v34, %v1064_v53  ;;  %v943_v34 = vadd.f32 %v4420_v25, %v878_v30  ;;  %v1320_v24 = vadd.f32 %v1319_v60, %v1305_v11  ;;  %v1284_v26 = vadd.f32 %v1283_v47, %v3690_v58  ;;  %v4422_v53 = vld [vmem:[#allocation22_spill] sm:$0xff]  ;;  %v4425_v11 = vld [vmem:[#allocation29_spill] sm:$0xff] }
 0x1d9   :  { %v1307_v45 = vmul.f32 %v3700_v42, %v3700_v42  ;;  %v1308_v22 = vmul.f32 %v3706_v7, %v3706_v7  ;;  %v881_v57 = vadd.f32 %v4423_v43, %v4422_v53  ;;  %v884_v16 = vadd.f32 %v4427_v0, %v4426_v15 }
 0x1da   :  { %v1321_v61 = vadd.f32 %v1320_v24, %v1306_v41  ;;  %v1285_v49 = vadd.f32 %v1284_v26, %v3700_v42 }
 0x1db   :  { %v1193_v36 = vpop.f32.mrf.mxu3  ;;  %v1261_v38 = vpop.f32.mrf.mxu0  ;;  %v946_v59 = vadd.f32 %v4424_v13, %v881_v57 }
 0x1dc   :  { %v1194_v6 = vadd.f32 %v1193_v36, %v1129_v63  ;;  %v4421_v36 = vld [vmem:[#allocation26_spill] sm:$0xff]  ;;  %v1322_v27 = vadd.f32 %v1321_v61, %v1307_v45  ;;  %v4430_v45 = vld [vmem:[#allocation24_spill] sm:$0xff] }
 0x1dd   :  { %v1072_v28 = vpop.f32.mrf.mxu1  ;;  %v1008_v17 = vadd.f32 %v4421_v36, %v943_v34  ;;  %v1011_v21 = vadd.f32 %v4425_v11, %v946_v59  ;;  %v4431_v61 = vld [vmem:[#allocation36_spill] sm:$0xff]  ;;  %v1758_v59 = vld [vmem:[#allocation12 + $0xe8] sm:$0xff] }
 0x1de   :  { %v3713_v31 = vadd.f32 %v3645_v5, %v1194_v6  ;;  %v1323_v1 = vadd.f32 %v1322_v27, %v1308_v22  ;;  %v1760_v27 = vld [vmem:[#allocation12 + $0xf8] sm:$0xff]  ;;  %v1773_v11 = vld [vmem:[#allocation12 + $0x160] sm:$0xff] }
 0x1df   :  { %v1131_v14 = vpop.f32.mrf.mxu2  ;;  %v1073_v33 = vadd.f32 %v1072_v28, %v1008_v17  ;;  %v4432_v17 = vld [vmem:[#allocation37_spill] sm:$0xff]  ;;  %1938 = vmatpush.msrb.mxu2 %v1760_v27 }
 0x1e0   :  { %v1132_v8 = vadd.f32 %v1131_v14, %v1067_v50  ;;  %v1286_v50 = vadd.f32 %v1285_v49, %v3706_v7  ;;  %v1309_v5 = vmul.f32 %v3713_v31, %v3713_v31 }
 0x1e2   :  { %v1287_v19 = vadd.f32 %v1286_v50, %v3713_v31  ;;  %v1324_v62 = vadd.f32 %v1323_v1, %v1309_v5 }
 0x1e3   :  { %v1196_v51 = vpop.f32.mrf.mxu3  ;;  %v1264_v29 = vpop.f32.mrf.mxu0 }
 0x1e4   :  { %v1197_v54 = vadd.f32 %v1196_v51, %v1132_v8 }
 0x1e5   :  { %v1075_v46 = vpop.f32.mrf.mxu1 }
 0x1e6   :  { %v3718_v37 = vadd.f32 %v1261_v38, %v1197_v54  ;;  %v1076_v51 = vadd.f32 %v1075_v46, %v1011_v21  ;;  %v1757_v46 = vld [vmem:[#allocation12 + $0xe0] sm:$0xff] }
 0x1e7   :  { %v1134_v52 = vpop.f32.mrf.mxu2 }
 0x1e8   :  { %v1135_v23 = vadd.f32 %v1134_v52, %v1070_v35  ;;  %v1310_v38 = vmul.f32 %v3718_v37, %v3718_v37  ;;  %v1288_v14 = vadd.f32 %v1287_v19, %v3718_v37  ;;  %v4429_v35 = vld [vmem:[#allocation32_spill] sm:$0xff]  ;;  %v887_v52 = vadd.f32 %v4431_v61, %v4430_v45  ;;  %v1759_v19 = vld [vmem:[#allocation12 + $0xf0] sm:$0xff] }
 0x1e9   :  { %1939 = vmatpush.msrb.mxu2 %v1759_v19 }
 0x1ea   :  { %v1325_v12 = vadd.f32 %v1324_v62, %v1310_v38  ;;  %v952_v53 = vadd.f32 %v4432_v17, %v887_v52  ;;  %v1776_v38 = vld [vmem:[#allocation12 + $0x178] sm:$0xff]  ;;  %v1775_v62 = vld [vmem:[#allocation12 + $0x170] sm:$0xff]  ;;  %v1750_v17 = vld [vmem:[#allocation12 + $0xa8] sm:$0xff] }
 0x1eb   :  { %v1199_v10 = vpop.f32.mrf.mxu3  ;;  %v1267_v63 = vpop.f32.mrf.mxu0  ;;  %2003 = vmatpush.msrb.mxu3 %v1776_v38  ;;  %1940 = vmatpush.msrb.mxu2 %v1758_v59  ;;  %v1751_v52 = vld [vmem:[#allocation12 + $0xb0] sm:$0xff]  ;;  %v1734_v59 = vld [vmem:[#allocation12 + $0x28] sm:$0xff] }
 0x1ec   :  { %v1200_v56 = vadd.f32 %v1199_v10, %v1135_v23  ;;  %1883 = vmatpush.msra.mxu1 %v1734_v59  ;;  %v1807_v59 = vld [vmem:[#allocation12 + $0x270] sm:$0xff] }
 0x1ed   :  { %v1078_v24 = vpop.f32.mrf.mxu1  ;;  %2004 = vmatpush.msrb.mxu3 %v1775_v62  ;;  %1941 = vmatpush.msrb.mxu2 %v1757_v46  ;;  %v1747_v62 = vld [vmem:[#allocation12 + $0x90] sm:$0xff] }
 0x1ee   :  { %v3731_v48 = vadd.f32 %v1264_v29, %v1200_v56  ;;  %v4428_v29 = vld [vmem:[#allocation34_spill] sm:$0xff]  ;;  %v4433_v56 = vld [vmem:[#allocation35_spill] sm:$0xff] }
 0x1ef   :  { %v1137_v8 = vpop.f32.mrf.mxu2  ;;  %v949_v47 = vadd.f32 %v4428_v29, %v884_v16  ;;  %v1017_v40 = vadd.f32 %v4433_v56, %v952_v53  ;;  %v1755_v16 = vld [vmem:[#allocation12 + $0xd0] sm:$0xff]  ;;  %v1754_v29 = vld [vmem:[#allocation12 + $0xc8] sm:$0xff]  ;;  %v1748_v56 = vld [vmem:[#allocation12 + $0x98] sm:$0xff] }
 0x1f0   :  { %v1289_v32 = vadd.f32 %v1288_v14, %v3731_v48  ;;  %v1311_v30 = vmul.f32 %v3731_v48, %v3731_v48  ;;  %v1138_v3 = vadd.f32 %v1137_v8, %v1073_v33  ;;  %v1774_v8 = vld [vmem:[#allocation12 + $0x168] sm:$0xff]  ;;  %v1767_v53 = vld [vmem:[#allocation12 + $0x130] sm:$0xff] }
 0x1f1   :  { %v1014_v26 = vadd.f32 %v4429_v35, %v949_v47  ;;  %2005 = vmatpush.msrb.mxu3 %v1774_v8  ;;  %v1771_v47 = vld [vmem:[#allocation12 + $0x150] sm:$0xff]  ;;  %v1769_v35 = vld [vmem:[#allocation12 + $0x140] sm:$0xff] }
 0x1f2   :  { %v1326_v6 = vadd.f32 %v1325_v12, %v1311_v30 }
 0x1f3   :  { %v1202_v60 = vpop.f32.mrf.mxu3  ;;  %v1270_v4 = vpop.f32.mrf.mxu0  ;;  %v1079_v36 = vadd.f32 %v1078_v24, %v1014_v26  ;;  %2006 = vmatpush.msrb.mxu3 %v1773_v11  ;;  %v1752_v24 = vld [vmem:[#allocation12 + $0xb8] sm:$0xff]  ;;  %v1791_v26 = vld [vmem:[#allocation12 + $0x1f0] sm:$0xff] }
 0x1f4   :  { %v1203_v41 = vadd.f32 %v1202_v60, %v1138_v3  ;;  %v1756_v3 = vld [vmem:[#allocation12 + $0xd8] sm:$0xff]  ;;  %v1763_v11 = vld [vmem:[#allocation12 + $0x110] sm:$0xff] }
 0x1f5   :  { %1942 = vmatpush.msrb.mxu2 %v1756_v3  ;;  %v1746_v3 = vld [vmem:[#allocation12 + $0x88] sm:$0xff] }
 0x1f6   :  { %v3740_v44 = vadd.f32 %v1267_v63, %v1203_v41  ;;  %v1081_v63 = vpop.f32.mrf.mxu1 }
 0x1f7   :  { %v1140_v54 = vpop.f32.mrf.mxu2  ;;  %v1082_v12 = vadd.f32 %v1081_v63, %v1017_v40  ;;  %1943 = vmatpush.msrb.mxu2 %v1755_v16  ;;  %v1765_v40 = vld [vmem:[#allocation12 + $0x120] sm:$0xff] }
 0x1f8   :  { %v1290_v25 = vadd.f32 %v1289_v32, %v3740_v44  ;;  %v1312_v34 = vmul.f32 %v3740_v44, %v3740_v44  ;;  %v1141_v28 = vadd.f32 %v1140_v54, %v1076_v51  ;;  %v1489_v16 = vld [vmem:[#allocation2] sm:$0xff] }
 0x1f9   :  { %1944 = vmatpush.msrb.mxu2 %v1754_v29 }
 0x1fa   :  { %v1327_v49 = vadd.f32 %v1326_v6, %v1312_v34  ;;  %v1772_v6 = vld [vmem:[#allocation12 + $0x158] sm:$0xff] }
 0x1fb   :  { %v1205_v22 = vpop.f32.mrf.mxu3  ;;  %v1273_v1 = vpop.f32.mrf.mxu0  ;;  %2007 = vmatpush.msrb.mxu3 %v1772_v6  ;;  %v1792_v34 = vld [vmem:[#allocation12 + $0x1f8] sm:$0xff] }
 0x1fc   :  { %v1206_v23 = vadd.f32 %v1205_v22, %v1141_v28  ;;  %2068 = vmatpush.msrb.mxu0 %v1792_v34  ;;  %v1790_v22 = vld [vmem:[#allocation12 + $0x1e8] sm:$0xff]  ;;  %v1732_v6 = vld [vmem:[#allocation12 + $0x18] sm:$0xff]  ;;  %v1731_v34 = vld [vmem:[#allocation12 + $0x10] sm:$0xff] }
 0x1fd   :  { %2008 = vmatpush.msrb.mxu3 %v1771_v47 }
 0x1fe   :  { %v3749_v43 = vadd.f32 %v1270_v4, %v1206_v23  ;;  %v1753_v4 = vld [vmem:[#allocation12 + $0xc0] sm:$0xff]  ;;  %2069 = vmatpush.msrb.mxu0 %v1791_v26  ;;  %v1783_v26 = vld [vmem:[#allocation12 + $0x1b0] sm:$0xff] }
 0x1ff   :  { %v1143_v57 = vpop.f32.mrf.mxu2  ;;  %1945 = vmatpush.msrb.mxu2 %v1753_v4  ;;  %v1490_v4 = vld [vmem:[#allocation2 + $0x8] sm:$0x3] }
 0x200   :  { %v1291_v50 = vadd.f32 %v1290_v25, %v3749_v43  ;;  %v1313_v5 = vmul.f32 %v3749_v43, %v3749_v43  ;;  %v1144_v10 = vadd.f32 %v1143_v57, %v1079_v36  ;;  %v1770_v25 = vld [vmem:[#allocation12 + $0x148] sm:$0xff]  ;;  %2070 = vmatpush.msrb.mxu0 %v1790_v22  ;;  %v1789_v57 = vld [vmem:[#allocation12 + $0x1e0] sm:$0xff] }
 0x201   :  { %2009 = vmatpush.msrb.mxu3 %v1770_v25  ;;  %1946 = vmatpush.msrb.mxu2 %v1752_v24  ;;  %v1625_v25 = vrot.slane %v1489_v16, 2  ;;  %v1562_v24 = vrot.slane %v1490_v4, 1  ;;  %v1730_v22 = vld [vmem:[#allocation12 + $0x8] sm:$0xff] }
 0x202   :  { %v1328_v33 = vadd.f32 %v1327_v49, %v1313_v5  ;;  %v1768_v49 = vld [vmem:[#allocation12 + $0x138] sm:$0xff]  ;;  %2071 = vmatpush.msrb.mxu0 %v1789_v57  ;;  %v1749_v5 = vld [vmem:[#allocation12 + $0xa0] sm:$0xff] }
 0x203   :  { %v1208_v13 = vpop.f32.mrf.mxu3  ;;  %v1276_v51 = vpop.f32.mrf.mxu0  ;;  %2010 = vmatpush.msrb.mxu3 %v1769_v35  ;;  %1947 = vmatpush.msrb.mxu2 %v1751_v52  ;;  %v1761_v35 = vld [vmem:[#allocation12 + $0x100] sm:$0xff] }
 0x204   :  { %v1209_v14 = vadd.f32 %v1208_v13, %v1144_v10  ;;  %v1766_v10 = vld [vmem:[#allocation12 + $0x128] sm:$0xff]  ;;  %v1729_v57 = vld [vmem:[#allocation12] sm:$0xff] }
 0x205   :  { %2011 = vmatpush.msrb.mxu3 %v1768_v49  ;;  %1948 = vmatpush.msrb.mxu2 %v1750_v17  ;;  %v1782_v17 = vld [vmem:[#allocation12 + $0x1a8] sm:$0xff] }
 0x206   :  { %v3755_v32 = vadd.f32 %v1273_v1, %v1209_v14  ;;  %v1788_v1 = vld [vmem:[#allocation12 + $0x1d8] sm:$0xff] }
 0x207   :  { %v1146_v30 = vpop.f32.mrf.mxu2  ;;  %2012 = vmatpush.msrb.mxu3 %v1767_v53  ;;  %1949 = vmatpush.msrb.mxu2 %v1749_v5  ;;  %v1764_v14 = vld [vmem:[#allocation12 + $0x118] sm:$0xff] }
 0x208   :  { %v1292_v21 = vadd.f32 %v1291_v50, %v3755_v32  ;;  %v1314_v15 = vmul.f32 %v3755_v32, %v3755_v32  ;;  %v1147_v0 = vadd.f32 %v1146_v30, %v1082_v12  ;;  %2072 = vmatpush.msrb.mxu0 %v1788_v1  ;;  %v1786_v12 = vld [vmem:[#allocation12 + $0x1c8] sm:$0xff]  ;;  %v1733_v30 = vld [vmem:[#allocation12 + $0x20] sm:$0xff] }
 0x209   :  { %2013 = vmatpush.msrb.mxu3 %v1766_v10  ;;  %1950 = vmatpush.msrb.mxu2 %v1748_v56  ;;  %v1779_v56 = vld [vmem:[#allocation12 + $0x190] sm:$0xff] }
 0x20a   :  { %v1329_v60 = vadd.f32 %v1328_v33, %v1314_v15  ;;  %v1787_v33 = vld [vmem:[#allocation12 + $0x1d0] sm:$0xff]  ;;  %1884 = vmatpush.msra.mxu1 %v1733_v30 }
 0x20b   :  { %v1211_v41 = vpop.f32.mrf.mxu3  ;;  %2014 = vmatpush.msrb.mxu3 %v1765_v40  ;;  %2073 = vmatpush.msrb.mxu0 %v1787_v33 }
 0x20c   :  { %v1212_v54 = vadd.f32 %v1211_v41, %v1147_v0  ;;  %1951 = vmatpush.msrb.mxu2 %v1747_v62  ;;  %v1785_v0 = vld [vmem:[#allocation12 + $0x1c0] sm:$0xff]  ;;  %v1762_v41 = vld [vmem:[#allocation12 + $0x108] sm:$0xff]  ;;  %1885 = vmatpush.msra.mxu1 %v1732_v6 }
 0x20d   :  { %2015 = vmatpush.msrb.mxu3 %v1764_v14  ;;  %2074 = vmatpush.msrb.mxu0 %v1786_v12  ;;  %v1806_v12 = vld [vmem:[#allocation12 + $0x268] sm:$0xff] }
 0x20e   :  { %v3760_v28 = vadd.f32 %v1276_v51, %v1212_v54  ;;  %1952 = vmatpush.msrb.mxu2 %v1746_v3  ;;  %v1561_v51 = vrot.slane %v1489_v16, 1  ;;  %v1784_v54 = vld [vmem:[#allocation12 + $0x1b8] sm:$0xff]  ;;  %1886 = vmatpush.msra.mxu1 %v1731_v34 }
 0x20f   :  { %2016 = vmatpush.msrb.mxu3 %v1763_v11  ;;  %2075 = vmatpush.msrb.mxu0 %v1785_v0  ;;  %v3792_v0 = vld [vmem:[%s4384_s5] ss:$0 sm:$0xff] }
 0x210   :  { %v1293_v45 = vadd.f32 %v1292_v21, %v3760_v28  ;;  %v1315_v61 = vmul.f32 %v3760_v28, %v3760_v28  ;;  %1887 = vmatpush.msra.mxu1 %v1730_v22 }
 0x211   :  { %2017 = vmatpush.msrb.mxu3 %v1762_v41  ;;  %2076 = vmatpush.msrb.mxu0 %v1784_v54 }
 0x212   :  { %v1294_v23 = vrot.slane %v1293_v45, 4  ;;  %v1330_v36 = vadd.f32 %v1329_v60, %v1315_v61  ;;  %v1745_v60 = vld [vmem:[#allocation12 + $0x80] sm:$0xff]  ;;  %1888 = vmatpush.msra.mxu1 %v1729_v57 }
 0x213   :  { %1953 = vmatpush.msrb.mxu2 %v1745_v60  ;;  %2018 = vmatpush.msrb.mxu3 %v1761_v35  ;;  %v1805_v35 = vld [vmem:[#allocation12 + $0x260] sm:$0xff] }
 0x214   :  { %v1295_v27 = vadd.f32 %v1294_v23, %v1293_v45  ;;  %v1331_v50 = vrot.slane %v1330_v36, 4  ;;  %v1626_v45 = vrot.slane %v1490_v4, 2  ;;  %v1563_v23 = vsel %vm380_vm0, %v1561_v51, %v1562_v24  ;;  %2077 = vmatpush.msrb.mxu0 %v1783_v26  ;;  %1889 = vmatmul.f32.vlgmr.msra.gmra.mxu1 %v1489_v16 }
 0x215   :  { %1954 = vmatmul.f32.vlgmr.msrb.gmra.mxu2 %v1563_v23 }
 0x216   :  { %v1296_v19 = vrot.slane %v1295_v27, 2  ;;  %v1332_v38 = vadd.f32 %v1331_v50, %v1330_v36  ;;  %v1627_v36 = vsel %vm445_vm1, %v1625_v25, %v1626_v45  ;;  %2078 = vmatpush.msrb.mxu0 %v1782_v17  ;;  %v1808_v50 = vld [vmem:[#allocation12 + $0x278] sm:$0xff] }
 0x217   :  { %2019 = vmatmul.f32.vlgmr.msrb.gmra.mxu3 %v1627_v36  ;;  %2133 = vmatpush.msrb.mxu1 %v1808_v50 }
 0x218   :  { %v1297_v63 = vadd.f32 %v1296_v19, %v1295_v27  ;;  %v1333_v13 = vrot.slane %v1332_v38, 2  ;;  %v1781_v27 = vld [vmem:[#allocation12 + $0x1a0] sm:$0xff] }
 0x219   :  { %2079 = vmatpush.msrb.mxu0 %v1781_v27  ;;  %2134 = vmatpush.msrb.mxu1 %v1807_v59 }
 0x21a   :  { %v1298_v46 = vrot.slane %v1297_v63, 1  ;;  %v1334_v8 = vadd.f32 %v1333_v13, %v1332_v38  ;;  %v1777_v13 = vld [vmem:[#allocation12 + $0x180] sm:$0xff] }
 0x21b   :  { %2135 = vmatpush.msrb.mxu1 %v1806_v12 }
 0x21c   :  { %v1299_v21 = vadd.f32 %v1298_v46, %v1297_v63  ;;  %v1335_v15 = vrot.slane %v1334_v8, 1  ;;  %v1778_v63 = vld [vmem:[#allocation12 + $0x188] sm:$0xff] }
 0x21d   :  { %2136 = vmatpush.msrb.mxu1 %v1805_v35 }
 0x21e   :  { %v1336_v29 = vadd.f32 %v1335_v15, %v1334_v8  ;;  %v3765_v47 = vmul.f32 0.0078125, %v1299_v21 }
 0x220   :  { %v1338_v61 = vmul.f32 0.0078125, %v1336_v29  ;;  %v1339_v52 = vmul.f32 %v3765_v47, %v3765_v47  ;;  %v1359_v49 = vsub.f32 %v3760_v28, %v3765_v47  ;;  %v1780_v28 = vld [vmem:[#allocation12 + $0x198] sm:$0xff]  ;;  %v1354_v10 = vsub.f32 %v3718_v37, %v3765_v47 }
 0x221   :  { %v1355_v1 = vsub.f32 %v3731_v48, %v3765_v47  ;;  %v1356_v19 = vsub.f32 %v3740_v44, %v3765_v47  ;;  %v1357_v40 = vsub.f32 %v3749_v43, %v3765_v47  ;;  %v1358_v33 = vsub.f32 %v3755_v32, %v3765_v47  ;;  %2080 = vmatpush.msrb.mxu0 %v1780_v28 }
 0x222   :  { %v1340_v53 = vsub.f32 %v1338_v61, %v1339_v52  ;;  %v1344_v3 = vsub.f32 %v3655_v20, %v3765_v47  ;;  %v1345_v21 = vsub.f32 %v3651_v9, %v3765_v47  ;;  %v1346_v15 = vsub.f32 %v3658_v2, %v3765_v47 }
 0x223   :  { %2081 = vmatpush.msrb.mxu0 %v1779_v56  ;;  %v1347_v16 = vsub.f32 %v3666_v18, %v3765_v47  ;;  %v1348_v20 = vsub.f32 %v3675_v55, %v3765_v47  ;;  %v1349_v6 = vsub.f32 %v3682_v39, %v3765_v47  ;;  %v1350_v9 = vsub.f32 %v3690_v58, %v3765_v47  ;;  %v3814_v55 = vld [vmem:[%s4385_s6] ss:$0 sm:$0xff] }
 0x224   :  { %v1341_v5 = vmax.f32 %v1340_v53, 0.0  ;;  %v1351_v2 = vsub.f32 %v3700_v42, %v3765_v47  ;;  %v1352_v41 = vsub.f32 %v3706_v7, %v3765_v47  ;;  %v1353_v18 = vsub.f32 %v3713_v31, %v3765_v47 }
 0x225   :  { %2082 = vmatpush.msrb.mxu0 %v1778_v63 }
 0x226   :  { %v1360_v38 = vadd.f32 1e-05, %v1341_v5 }
 0x227   :  { %2083 = vmatpush.msrb.mxu0 %v1777_v13 }
 0x228   :  { %2736 = vrsqrt.f32 %v1360_v38  ;;  %vm1367_vm3 = vweird.f32 %v1360_v38 }
 0x22e   :  { %v2737_v62 = vpop.eup %2736 }
 0x22f   :  { %v1362_v14 = vmul.f32 %v2737_v62, %v1360_v38  ;;  %vm1368_vm2 = vweird.f32 %v2737_v62 }
 0x230   :  { %vm1369_vm4 = vmor %vm1367_vm3, %vm1368_vm2 }
 0x231   :  { %v1363_v46 = vmul.f32 %v2737_v62, %v1362_v14 }
 0x233   :  { %v1364_v8 = vmul.f32 0.5, %v1363_v46 }
 0x235   :  { %v1365_v30 = vsub.f32 1.5, %v1364_v8  ;;  %v1804_v8 = vld [vmem:[#allocation12 + $0x258] sm:$0xff] }
 0x236   :  { %2137 = vmatpush.msrb.mxu1 %v1804_v8 }
 0x237   :  { %v1366_v11 = vmul.f32 %v2737_v62, %v1365_v30 }
 0x239   :  { %v3802_v60 = vsel %vm1369_vm4, %v2737_v62, %v1366_v11 }
 0x23a   :  { %v1386_v51 = vmul.f32 %v3802_v60, %v1359_v49  ;;  %v1371_v39 = vmul.f32 %v3802_v60, %v1344_v3  ;;  %v1372_v58 = vmul.f32 %v3802_v60, %v1345_v21  ;;  %v1373_v29 = vmul.f32 %v3802_v60, %v1346_v15 }
 0x23b   :  { %v1374_v42 = vmul.f32 %v3802_v60, %v1347_v16  ;;  %v1375_v7 = vmul.f32 %v3802_v60, %v1348_v20  ;;  %v1376_v54 = vmul.f32 %v3802_v60, %v1349_v6  ;;  %v1377_v31 = vmul.f32 %v3802_v60, %v1350_v9 }
 0x23c   :  { %v1405_v4 = vmul.f32 %v3792_v0, %v1386_v51  ;;  %v1390_v25 = vmul.f32 %v3792_v0, %v1371_v39  ;;  %v1391_v34 = vmul.f32 %v3792_v0, %v1372_v58  ;;  %v1392_v24 = vmul.f32 %v3792_v0, %v1373_v29 }
 0x23d   :  { %v1393_v26 = vmul.f32 %v3792_v0, %v1374_v42  ;;  %v1394_v45 = vmul.f32 %v3792_v0, %v1375_v7  ;;  %v1395_v61 = vmul.f32 %v3792_v0, %v1376_v54  ;;  %v1396_v52 = vmul.f32 %v3792_v0, %v1377_v31 }
 0x23e   :  { %v1424_v49 = vadd.f32 %v3814_v55, %v1405_v4  ;;  %v1409_v22 = vadd.f32 %v3814_v55, %v1390_v25  ;;  %v1410_v23 = vadd.f32 %v3814_v55, %v1391_v34  ;;  %v1411_v36 = vadd.f32 %v3814_v55, %v1392_v24 }
 0x23f   :  { %v1412_v17 = vadd.f32 %v3814_v55, %v1393_v26  ;;  %v1413_v53 = vadd.f32 %v3814_v55, %v1394_v45  ;;  %v1414_v57 = vadd.f32 %v3814_v55, %v1395_v61  ;;  %v1415_v27 = vadd.f32 %v3814_v55, %v1396_v52 }
 0x240   :  { %vm1440_vm5 = vcmp.ge.f32.partialorder %v1424_v49, 0.0  ;;  %v1456_v50 = vmul.f32 0.1, %v1424_v49  ;;  %vm1425_vm6 = vcmp.ge.f32.partialorder %v1409_v22, 0.0  ;;  %v1441_v5 = vmul.f32 0.1, %v1409_v22 }
 0x241   :  { %vm1426_vm7 = vcmp.ge.f32.partialorder %v1410_v23, 0.0  ;;  %v1442_v28 = vmul.f32 0.1, %v1410_v23  ;;  %vm1427_vm8 = vcmp.ge.f32.partialorder %v1411_v36, 0.0  ;;  %v1443_v38 = vmul.f32 0.1, %v1411_v36 }
 0x242   :  { %v1472_v56 = vsel %vm1440_vm5, %v1424_v49, %v1456_v50  ;;  %v1457_v63 = vsel %vm1425_vm6, %v1409_v22, %v1441_v5  ;;  %vm1428_vm9 = vcmp.ge.f32.partialorder %v1412_v17, 0.0  ;;  %v1444_v13 = vmul.f32 0.1, %v1412_v17  ;;  %v1802_v49 = vld [vmem:[#allocation12 + $0x248] sm:$0xff] }
 0x243   :  { %1488 = vst [vmem:[#allocation2 + $0x121] sm:$0xff] %v1472_v56  ;;  %v1458_v59 = vsel %vm1426_vm7, %v1410_v23, %v1442_v28  ;;  %v1459_v62 = vsel %vm1427_vm8, %v1411_v36, %v1443_v38  ;;  %vm1429_vm10 = vcmp.ge.f32.partialorder %v1413_v53, 0.0  ;;  %v1445_v14 = vmul.f32 0.1, %v1413_v53 }
 0x244   :  { %1473 = vst [vmem:[#allocation2 + $0x11] sm:$0xff] %v1457_v63  ;;  %v1460_v46 = vsel %vm1428_vm9, %v1412_v17, %v1444_v13  ;;  %vm1430_vm11 = vcmp.ge.f32.partialorder %v1414_v57, 0.0  ;;  %v1446_v12 = vmul.f32 0.1, %v1414_v57  ;;  %vm1431_vm12 = vcmp.ge.f32.partialorder %v1415_v27, 0.0 }
 0x245   :  { %1474 = vst [vmem:[#allocation2 + $0x21] sm:$0xff] %v1458_v59  ;;  %v1461_v30 = vsel %vm1429_vm10, %v1413_v53, %v1445_v14  ;;  %v1447_v3 = vmul.f32 0.1, %v1415_v27  ;;  %v1378_v11 = vmul.f32 %v3802_v60, %v1351_v2  ;;  %v1379_v21 = vmul.f32 %v3802_v60, %v1352_v41 }
 0x246   :  { %1475 = vst [vmem:[#allocation2 + $0x31] sm:$0xff] %v1459_v62  ;;  %v1462_v15 = vsel %vm1430_vm11, %v1414_v57, %v1446_v12  ;;  %v1380_v16 = vmul.f32 %v3802_v60, %v1353_v18  ;;  %v1381_v20 = vmul.f32 %v3802_v60, %v1354_v10  ;;  %v1382_v6 = vmul.f32 %v3802_v60, %v1355_v1 }
 0x247   :  { %1476 = vst [vmem:[#allocation2 + $0x41] sm:$0xff] %v1460_v46  ;;  %v1463_v9 = vsel %vm1431_vm12, %v1415_v27, %v1447_v3  ;;  %v1397_v2 = vmul.f32 %v3792_v0, %v1378_v11  ;;  %v1383_v41 = vmul.f32 %v3802_v60, %v1356_v19  ;;  %v1384_v37 = vmul.f32 %v3802_v60, %v1357_v40  ;;  %v1803_v40 = vld [vmem:[#allocation12 + $0x250] sm:$0xff]  ;;  %v1801_v3 = vld [vmem:[#allocation12 + $0x240] sm:$0xff] }
 0x248   :  { %1477 = vst [vmem:[#allocation2 + $0x51] sm:$0xff] %v1461_v30  ;;  %v1385_v10 = vmul.f32 %v3802_v60, %v1358_v33  ;;  %2138 = vmatpush.msrb.mxu1 %v1803_v40  ;;  %v1398_v29 = vmul.f32 %v3792_v0, %v1379_v21  ;;  %v1399_v32 = vmul.f32 %v3792_v0, %v1380_v16 }
 0x249   :  { %1478 = vst [vmem:[#allocation2 + $0x61] sm:$0xff] %v1462_v15  ;;  %v1416_v48 = vadd.f32 %v3814_v55, %v1397_v2  ;;  %v1400_v7 = vmul.f32 %v3792_v0, %v1381_v20  ;;  %v1401_v54 = vmul.f32 %v3792_v0, %v1382_v6  ;;  %v1402_v25 = vmul.f32 %v3792_v0, %v1383_v41 }
 0x24a   :  { %1479 = vst [vmem:[#allocation2 + $0x71] sm:$0xff] %v1463_v9  ;;  %v1417_v31 = vadd.f32 %v3814_v55, %v1398_v29  ;;  %v1418_v4 = vadd.f32 %v3814_v55, %v1399_v32  ;;  %v1403_v23 = vmul.f32 %v3792_v0, %v1384_v37  ;;  %2139 = vmatpush.msrb.mxu1 %v1802_v49 }
 0x24b   :  { %v1491_v1 = vld [vmem:[#allocation2 + $0x10] sm:$0xff]  ;;  %v1492_v18 = vld [vmem:[#allocation2 + $0x18] sm:$0x3]  ;;  %vm1432_vm13 = vcmp.ge.f32.partialorder %v1416_v48, 0.0  ;;  %v1448_v44 = vmul.f32 0.1, %v1416_v48  ;;  %v1419_v61 = vadd.f32 %v3814_v55, %v1400_v7  ;;  %v1420_v22 = vadd.f32 %v3814_v55, %v1401_v54 }
 0x24c   :  { %1892 = vmatmul.f32.gmra.mxu1 %v1491_v1  ;;  %2084 = vmatmul.f32.vlgmr.msrb.gmra.mxu0 %v1491_v1  ;;  %v1564_v19 = vrot.slane %v1491_v1, 1  ;;  %v1565_v51 = vrot.slane %v1492_v18, 1  ;;  %v1628_v43 = vrot.slane %v1491_v1, 2  ;;  %v1629_v39 = vrot.slane %v1492_v18, 2  ;;  %v3874_v60 = vld [vmem:[#allocation2 + $0x20] sm:$0xff] }
 0x24d   :  { %v1464_v58 = vsel %vm1432_vm13, %v1416_v48, %v1448_v44  ;;  %v1494_v42 = vld [vmem:[#allocation2 + $0x28] sm:$0x3]  ;;  %v1567_v34 = vrot.slane %v3874_v60, 1  ;;  %v1631_v35 = vrot.slane %v3874_v60, 2  ;;  %v3883_v45 = vld [vmem:[#allocation2 + $0x30] sm:$0xff]  ;;  %vm1433_vm14 = vcmp.ge.f32.partialorder %v1417_v31, 0.0  ;;  %2140 = vmatpush.msrb.mxu1 %v1801_v3 }
 0x24e   :  { %v3867_v47 = vsel %vm380_vm0, %v1564_v19, %v1565_v51  ;;  %v3870_v33 = vsel %vm445_vm1, %v1628_v43, %v1629_v39  ;;  %1480 = vst [vmem:[#allocation2 + $0x81] sm:$0xff] %v1464_v58  ;;  %v1568_v24 = vrot.slane %v1494_v42, 1  ;;  %v1632_v26 = vrot.slane %v1494_v42, 2  ;;  %v1496_v52 = vld [vmem:[#allocation2 + $0x38] sm:$0x3]  ;;  %v3914_v20 = vld [vmem:[#allocation2 + $0x40] sm:$0xff] }
 0x24f   :  { %1957 = vmatmul.f32.gmra.mxu2 %v3867_v47  ;;  %2022 = vmatmul.f32.gmra.mxu3 %v3870_v33  ;;  %v1570_v36 = vrot.slane %v3883_v45, 1  ;;  %v1421_v17 = vadd.f32 %v3814_v55, %v1402_v25  ;;  %v1404_v53 = vmul.f32 %v3792_v0, %v1385_v10  ;;  %v1449_v50 = vmul.f32 0.1, %v1417_v31  ;;  %v1498_v6 = vld [vmem:[#allocation2 + $0x48] sm:$0x3]  ;;  %v1800_v10 = vld [vmem:[#allocation12 + $0x238] sm:$0xff] }
 0x250   :  { %v3894_v57 = vsel %vm380_vm0, %v1567_v34, %v1568_v24  ;;  %v3897_v27 = vsel %vm445_vm1, %v1631_v35, %v1632_v26  ;;  %vm1434_vm15 = vcmp.ge.f32.partialorder %v1418_v4, 0.0  ;;  %v1571_v5 = vrot.slane %v1496_v52, 1  ;;  %2141 = vmatpush.msrb.mxu1 %v1800_v10  ;;  %v3928_v44 = vld [vmem:[#allocation2 + $0x50] sm:$0xff]  ;;  %v1500_v19 = vld [vmem:[#allocation2 + $0x58] sm:$0x3]  ;;  %v3942_v42 = vld [vmem:[#allocation2 + $0x60] sm:$0xff] }
 0x251   :  { %v1450_v28 = vmul.f32 0.1, %v1418_v4  ;;  %vm1435_vm2 = vcmp.ge.f32.partialorder %v1419_v61, 0.0  ;;  %v1451_v38 = vmul.f32 0.1, %v1419_v61  ;;  %v1634_v56 = vrot.slane %v3883_v45, 2 }
 0x252   :  { %v1465_v63 = vsel %vm1433_vm14, %v1417_v31, %v1449_v50  ;;  %vm1436_vm3 = vcmp.ge.f32.partialorder %v1420_v22, 0.0  ;;  %v1452_v0 = vmul.f32 0.1, %v1420_v22  ;;  %vm1437_vm4 = vcmp.ge.f32.partialorder %v1421_v17, 0.0  ;;  %v1799_v58 = vld [vmem:[#allocation12 + $0x230] sm:$0xff]  ;;  %v1798_v34 = vld [vmem:[#allocation12 + $0x228] sm:$0xff] }
 0x253   :  { %1481 = vst [vmem:[#allocation2 + $0xb1] sm:$0xff] %v1465_v63  ;;  %v1466_v13 = vsel %vm1434_vm15, %v1418_v4, %v1450_v28  ;;  %v1467_v59 = vsel %vm1435_vm2, %v1419_v61, %v1451_v38  ;;  %v1453_v62 = vmul.f32 0.1, %v1421_v17  ;;  %v1635_v14 = vrot.slane %v1496_v52, 2  ;;  %2142 = vmatpush.msrb.mxu1 %v1799_v58  ;;  %v1502_v7 = vld [vmem:[#allocation2 + $0x68] sm:$0x3] }
 0x254   :  { %1895 = vmatmul.f32.gmra.mxu1 %v3874_v60  ;;  %2087 = vmatmul.f32.gmra.mxu0 %v3874_v60  ;;  %1482 = vst [vmem:[#allocation2 + $0xc1] sm:$0xff] %v1466_v13  ;;  %v1468_v46 = vsel %vm1436_vm3, %v1420_v22, %v1452_v0  ;;  %v1422_v8 = vadd.f32 %v3814_v55, %v1403_v23  ;;  %v1573_v2 = vrot.slane %v3914_v20, 1  ;;  %v1574_v41 = vrot.slane %v1498_v6, 1  ;;  %v3956_v26 = vld [vmem:[#allocation2 + $0x70] sm:$0xff]  ;;  %v1504_v61 = vld [vmem:[#allocation2 + $0x78] sm:$0x3] }
 0x255   :  { %v1423_v12 = vadd.f32 %v3814_v55, %v1404_v53  ;;  %1483 = vst [vmem:[#allocation2 + $0xd1] sm:$0xff] %v1467_v59  ;;  %v1469_v30 = vsel %vm1437_vm4, %v1421_v17, %v1453_v62  ;;  %v3907_v15 = vsel %vm380_vm0, %v1570_v36, %v1571_v5  ;;  %v3910_v16 = vsel %vm445_vm1, %v1634_v56, %v1635_v14  ;;  %v1797_v36 = vld [vmem:[#allocation12 + $0x220] sm:$0xff]  ;;  %v1510_v53 = vld [vmem:[#allocation2 + $0xa8] sm:$0x3]  ;;  %v1796_v62 = vld [vmem:[#allocation12 + $0x218] sm:$0xff] }
 0x256   :  { %1484 = vst [vmem:[#allocation2 + $0xe1] sm:$0xff] %v1468_v46  ;;  %vm1438_vm5 = vcmp.ge.f32.partialorder %v1422_v8, 0.0  ;;  %v1454_v11 = vmul.f32 0.1, %v1422_v8  ;;  %v1637_v37 = vrot.slane %v3914_v20, 2  ;;  %v1638_v48 = vrot.slane %v1498_v6, 2  ;;  %2143 = vmatpush.msrb.mxu1 %v1798_v34 }
 0x257   :  { %1960 = vmatmul.f32.gmra.mxu2 %v3894_v57  ;;  %2025 = vmatmul.f32.gmra.mxu3 %v3897_v27  ;;  %vm1439_vm6 = vcmp.ge.f32.partialorder %v1423_v12, 0.0  ;;  %1485 = vst [vmem:[#allocation2 + $0xf1] sm:$0xff] %v1469_v30  ;;  %v1455_v21 = vmul.f32 0.1, %v1423_v12  ;;  %v3921_v1 = vsel %vm380_vm0, %v1573_v2, %v1574_v41  ;;  %v1576_v51 = vrot.slane %v3928_v44, 1  ;;  %v1509_v17 = vld [vmem:[#allocation2 + $0xa0] sm:$0xff] }
 0x258   :  { %v1470_v55 = vsel %vm1438_vm5, %v1422_v8, %v1454_v11  ;;  %v3924_v18 = vsel %vm445_vm1, %v1637_v37, %v1638_v48  ;;  %v1577_v43 = vrot.slane %v1500_v19, 1  ;;  %v1640_v39 = vrot.slane %v3928_v44, 2  ;;  %2144 = vmatpush.msrb.mxu1 %v1797_v36  ;;  %v3970_v0 = vld [vmem:[#allocation2 + $0x80] sm:$0xff]  ;;  %v1824_v8 = vld [vmem:[#allocation12 + $0x2f8] sm:$0xff]  ;;  %v1823_v30 = vld [vmem:[#allocation12 + $0x2f0] sm:$0xff] }
 0x259   :  { %1486 = vst [vmem:[#allocation2 + $0x101] sm:$0xff] %v1470_v55  ;;  %v1471_v9 = vsel %vm1439_vm6, %v1423_v12, %v1455_v21  ;;  %v1641_v40 = vrot.slane %v1500_v19, 2  ;;  %v1579_v54 = vrot.slane %v3942_v42, 1  ;;  %v1580_v31 = vrot.slane %v1502_v7, 1  ;;  %v1840_v12 = vld [vmem:[#allocation12 + $0x378] sm:$0xff]  ;;  %2198 = vmatpush.msra.mxu2 %v1824_v8  ;;  %v1839_v3 = vld [vmem:[#allocation12 + $0x370] sm:$0xff] }
 0x25a   :  { %1487 = vst [vmem:[#allocation2 + $0x111] sm:$0xff] %v1471_v9  ;;  %v3935_v29 = vsel %vm380_vm0, %v1576_v51, %v1577_v43  ;;  %v1643_v4 = vrot.slane %v3942_v42, 2  ;;  %v1644_v25 = vrot.slane %v1502_v7, 2  ;;  %v1582_v52 = vrot.slane %v3956_v26, 1  ;;  %2145 = vmatpush.msrb.mxu1 %v1796_v62  ;;  %v1511_v14 = vld [vmem:[#allocation2 + $0xb0] sm:$0xff]  ;;  %2263 = vmatpush.msra.mxu3 %v1840_v12  ;;  %v1822_v2 = vld [vmem:[#allocation12 + $0x2e8] sm:$0xff] }
 0x25b   :  { %v3938_v32 = vsel %vm445_vm1, %v1640_v39, %v1641_v40  ;;  %v3949_v24 = vsel %vm380_vm0, %v1579_v54, %v1580_v31  ;;  %v1583_v49 = vrot.slane %v1504_v61, 1  ;;  %v1646_v22 = vrot.slane %v3956_v26, 2  ;;  %v1512_v46 = vld [vmem:[#allocation2 + $0xb8] sm:$0x3]  ;;  %2199 = vmatpush.msra.mxu2 %v1823_v30  ;;  %v1795_v9 = vld [vmem:[#allocation12 + $0x210] sm:$0xff]  ;;  %v1838_v41 = vld [vmem:[#allocation12 + $0x368] sm:$0xff] }
 0x25c   :  { %1898 = vmatmul.f32.gmra.mxu1 %v3883_v45  ;;  %2090 = vmatmul.f32.gmra.mxu0 %v3883_v45  ;;  %v3952_v35 = vsel %vm445_vm1, %v1643_v4, %v1644_v25  ;;  %v1647_v23 = vrot.slane %v1504_v61, 2  ;;  %v1585_v28 = vrot.slane %v1509_v17, 1  ;;  %v1649_v38 = vrot.slane %v1509_v17, 2  ;;  %v1856_v37 = vld [vmem:[#allocation12 + $0x3f8] sm:$0xff]  ;;  %v1821_v48 = vld [vmem:[#allocation12 + $0x2e0] sm:$0xff]  ;;  %v1855_v40 = vld [vmem:[#allocation12 + $0x3f0] sm:$0xff] }
 0x25d   :  { %v3963_v50 = vsel %vm380_vm0, %v1582_v52, %v1583_v49  ;;  %v1586_v56 = vrot.slane %v1510_v53, 1  ;;  %v1650_v63 = vrot.slane %v1510_v53, 2  ;;  %v1588_v11 = vrot.slane %v1511_v14, 1  ;;  %2264 = vmatpush.msra.mxu3 %v1839_v3  ;;  %2146 = vmatpush.msrb.mxu1 %v1795_v9  ;;  %v1837_v10 = vld [vmem:[#allocation12 + $0x360] sm:$0xff]  ;;  %v1514_v39 = vld [vmem:[#allocation2 + $0xc8] sm:$0x3] }
 0x25e   :  { %v3966_v5 = vsel %vm445_vm1, %v1646_v22, %v1647_v23  ;;  %v1589_v21 = vrot.slane %v1512_v46, 1  ;;  %v1652_v55 = vrot.slane %v1511_v14, 2  ;;  %v1653_v6 = vrot.slane %v1512_v46, 2  ;;  %2200 = vmatpush.msra.mxu2 %v1822_v2  ;;  %v3981_v43 = vld [vmem:[#allocation2 + $0xc0] sm:$0xff]  ;;  %2328 = vmatpush.msra.mxu0 %v1856_v37  ;;  %v1820_v58 = vld [vmem:[#allocation12 + $0x2d8] sm:$0xff]  ;;  %v1854_v54 = vld [vmem:[#allocation12 + $0x3e8] sm:$0xff] }
 0x25f   :  { %1963 = vmatmul.f32.gmra.mxu2 %v3907_v15  ;;  %2028 = vmatmul.f32.gmra.mxu3 %v3910_v16  ;;  %v1587_v13 = vsel %vm380_vm0, %v1585_v28, %v1586_v56  ;;  %v1651_v59 = vsel %vm445_vm1, %v1649_v38, %v1650_v63  ;;  %v1836_v7 = vld [vmem:[#allocation12 + $0x358] sm:$0xff]  ;;  %v1591_v31 = vrot.slane %v3981_v43, 1  ;;  %v1592_v4 = vrot.slane %v1514_v39, 1  ;;  %v1819_v61 = vld [vmem:[#allocation12 + $0x2d0] sm:$0xff]  ;;  %v1853_v49 = vld [vmem:[#allocation12 + $0x3e0] sm:$0xff] }
 0x260   :  { %v3976_v19 = vsel %vm380_vm0, %v1588_v11, %v1589_v21  ;;  %v3979_v51 = vsel %vm445_vm1, %v1652_v55, %v1653_v6  ;;  %2265 = vmatpush.msra.mxu3 %v1838_v41  ;;  %2201 = vmatpush.msra.mxu2 %v1821_v48  ;;  %v1655_v25 = vrot.slane %v3981_v43, 2  ;;  %v1656_v34 = vrot.slane %v1514_v39, 2  ;;  %v1835_v52 = vld [vmem:[#allocation12 + $0x350] sm:$0xff]  ;;  %v1794_v22 = vld [vmem:[#allocation12 + $0x208] sm:$0xff]  ;;  %v1852_v38 = vld [vmem:[#allocation12 + $0x3d8] sm:$0xff] }
 0x261   :  { %2329 = vmatpush.msra.mxu0 %v1855_v40  ;;  %v1818_v23 = vld [vmem:[#allocation12 + $0x2c8] sm:$0xff]  ;;  %v3995_v28 = vld [vmem:[#allocation2 + $0xd0] sm:$0xff]  ;;  %2147 = vmatpush.msrb.mxu1 %v1794_v22  ;;  %v1516_v56 = vld [vmem:[#allocation2 + $0xd8] sm:$0x3] }
 0x262   :  { %2266 = vmatpush.msra.mxu3 %v1837_v10  ;;  %2202 = vmatpush.msra.mxu2 %v1820_v58  ;;  %v1834_v36 = vld [vmem:[#allocation12 + $0x348] sm:$0xff]  ;;  %v3993_v53 = vsel %vm445_vm1, %v1655_v25, %v1656_v34  ;;  %v1817_v63 = vld [vmem:[#allocation12 + $0x2c0] sm:$0xff]  ;;  %v1594_v62 = vrot.slane %v3995_v28, 1  ;;  %v1658_v46 = vrot.slane %v3995_v28, 2  ;;  %v1659_v8 = vrot.slane %v1516_v56, 2  ;;  %v1816_v12 = vld [vmem:[#allocation12 + $0x2b8] sm:$0xff] }
 0x263   :  { %2330 = vmatpush.msra.mxu0 %v1854_v54  ;;  %v1832_v30 = vld [vmem:[#allocation12 + $0x338] sm:$0xff]  ;;  %v1850_v3 = vld [vmem:[#allocation12 + $0x3c8] sm:$0xff]  ;;  %v1793_v11 = vld [vmem:[#allocation12 + $0x200] sm:$0xff] }
 0x264   :  { %1901 = vmatmul.f32.gmra.mxu1 %v3914_v20  ;;  %2093 = vmatmul.f32.gmra.mxu0 %v3914_v20  ;;  %v1815_v21 = vld [vmem:[#allocation12 + $0x2b0] sm:$0xff]  ;;  %v4007_v9 = vsel %vm445_vm1, %v1658_v46, %v1659_v8  ;;  %v4009_v2 = vld [vmem:[#allocation2 + $0xe0] sm:$0xff]  ;;  %v1518_v37 = vld [vmem:[#allocation2 + $0xe8] sm:$0x3] }
 0x265   :  { %2267 = vmatpush.msra.mxu3 %v1836_v7  ;;  %2203 = vmatpush.msra.mxu2 %v1819_v61  ;;  %v1831_v55 = vld [vmem:[#allocation12 + $0x330] sm:$0xff]  ;;  %v1849_v41 = vld [vmem:[#allocation12 + $0x3c0] sm:$0xff]  ;;  %v1814_v48 = vld [vmem:[#allocation12 + $0x2a8] sm:$0xff]  ;;  %v1597_v40 = vrot.slane %v4009_v2, 1  ;;  %v1598_v58 = vrot.slane %v1518_v37, 1  ;;  %v1661_v7 = vrot.slane %v4009_v2, 2 }
 0x266   :  { %2331 = vmatpush.msra.mxu0 %v1853_v49  ;;  %2148 = vmatpush.msrb.mxu1 %v1793_v11  ;;  %v1830_v10 = vld [vmem:[#allocation12 + $0x328] sm:$0xff]  ;;  %v1848_v39 = vld [vmem:[#allocation12 + $0x3b8] sm:$0xff]  ;;  %v1662_v54 = vrot.slane %v1518_v37, 2  ;;  %v1847_v25 = vld [vmem:[#allocation12 + $0x3b0] sm:$0xff] }
 0x267   :  { %1966 = vmatmul.f32.gmra.mxu2 %v3921_v1  ;;  %2031 = vmatmul.f32.gmra.mxu3 %v3924_v18  ;;  %v1872_v34 = vld [vmem:[#allocation12 + $0x478] sm:$0xff]  ;;  %v4018_v49 = vsel %vm380_vm0, %v1597_v40, %v1598_v58  ;;  %v1810_v8 = vld [vmem:[#allocation12 + $0x288] sm:$0xff]  ;;  %v1809_v11 = vld [vmem:[#allocation12 + $0x280] sm:$0xff] }
 0x268   :  { %2268 = vmatpush.msra.mxu3 %v1835_v52  ;;  %2204 = vmatpush.msra.mxu2 %v1818_v23  ;;  %v1812_v61 = vld [vmem:[#allocation12 + $0x298] sm:$0xff]  ;;  %v4021_v22 = vsel %vm445_vm1, %v1661_v7, %v1662_v54  ;;  %v4023_v23 = vld [vmem:[#allocation2 + $0xf0] sm:$0xff] }
 0x269   :  { %2332 = vmatpush.msra.mxu0 %v1852_v38  ;;  %v1828_v52 = vld [vmem:[#allocation12 + $0x318] sm:$0xff]  ;;  %2393 = vmatpush.msra.mxu1 %v1872_v34  ;;  %v1843_v37 = vld [vmem:[#allocation12 + $0x390] sm:$0xff] }
 0x26a   :  { %2269 = vmatpush.msra.mxu3 %v1834_v36  ;;  %2205 = vmatpush.msra.mxu2 %v1817_v63  ;;  %v1846_v36 = vld [vmem:[#allocation12 + $0x3a8] sm:$0xff]  ;;  %v1520_v38 = vld [vmem:[#allocation2 + $0xf8] sm:$0x3]  ;;  %v1827_v63 = vld [vmem:[#allocation12 + $0x310] sm:$0xff] }
 0x26b   :  { %v1665_v46 = vrot.slane %v1520_v38, 2 }
 0x26c   :  { %1904 = vmatmul.f32.gmra.mxu1 %v3928_v44  ;;  %2096 = vmatmul.f32.gmra.mxu0 %v3928_v44 }
 0x26d   :  { %2206 = vmatpush.msra.mxu2 %v1816_v12  ;;  %v1826_v12 = vld [vmem:[#allocation12 + $0x308] sm:$0xff] }
 0x26f   :  { %1969 = vmatmul.f32.gmra.mxu2 %v3935_v29  ;;  %2034 = vmatmul.f32.gmra.mxu3 %v3938_v32 }
 0x270   :  { %2207 = vmatpush.msra.mxu2 %v1815_v21  ;;  %v1825_v21 = vld [vmem:[#allocation12 + $0x300] sm:$0xff] }
 0x272   :  { %2208 = vmatpush.msra.mxu2 %v1814_v48  ;;  %v4039_v48 = vld [vmem:[#allocation2 + $0x100] sm:$0xff] }
 0x273   :  { %v1603_v40 = vrot.slane %v4039_v48, 1  ;;  %v1667_v7 = vrot.slane %v4039_v48, 2 }
 0x274   :  { %1907 = vmatmul.f32.gmra.mxu1 %v3942_v42  ;;  %2099 = vmatmul.f32.gmra.mxu0 %v3942_v42 }
 0x277   :  { %1972 = vmatmul.f32.gmra.mxu2 %v3949_v24  ;;  %2037 = vmatmul.f32.gmra.mxu3 %v3952_v35 }
 0x27c   :  { %1910 = vmatmul.f32.gmra.mxu1 %v3956_v26  ;;  %2102 = vmatmul.f32.gmra.mxu0 %v3956_v26 }
 0x27f   :  { %1975 = vmatmul.f32.gmra.mxu2 %v3963_v50  ;;  %2040 = vmatmul.f32.gmra.mxu3 %v3966_v5 }
 0x284   :  { %1913 = vmatmul.f32.gmra.mxu1 %v1509_v17  ;;  %2105 = vmatmul.f32.gmra.mxu0 %v3970_v0  ;;  %v3990_v17 = vsel %vm380_vm0, %v1591_v31, %v1592_v4  ;;  %v1813_v31 = vld [vmem:[#allocation12 + $0x2a0] sm:$0xff] }
 0x285   :  { %v1829_v4 = vld [vmem:[#allocation12 + $0x320] sm:$0xff]  ;;  %2209 = vmatpush.msra.mxu2 %v1813_v31 }
 0x286   :  { %v1841_v31 = vld [vmem:[#allocation12 + $0x380] sm:$0xff] }
 0x287   :  { %1978 = vmatmul.f32.gmra.mxu2 %v1587_v13  ;;  %2043 = vmatmul.f32.gmra.mxu3 %v1651_v59  ;;  %v1833_v13 = vld [vmem:[#allocation12 + $0x340] sm:$0xff]  ;;  %v1851_v59 = vld [vmem:[#allocation12 + $0x3d0] sm:$0xff] }
 0x288   :  { %2270 = vmatpush.msra.mxu3 %v1833_v13  ;;  %2333 = vmatpush.msra.mxu0 %v1851_v59  ;;  %v1845_v13 = vld [vmem:[#allocation12 + $0x3a0] sm:$0xff]  ;;  %v1600_v59 = vrot.slane %v4023_v23, 1 }
 0x289   :  { %2210 = vmatpush.msra.mxu2 %v1812_v61  ;;  %v4053_v61 = vld [vmem:[#allocation2 + $0x110] sm:$0xff] }
 0x28a   :  { %2271 = vmatpush.msra.mxu3 %v1832_v30  ;;  %2334 = vmatpush.msra.mxu0 %v1850_v3  ;;  %v1844_v30 = vld [vmem:[#allocation12 + $0x398] sm:$0xff]  ;;  %v1871_v3 = vld [vmem:[#allocation12 + $0x470] sm:$0xff] }
 0x28b   :  { %2394 = vmatpush.msra.mxu1 %v1871_v3 }
 0x28c   :  { %1916 = vmatmul.f32.gmra.mxu1 %v1511_v14  ;;  %2108 = vmatmul.f32.gmra.mxu0 %v1511_v14  ;;  %v1595_v14 = vrot.slane %v1516_v56, 1  ;;  %v1811_v56 = vld [vmem:[#allocation12 + $0x290] sm:$0xff] }
 0x28d   :  { %2272 = vmatpush.msra.mxu3 %v1831_v55  ;;  %2335 = vmatpush.msra.mxu0 %v1849_v41 }
 0x28e   :  { %v4004_v6 = vsel %vm380_vm0, %v1594_v62, %v1595_v14  ;;  %v1601_v62 = vrot.slane %v1520_v38, 1  ;;  %v1664_v14 = vrot.slane %v4023_v23, 2  ;;  %2211 = vmatpush.msra.mxu2 %v1811_v56  ;;  %v1670_v56 = vrot.slane %v4053_v61, 2 }
 0x28f   :  { %1981 = vmatmul.f32.gmra.mxu2 %v3976_v19  ;;  %2046 = vmatmul.f32.gmra.mxu3 %v3979_v51 }
 0x290   :  { %2273 = vmatpush.msra.mxu3 %v1830_v10  ;;  %2336 = vmatpush.msra.mxu0 %v1848_v39  ;;  %v4032_v55 = vsel %vm380_vm0, %v1600_v59, %v1601_v62  ;;  %v4035_v41 = vsel %vm445_vm1, %v1664_v14, %v1665_v46  ;;  %v1522_v10 = vld [vmem:[#allocation2 + $0x108] sm:$0x3]  ;;  %v4069_v46 = vld [vmem:[#allocation2 + $0x120] sm:$0xff] }
 0x291   :  { %2212 = vmatpush.msra.mxu2 %v1810_v8  ;;  %v1842_v39 = vld [vmem:[#allocation12 + $0x388] sm:$0xff]  ;;  %v1604_v58 = vrot.slane %v1522_v10, 1  ;;  %v1668_v54 = vrot.slane %v1522_v10, 2  ;;  %v4067_v14 = vpop.f32.mrf.mxu1  ;;  %v1868_v8 = vld [vmem:[#allocation12 + $0x458] sm:$0xff] }
 0x292   :  { %2274 = vmatpush.msra.mxu3 %v1829_v4  ;;  %2337 = vmatpush.msra.mxu0 %v1847_v25  ;;  %v1870_v4 = vld [vmem:[#allocation12 + $0x468] sm:$0xff] }
 0x293   :  { %2213 = vmatpush.msra.mxu2 %v1809_v11  ;;  %v4046_v25 = vsel %vm380_vm0, %v1603_v40, %v1604_v58  ;;  %v4049_v34 = vsel %vm445_vm1, %v1667_v7, %v1668_v54  ;;  %2395 = vmatpush.msra.mxu1 %v1870_v4  ;;  %v1866_v40 = vld [vmem:[#allocation12 + $0x448] sm:$0xff] }
 0x294   :  { %1919 = vmatmul.f32.gmra.mxu1 %v3981_v43  ;;  %2111 = vmatmul.f32.gmra.mxu0 %v3981_v43 }
 0x295   :  { %2275 = vmatpush.msra.mxu3 %v1828_v52  ;;  %2338 = vmatpush.msra.mxu0 %v1846_v36  ;;  %v1524_v52 = vld [vmem:[#allocation2 + $0x118] sm:$0x3]  ;;  %v1606_v36 = vrot.slane %v4053_v61, 1 }
 0x296   :  { %v1607_v38 = vrot.slane %v1524_v52, 1 }
 0x297   :  { %1984 = vmatmul.f32.gmra.mxu2 %v3990_v17  ;;  %2049 = vmatmul.f32.gmra.mxu3 %v3993_v53 }
 0x298   :  { %2276 = vmatpush.msra.mxu3 %v1827_v63  ;;  %2339 = vmatpush.msra.mxu0 %v1845_v13  ;;  %v1671_v63 = vrot.slane %v1524_v52, 2  ;;  %v1869_v13 = vld [vmem:[#allocation12 + $0x460] sm:$0xff]  ;;  %v4060_v59 = vsel %vm380_vm0, %v1606_v36, %v1607_v38  ;;  %v4077_v3 = vpop.f32.mrf.mxu2 }
 0x299   :  { %2396 = vmatpush.msra.mxu1 %v1869_v13 }
 0x29a   :  { %2277 = vmatpush.msra.mxu3 %v1826_v12  ;;  %2340 = vmatpush.msra.mxu0 %v1844_v30  ;;  %v4063_v62 = vsel %vm445_vm1, %v1670_v56, %v1671_v63  ;;  %v4079_v11 = vpop.f32.mrf.mxu3 }
 0x29b   :  { %2397 = vmatpush.msra.mxu1 %v1868_v8 }
 0x29c   :  { %1922 = vmatmul.f32.gmra.mxu1 %v3995_v28  ;;  %2114 = vmatmul.f32.gmra.mxu0 %v3995_v28 }
 0x29d   :  { %2278 = vmatpush.msra.mxu3 %v1825_v21  ;;  %2341 = vmatpush.msra.mxu0 %v1843_v37  ;;  %v1867_v21 = vld [vmem:[#allocation12 + $0x450] sm:$0xff] }
 0x29e   :  { %2398 = vmatpush.msra.mxu1 %v1867_v21 }
 0x29f   :  { %1987 = vmatmul.f32.gmra.mxu2 %v4004_v6  ;;  %2052 = vmatmul.f32.gmra.mxu3 %v4007_v9 }
 0x2a0   :  { %2342 = vmatpush.msra.mxu0 %v1842_v39  ;;  %2399 = vmatpush.msra.mxu1 %v1866_v40 }
 0x2a2   :  { %2343 = vmatpush.msra.mxu0 %v1841_v31 }
 0x2a4   :  { %1925 = vmatmul.f32.gmra.mxu1 %v4009_v2  ;;  %2117 = vmatmul.f32.gmra.mxu0 %v4009_v2 }
 0x2a7   :  { %1990 = vmatmul.f32.gmra.mxu2 %v4018_v49  ;;  %2055 = vmatmul.f32.gmra.mxu3 %v4021_v22 }
 0x2ac   :  { %1928 = vmatmul.f32.gmra.mxu1 %v4023_v23  ;;  %2120 = vmatmul.f32.gmra.mxu0 %v4023_v23 }
 0x2af   :  { %1993 = vmatmul.f32.gmra.mxu2 %v4032_v55  ;;  %2058 = vmatmul.f32.gmra.mxu3 %v4035_v41 }
 0x2b4   :  { %1931 = vmatmul.f32.gmra.mxu1 %v4039_v48  ;;  %2123 = vmatmul.f32.gmra.mxu0 %v4039_v48 }
 0x2b7   :  { %1996 = vmatmul.f32.gmra.mxu2 %v4046_v25  ;;  %2061 = vmatmul.f32.gmra.mxu3 %v4049_v34 }
 0x2bc   :  { %1934 = vmatmul.f32.gmra.mxu1 %v4053_v61  ;;  %2126 = vmatmul.f32.gmra.mxu0 %v4053_v61 }
 0x2bf   :  { %1999 = vmatmul.f32.gmra.mxu2 %v4060_v59  ;;  %2064 = vmatmul.f32.gmra.mxu3 %v4063_v62 }
 0x2c4   :  { %2129 = vmatmul.f32.gmra.mxu0 %v4069_v46  ;;  %2149 = vmatmul.f32.vlgmr.msrb.gmra.mxu1 %v3867_v47 }
 0x2c7   :  { %2214 = vmatmul.f32.vlgmr.msra.gmra.mxu2 %v3870_v33  ;;  %2279 = vmatmul.f32.vlgmr.msra.gmra.mxu3 %v3874_v60 }
 0x2c9   :  { %v1893_v12 = vpop.f32.mrf.mxu1  ;;  %v4075_v30 = vpop.f32.mrf.mxu0 }
 0x2cc   :  { %2152 = vmatmul.f32.gmra.mxu1 %v3894_v57  ;;  %2344 = vmatmul.f32.vlgmr.msra.gmra.mxu0 %v3894_v57 }
 0x2cf   :  { %2217 = vmatmul.f32.gmra.mxu2 %v3897_v27  ;;  %2282 = vmatmul.f32.gmra.mxu3 %v3883_v45 }
 0x2d1   :  { %v1896_v47 = vpop.f32.mrf.mxu1  ;;  %v2088_v33 = vpop.f32.mrf.mxu0 }
 0x2d2   :  { %v1958_v60 = vpop.f32.mrf.mxu2  ;;  %v2023_v37 = vpop.f32.mrf.mxu3 }
 0x2d3   :  { %v1959_v10 = vadd.f32 %v1958_v60, %v1893_v12 }
 0x2d4   :  { %2155 = vmatmul.f32.gmra.mxu1 %v3907_v15  ;;  %2347 = vmatmul.f32.gmra.mxu0 %v3907_v15  ;;  %v1865_v15 = vld [vmem:[#allocation12 + $0x440] sm:$0xff] }
 0x2d5   :  { %v2024_v39 = vadd.f32 %v2023_v37, %v1959_v10  ;;  %2400 = vmatpush.msra.mxu1 %v1865_v15 }
 0x2d7   :  { %2220 = vmatmul.f32.gmra.mxu2 %v3910_v16  ;;  %2285 = vmatmul.f32.gmra.mxu3 %v3914_v20  ;;  %v4089_v57 = vadd.f32 %v2088_v33, %v2024_v39 }
 0x2d9   :  { %v1899_v58 = vpop.f32.mrf.mxu1  ;;  %v2091_v45 = vpop.f32.mrf.mxu0 }
 0x2da   :  { %v1961_v7 = vpop.f32.mrf.mxu2  ;;  %v2026_v54 = vpop.f32.mrf.mxu3 }
 0x2db   :  { %v1962_v31 = vadd.f32 %v1961_v7, %v1896_v47  ;;  %v1862_v7 = vld [vmem:[#allocation12 + $0x428] sm:$0xff] }
 0x2dc   :  { %2158 = vmatmul.f32.gmra.mxu1 %v3921_v1  ;;  %2350 = vmatmul.f32.gmra.mxu0 %v3921_v1  ;;  %v1864_v1 = vld [vmem:[#allocation12 + $0x438] sm:$0xff] }
 0x2dd   :  { %v2027_v4 = vadd.f32 %v2026_v54, %v1962_v31  ;;  %2401 = vmatpush.msra.mxu1 %v1864_v1  ;;  %v4120_v1 = vld [vmem:[#allocation2 + $0x90] sm:$0xff] }
 0x2df   :  { %2223 = vmatmul.f32.gmra.mxu2 %v3924_v18  ;;  %2288 = vmatmul.f32.gmra.mxu3 %v3928_v44  ;;  %v4095_v52 = vadd.f32 %v2091_v45, %v2027_v4  ;;  %v1506_v45 = vld [vmem:[#allocation2 + $0x88] sm:$0x3] }
 0x2e0   :  { %v1694_v54 = vrot.slane %v1506_v45, 1 }
 0x2e1   :  { %v1902_v20 = vpop.f32.mrf.mxu1  ;;  %v2094_v36 = vpop.f32.mrf.mxu0 }
 0x2e2   :  { %v1964_v38 = vpop.f32.mrf.mxu2  ;;  %v2029_v56 = vpop.f32.mrf.mxu3 }
 0x2e3   :  { %v1965_v63 = vadd.f32 %v1964_v38, %v1899_v58  ;;  %v1701_v38 = vrot.slane %v3970_v0, 2 }
 0x2e4   :  { %2161 = vmatmul.f32.gmra.mxu1 %v3935_v29  ;;  %2353 = vmatmul.f32.gmra.mxu0 %v3935_v29  ;;  %v1863_v29 = vld [vmem:[#allocation12 + $0x430] sm:$0xff] }
 0x2e5   :  { %v2030_v13 = vadd.f32 %v2029_v56, %v1965_v63  ;;  %2402 = vmatpush.msra.mxu1 %v1863_v29  ;;  %v4117_v56 = vld [vmem:[#allocation2 + $0x98] sm:$0x3] }
 0x2e7   :  { %2226 = vmatmul.f32.gmra.mxu2 %v3938_v32  ;;  %2291 = vmatmul.f32.gmra.mxu3 %v3942_v42  ;;  %v4101_v8 = vadd.f32 %v2094_v36, %v2030_v13 }
 0x2e8   :  { %2403 = vmatpush.msra.mxu1 %v1862_v7 }
 0x2e9   :  { %v1905_v44 = vpop.f32.mrf.mxu1  ;;  %v2097_v12 = vpop.f32.mrf.mxu0 }
 0x2ea   :  { %v1967_v21 = vpop.f32.mrf.mxu2  ;;  %v2032_v47 = vpop.f32.mrf.mxu3 }
 0x2eb   :  { %v1968_v33 = vadd.f32 %v1967_v21, %v1902_v20  ;;  %v1714_v21 = vrot.slane %v4117_v56, 1 }
 0x2ec   :  { %2164 = vmatmul.f32.gmra.mxu1 %v3949_v24  ;;  %2356 = vmatmul.f32.gmra.mxu0 %v3949_v24 }
 0x2ed   :  { %v2033_v60 = vadd.f32 %v2032_v47, %v1968_v33  ;;  %v1861_v47 = vld [vmem:[#allocation12 + $0x420] sm:$0xff] }
 0x2ee   :  { %2404 = vmatpush.msra.mxu1 %v1861_v47 }
 0x2ef   :  { %2229 = vmatmul.f32.gmra.mxu2 %v3952_v35  ;;  %2294 = vmatmul.f32.gmra.mxu3 %v3956_v26  ;;  %v4107_v37 = vadd.f32 %v2097_v12, %v2033_v60  ;;  %v1693_v26 = vrot.slane %v3970_v0, 1  ;;  %v1713_v12 = vrot.slane %v4120_v1, 1 }
 0x2f1   :  { %v1908_v42 = vpop.f32.mrf.mxu1  ;;  %v2100_v10 = vpop.f32.mrf.mxu0  ;;  %v1695_v13 = vsel %vm380_vm0, %v1693_v26, %v1694_v54 }
 0x2f2   :  { %v1970_v39 = vpop.f32.mrf.mxu2  ;;  %v2035_v40 = vpop.f32.mrf.mxu3 }
 0x2f3   :  { %v1971_v58 = vadd.f32 %v1970_v39, %v1905_v44 }
 0x2f4   :  { %2167 = vmatmul.f32.gmra.mxu1 %v3963_v50  ;;  %2359 = vmatmul.f32.gmra.mxu0 %v3963_v50  ;;  %v1702_v50 = vrot.slane %v1506_v45, 2  ;;  %v1860_v45 = vld [vmem:[#allocation12 + $0x418] sm:$0xff] }
 0x2f5   :  { %v2036_v24 = vadd.f32 %v2035_v40, %v1971_v58  ;;  %2405 = vmatpush.msra.mxu1 %v1860_v45 }
 0x2f6   :  { %v4125_v33 = vsel %vm445_vm1, %v1701_v38, %v1702_v50 }
 0x2f7   :  { %2232 = vmatmul.f32.gmra.mxu2 %v3966_v5  ;;  %2297 = vmatmul.f32.gmra.mxu3 %v3970_v0  ;;  %v4114_v31 = vadd.f32 %v2100_v10, %v2036_v24 }
 0x2f9   :  { %v1911_v4 = vpop.f32.mrf.mxu1  ;;  %v2103_v15 = vpop.f32.mrf.mxu0 }
 0x2fa   :  { %v1973_v20 = vpop.f32.mrf.mxu2  ;;  %v2038_v36 = vpop.f32.mrf.mxu3 }
 0x2fb   :  { %v1974_v63 = vadd.f32 %v1973_v20, %v1908_v42  ;;  %v1715_v42 = vsel %vm380_vm0, %v1713_v12, %v1714_v21 }
 0x2fc   :  { %2170 = vmatmul.f32.gmra.mxu1 %v1695_v13  ;;  %2362 = vmatmul.f32.gmra.mxu0 %v1695_v13 }
 0x2fd   :  { %v2039_v44 = vadd.f32 %v2038_v36, %v1974_v63 }
 0x2ff   :  { %2235 = vmatmul.f32.gmra.mxu2 %v4125_v33  ;;  %2300 = vmatmul.f32.gmra.mxu3 %v4120_v1  ;;  %v4129_v0 = vadd.f32 %v2103_v15, %v2039_v44 }
 0x301   :  { %v1914_v60 = vpop.f32.mrf.mxu1  ;;  %v2106_v29 = vpop.f32.mrf.mxu0 }
 0x302   :  { %v1976_v10 = vpop.f32.mrf.mxu2  ;;  %v2041_v39 = vpop.f32.mrf.mxu3 }
 0x303   :  { %v1977_v40 = vadd.f32 %v1976_v10, %v1911_v4  ;;  %v1859_v4 = vld [vmem:[#allocation12 + $0x410] sm:$0xff] }
 0x304   :  { %2173 = vmatmul.f32.gmra.mxu1 %v3976_v19  ;;  %2365 = vmatmul.f32.gmra.mxu0 %v1715_v42 }
 0x305   :  { %v2042_v58 = vadd.f32 %v2041_v39, %v1977_v40  ;;  %2406 = vmatpush.msra.mxu1 %v1859_v4 }
 0x307   :  { %2238 = vmatmul.f32.gmra.mxu2 %v3979_v51  ;;  %2303 = vmatmul.f32.gmra.mxu3 %v3981_v43  ;;  %v4135_v24 = vadd.f32 %v2106_v29, %v2042_v58 }
 0x309   :  { %v1917_v7 = vpop.f32.mrf.mxu1  ;;  %v2109_v26 = vpop.f32.mrf.mxu0 }
 0x30a   :  { %v1979_v54 = vpop.f32.mrf.mxu2  ;;  %v2044_v15 = vpop.f32.mrf.mxu3 }
 0x30b   :  { %v1980_v20 = vadd.f32 %v1979_v54, %v1914_v60 }
 0x30c   :  { %2176 = vmatmul.f32.gmra.mxu1 %v3990_v17  ;;  %2368 = vmatmul.f32.gmra.mxu0 %v3990_v17  ;;  %v1858_v17 = vld [vmem:[#allocation12 + $0x408] sm:$0xff] }
 0x30d   :  { %v2045_v19 = vadd.f32 %v2044_v15, %v1980_v20  ;;  %2407 = vmatpush.msra.mxu1 %v1858_v17 }
 0x30f   :  { %2241 = vmatmul.f32.gmra.mxu2 %v3993_v53  ;;  %2306 = vmatmul.f32.gmra.mxu3 %v3995_v28  ;;  %v4141_v51 = vadd.f32 %v2109_v26, %v2045_v19 }
 0x311   :  { %v1920_v43 = vpop.f32.mrf.mxu1  ;;  %v2112_v36 = vpop.f32.mrf.mxu0 }
 0x312   :  { %v1982_v38 = vpop.f32.mrf.mxu2  ;;  %v2047_v50 = vpop.f32.mrf.mxu3 }
 0x313   :  { %v1983_v63 = vadd.f32 %v1982_v38, %v1917_v7  ;;  %v1526_v38 = vld [vmem:[#allocation2 + $0x128] sm:$0x3] }
 0x314   :  { %2179 = vmatmul.f32.gmra.mxu1 %v4004_v6  ;;  %2371 = vmatmul.f32.gmra.mxu0 %v4004_v6  ;;  %v1857_v6 = vld [vmem:[#allocation12 + $0x400] sm:$0xff] }
 0x315   :  { %v2048_v13 = vadd.f32 %v2047_v50, %v1983_v63  ;;  %2408 = vmatpush.msra.mxu1 %v1857_v6  ;;  %v4178_v6 = vld [vmem:[#allocation2 + $0x130] sm:$0xff] }
 0x317   :  { %2244 = vmatmul.f32.gmra.mxu2 %v4007_v9  ;;  %2309 = vmatmul.f32.gmra.mxu3 %v4009_v2  ;;  %v4147_v44 = vadd.f32 %v2112_v36, %v2048_v13 }
 0x319   :  { %v1923_v28 = vpop.f32.mrf.mxu1  ;;  %v2115_v12 = vpop.f32.mrf.mxu0 }
 0x31a   :  { %v1985_v21 = vpop.f32.mrf.mxu2  ;;  %v2050_v47 = vpop.f32.mrf.mxu3 }
 0x31b   :  { %v1986_v60 = vadd.f32 %v1985_v21, %v1920_v43  ;;  %v1704_v21 = vrot.slane %v4069_v46, 2 }
 0x31c   :  { %2182 = vmatmul.f32.gmra.mxu1 %v4018_v49  ;;  %2374 = vmatmul.f32.gmra.mxu0 %v4018_v49 }
 0x31d   :  { %v2051_v29 = vadd.f32 %v2050_v47, %v1986_v60  ;;  %v1705_v47 = vrot.slane %v1526_v38, 2  ;;  %v4175_v60 = vld [vmem:[#allocation2 + $0x138] sm:$0x3] }
 0x31f   :  { %2247 = vmatmul.f32.gmra.mxu2 %v4021_v22  ;;  %2312 = vmatmul.f32.gmra.mxu3 %v4023_v23  ;;  %v4153_v42 = vadd.f32 %v2115_v12, %v2051_v29 }
 0x321   :  { %v1926_v2 = vpop.f32.mrf.mxu1  ;;  %v2118_v10 = vpop.f32.mrf.mxu0 }
 0x322   :  { %v1988_v39 = vpop.f32.mrf.mxu2  ;;  %v2053_v40 = vpop.f32.mrf.mxu3 }
 0x323   :  { %v1989_v58 = vadd.f32 %v1988_v39, %v1923_v28  ;;  %v1717_v39 = vrot.slane %v4175_v60, 1 }
 0x324   :  { %2185 = vmatmul.f32.gmra.mxu1 %v4032_v55  ;;  %2377 = vmatmul.f32.gmra.mxu0 %v4032_v55 }
 0x325   :  { %v2054_v45 = vadd.f32 %v2053_v40, %v1989_v58  ;;  %v4183_v40 = vsel %vm445_vm1, %v1704_v21, %v1705_v47  ;;  %v1956_v58 = vadd.f32 %v4077_v3, %v4067_v14 }
 0x327   :  { %2250 = vmatmul.f32.gmra.mxu2 %v4035_v41  ;;  %2315 = vmatmul.f32.gmra.mxu3 %v4039_v48  ;;  %v4159_v49 = vadd.f32 %v2118_v10, %v2054_v45  ;;  %v1716_v10 = vrot.slane %v4178_v6, 1 }
 0x329   :  { %v1929_v7 = vpop.f32.mrf.mxu1  ;;  %v2121_v23 = vpop.f32.mrf.mxu0 }
 0x32a   :  { %v1991_v26 = vpop.f32.mrf.mxu2  ;;  %v2056_v54 = vpop.f32.mrf.mxu3 }
 0x32b   :  { %v1992_v15 = vadd.f32 %v1991_v26, %v1926_v2 }
 0x32c   :  { %2188 = vmatmul.f32.gmra.mxu1 %v4046_v25  ;;  %2380 = vmatmul.f32.gmra.mxu0 %v4046_v25  ;;  %v1696_v25 = vrot.slane %v4069_v46, 1 }
 0x32d   :  { %v2057_v20 = vadd.f32 %v2056_v54, %v1992_v15 }
 0x32f   :  { %2253 = vmatmul.f32.gmra.mxu2 %v4049_v34  ;;  %2318 = vmatmul.f32.gmra.mxu3 %v4053_v61  ;;  %v4165_v55 = vadd.f32 %v2121_v23, %v2057_v20  ;;  %v1697_v61 = vrot.slane %v1526_v38, 1  ;;  %v1718_v23 = vsel %vm380_vm0, %v1716_v10, %v1717_v39  ;;  %v2021_v20 = vadd.f32 %v4079_v11, %v1956_v58 }
 0x331   :  { %v1932_v19 = vpop.f32.mrf.mxu1  ;;  %v2124_v48 = vpop.f32.mrf.mxu0  ;;  %v1698_v29 = vsel %vm380_vm0, %v1696_v25, %v1697_v61 }
 0x332   :  { %v1994_v4 = vpop.f32.mrf.mxu2  ;;  %v2059_v43 = vpop.f32.mrf.mxu3 }
 0x333   :  { %v1995_v36 = vadd.f32 %v1994_v4, %v1929_v7 }
 0x334   :  { %2191 = vmatmul.f32.gmra.mxu1 %v4060_v59  ;;  %2383 = vmatmul.f32.gmra.mxu0 %v4060_v59 }
 0x335   :  { %v2060_v50 = vadd.f32 %v2059_v43, %v1995_v36 }
 0x337   :  { %2256 = vmatmul.f32.gmra.mxu2 %v4063_v62  ;;  %2321 = vmatmul.f32.gmra.mxu3 %v4069_v46  ;;  %v4172_v63 = vadd.f32 %v2124_v48, %v2060_v50  ;;  %v2086_v48 = vadd.f32 %v4075_v30, %v2021_v20 }
 0x339   :  { %v1935_v13 = vpop.f32.mrf.mxu1  ;;  %v2127_v17 = vpop.f32.mrf.mxu0 }
 0x33a   :  { %v1997_v28 = vpop.f32.mrf.mxu2  ;;  %v2062_v12 = vpop.f32.mrf.mxu3 }
 0x33b   :  { %v1998_v59 = vadd.f32 %v1997_v28, %v1932_v19 }
 0x33c   :  { %2194 = vmatmul.f32.gmra.mxu1 %v1698_v29  ;;  %2386 = vmatmul.f32.gmra.mxu0 %v1698_v29 }
 0x33d   :  { %v2063_v2 = vadd.f32 %v2062_v12, %v1998_v59 }
 0x33f   :  { %2259 = vmatmul.f32.gmra.mxu2 %v4183_v40  ;;  %2324 = vmatmul.f32.gmra.mxu3 %v4178_v6  ;;  %v4187_v46 = vadd.f32 %v2127_v17, %v2063_v2 }
 0x341   :  { %v2130_v45 = vpop.f32.mrf.mxu0  ;;  %v2150_v7 = vpop.f32.mrf.mxu1 }
 0x342   :  { %v2000_v26 = vpop.f32.mrf.mxu2  ;;  %v2065_v54 = vpop.f32.mrf.mxu3  ;;  %v2151_v43 = vadd.f32 %v2150_v7, %v2086_v48 }
 0x343   :  { %v2001_v15 = vadd.f32 %v2000_v26, %v1935_v13 }
 0x344   :  { %2409 = vmatmul.f32.vlgmr.msra.gmra.mxu1 %v3897_v27  ;;  %2389 = vmatmul.f32.gmra.mxu0 %v1718_v23 }
 0x345   :  { %v2066_v19 = vadd.f32 %v2065_v54, %v2001_v15 }
 0x347   :  { %v4195_v4 = vadd.f32 %v2130_v45, %v2066_v19 }
 0x349   :  { %v2153_v36 = vpop.f32.mrf.mxu1  ;;  %v2345_v14 = vpop.f32.mrf.mxu0 }
 0x34a   :  { %v2215_v3 = vpop.f32.mrf.mxu2  ;;  %v2280_v38 = vpop.f32.mrf.mxu3  ;;  %v2154_v27 = vadd.f32 %v2153_v36, %v4089_v57 }
 0x34b   :  { %v2216_v50 = vadd.f32 %v2215_v3, %v2151_v43  ;;  %v1722_v3 = vrot.slane %v4117_v56, 2 }
 0x34c   :  { %2412 = vmatmul.f32.gmra.mxu1 %v3910_v16 }
 0x34d   :  { %v2281_v25 = vadd.f32 %v2280_v38, %v2216_v50 }
 0x34f   :  { %v4198_v61 = vadd.f32 %v2345_v14, %v2281_v25 }
 0x351   :  { %v2156_v13 = vpop.f32.mrf.mxu1  ;;  %v2348_v11 = vpop.f32.mrf.mxu0 }
 0x352   :  { %v2218_v17 = vpop.f32.mrf.mxu2  ;;  %v2283_v28 = vpop.f32.mrf.mxu3  ;;  %v2157_v47 = vadd.f32 %v2156_v13, %v4095_v52 }
 0x353   :  { %v2219_v30 = vadd.f32 %v2218_v17, %v2154_v27 }
 0x354   :  { %2415 = vmatmul.f32.gmra.mxu1 %v3924_v18 }
 0x355   :  { %v2284_v12 = vadd.f32 %v2283_v28, %v2219_v30 }
 0x357   :  { %v4202_v21 = vadd.f32 %v2348_v11, %v2284_v12 }
 0x359   :  { %v2159_v59 = vpop.f32.mrf.mxu1  ;;  %v2351_v29 = vpop.f32.mrf.mxu0 }
 0x35a   :  { %v2221_v16 = vpop.f32.mrf.mxu2  ;;  %v2286_v2 = vpop.f32.mrf.mxu3  ;;  %v2160_v58 = vadd.f32 %v2159_v59, %v4101_v8 }
 0x35b   :  { %v2222_v10 = vadd.f32 %v2221_v16, %v2157_v47 }
 0x35c   :  { %2418 = vmatmul.f32.gmra.mxu1 %v3938_v32 }
 0x35d   :  { %v2287_v57 = vadd.f32 %v2286_v2, %v2222_v10 }
 0x35f   :  { %v2352_v39 = vadd.f32 %v2351_v29, %v2287_v57 }
 0x361   :  { %v2162_v45 = vpop.f32.mrf.mxu1  ;;  %v2354_v26 = vpop.f32.mrf.mxu0 }
 0x362   :  { %v2224_v7 = vpop.f32.mrf.mxu2  ;;  %v2289_v23 = vpop.f32.mrf.mxu3  ;;  %v2163_v15 = vadd.f32 %v2162_v45, %v4107_v37 }
 0x363   :  { %v2225_v18 = vadd.f32 %v2224_v7, %v2160_v58 }
 0x364   :  { %2421 = vmatmul.f32.gmra.mxu1 %v3952_v35  ;;  %v1721_v35 = vrot.slane %v4120_v1, 2 }
 0x365   :  { %v2290_v54 = vadd.f32 %v2289_v23, %v2225_v18 }
 0x366   :  { %v1723_v37 = vsel %vm445_vm1, %v1721_v35, %v1722_v3 }
 0x367   :  { %v2355_v52 = vadd.f32 %v2354_v26, %v2290_v54 }
 0x369   :  { %v4209_v20 = vpop.f32.mrf.mxu1  ;;  %v2357_v8 = vpop.f32.mrf.mxu0 }
 0x36a   :  { %v2227_v19 = vpop.f32.mrf.mxu2  ;;  %v2292_v32 = vpop.f32.mrf.mxu3 }
 0x36b   :  { %v2228_v48 = vadd.f32 %v2227_v19, %v2163_v15 }
 0x36c   :  { %2424 = vmatmul.f32.gmra.mxu1 %v3966_v5 }
 0x36d   :  { %v2293_v43 = vadd.f32 %v2292_v32, %v2228_v48 }
 0x36f   :  { %v2358_v36 = vadd.f32 %v2357_v8, %v2293_v43 }
 0x371   :  { %v4212_v14 = vpop.f32.mrf.mxu1  ;;  %v2360_v30 = vpop.f32.mrf.mxu0 }
 0x372   :  { %v2230_v17 = vpop.f32.mrf.mxu2  ;;  %v2169_v19 = vadd.f32 %v4212_v14, %v4129_v0 }
 0x374   :  { %2427 = vmatmul.f32.gmra.mxu1 %v4125_v33 }
 0x379   :  { %v2171_v38 = vpop.f32.mrf.mxu1  ;;  %v2363_v29 = vpop.f32.mrf.mxu0 }
 0x37a   :  { %v2233_v12 = vpop.f32.mrf.mxu2  ;;  %v2172_v32 = vadd.f32 %v2171_v38, %v4135_v24 }
 0x37b   :  { %v2234_v43 = vadd.f32 %v2233_v12, %v2169_v19 }
 0x37c   :  { %2430 = vmatmul.f32.gmra.mxu1 %v1723_v37 }
 0x381   :  { %v2174_v50 = vpop.f32.mrf.mxu1  ;;  %v2366_v57 = vpop.f32.mrf.mxu0 }
 0x382   :  { %v4219_v25 = vadd.f32 %v2174_v50, %v4141_v51  ;;  %v2236_v16 = vpop.f32.mrf.mxu2 }
 0x383   :  { %v2237_v35 = vadd.f32 %v2236_v16, %v2172_v32 }
 0x384   :  { %2433 = vmatmul.f32.gmra.mxu1 %v3993_v53 }
 0x389   :  { %v2177_v5 = vpop.f32.mrf.mxu1  ;;  %v2369_v7 = vpop.f32.mrf.mxu0 }
 0x38a   :  { %v4223_v27 = vadd.f32 %v2177_v5, %v4147_v44  ;;  %v2239_v58 = vpop.f32.mrf.mxu2 }
 0x38b   :  { %v2240_v5 = vadd.f32 %v2239_v58, %v4219_v25 }
 0x38c   :  { %2436 = vmatmul.f32.gmra.mxu1 %v4007_v9 }
 0x391   :  { %v2180_v33 = vpop.f32.mrf.mxu1  ;;  %v2372_v54 = vpop.f32.mrf.mxu0 }
 0x392   :  { %v4227_v1 = vadd.f32 %v2180_v33, %v4153_v42  ;;  %v2242_v23 = vpop.f32.mrf.mxu2 }
 0x394   :  { %2439 = vmatmul.f32.gmra.mxu1 %v4021_v22 }
 0x399   :  { %v2183_v56 = vpop.f32.mrf.mxu1  ;;  %v2375_v37 = vpop.f32.mrf.mxu0 }
 0x39a   :  { %v4231_v13 = vadd.f32 %v2183_v56, %v4159_v49  ;;  %v1725_v49 = vrot.slane %v4175_v60, 2  ;;  %v2245_v15 = vpop.f32.mrf.mxu2 }
 0x39b   :  { %v2246_v25 = vadd.f32 %v2245_v15, %v4227_v1 }
 0x39c   :  { %2442 = vmatmul.f32.gmra.mxu1 %v4035_v41  ;;  %v1724_v41 = vrot.slane %v4178_v6, 2 }
 0x39e   :  { %v1726_v11 = vsel %vm445_vm1, %v1724_v41, %v1725_v49 }
 0x3a1   :  { %v2186_v51 = vpop.f32.mrf.mxu1 }
 0x3a2   :  { %v4235_v53 = vadd.f32 %v2186_v51, %v4165_v55  ;;  %v2248_v33 = vpop.f32.mrf.mxu2 }
 0x3a4   :  { %2445 = vmatmul.f32.gmra.mxu1 %v4049_v34 }
 0x3a9   :  { %v2189_v44 = vpop.f32.mrf.mxu1 }
 0x3aa   :  { %v4239_v9 = vadd.f32 %v2189_v44, %v4172_v63 }
 0x3ac   :  { %2448 = vmatmul.f32.gmra.mxu1 %v4063_v62 }
 0x3b1   :  { %v2192_v42 = vpop.f32.mrf.mxu1 }
 0x3b2   :  { %v4243_v22 = vadd.f32 %v2192_v42, %v4187_v46 }
 0x3b4   :  { %2451 = vmatmul.f32.gmra.mxu1 %v4183_v40  ;;  %v2295_v40 = vpop.f32.mrf.mxu3 }
 0x3b9   :  { %v2195_v55 = vpop.f32.mrf.mxu1 }
 0x3ba   :  { %v4250_v34 = vadd.f32 %v2195_v55, %v4195_v4 }
 0x3bc   :  { %2454 = vmatmul.f32.gmra.mxu1 %v1726_v11  ;;  %v2298_v47 = vpop.f32.mrf.mxu3 }
 0x3bd   :  { %v2299_v50 = vadd.f32 %v2298_v47, %v2234_v43  ;;  %v2378_v47 = vpop.f32.mrf.mxu0 }
 0x3bf   :  { %v2364_v44 = vadd.f32 %v2363_v29, %v2299_v50 }
 0x3c1   :  { %v2410_v63 = vpop.f32.mrf.mxu1 }
 0x3c2   :  { %v4253_v62 = vadd.f32 %v2410_v63, %v4198_v61 }
 0x3c4   :  { %v2301_v10 = vpop.f32.mrf.mxu3  ;;  %v2479_v0 = vmul.f32 %v4253_v62, %v4253_v62 }
 0x3c5   :  { %v2381_v50 = vpop.f32.mrf.mxu0 }
 0x3c9   :  { %v2413_v46 = vpop.f32.mrf.mxu1 }
 0x3ca   :  { %v4256_v28 = vadd.f32 %v2413_v46, %v4202_v21 }
 0x3cc   :  { %v2304_v45 = vpop.f32.mrf.mxu3  ;;  %v2480_v56 = vmul.f32 %v4256_v28, %v4256_v28  ;;  %v2458_v24 = vadd.f32 %v4256_v28, %v4253_v62 }
 0x3cd   :  { %v2305_v51 = vadd.f32 %v2304_v45, %v2240_v5 }
 0x3ce   :  { %v2495_v41 = vadd.f32 %v2480_v56, %v2479_v0 }
 0x3cf   :  { %v2370_v12 = vadd.f32 %v2369_v7, %v2305_v51 }
 0x3d1   :  { %v2416_v6 = vpop.f32.mrf.mxu1 }
 0x3d2   :  { %v4258_v60 = vadd.f32 %v2416_v6, %v2352_v39 }
 0x3d4   :  { %v2307_v39 = vpop.f32.mrf.mxu3  ;;  %v2481_v14 = vmul.f32 %v4258_v60, %v4258_v60  ;;  %v2459_v49 = vadd.f32 %v2458_v24, %v4258_v60 }
 0x3d6   :  { %v2496_v46 = vadd.f32 %v2495_v41, %v2481_v14 }
 0x3d9   :  { %v2419_v59 = vpop.f32.mrf.mxu1 }
 0x3da   :  { %v4260_v4 = vadd.f32 %v2419_v59, %v2355_v52  ;;  %v2166_v52 = vadd.f32 %v4209_v20, %v4114_v31  ;;  %v2302_v31 = vadd.f32 %v2301_v10, %v2237_v35  ;;  %v2243_v20 = vadd.f32 %v2242_v23, %v4223_v27 }
 0x3db   :  { %v2249_v10 = vadd.f32 %v2248_v33, %v4231_v13 }
 0x3dc   :  { %v2231_v48 = vadd.f32 %v2230_v17, %v2166_v52  ;;  %v2310_v8 = vpop.f32.mrf.mxu3  ;;  %v2482_v27 = vmul.f32 %v4260_v4, %v4260_v4  ;;  %v2308_v11 = vadd.f32 %v2307_v39, %v2243_v20  ;;  %v2367_v17 = vadd.f32 %v2366_v57, %v2302_v31  ;;  %v2251_v57 = vpop.f32.mrf.mxu2 }
 0x3dd   :  { %v2252_v5 = vadd.f32 %v2251_v57, %v4235_v53 }
 0x3de   :  { %v2296_v3 = vadd.f32 %v2295_v40, %v2231_v48  ;;  %v2460_v40 = vadd.f32 %v2459_v49, %v4260_v4  ;;  %v2497_v59 = vadd.f32 %v2496_v46, %v2482_v27  ;;  %v2373_v58 = vadd.f32 %v2372_v54, %v2308_v11 }
 0x3e0   :  { %v2361_v38 = vadd.f32 %v2360_v30, %v2296_v3  ;;  %v2311_v30 = vadd.f32 %v2310_v8, %v2246_v25 }
 0x3e1   :  { %v2422_v2 = vpop.f32.mrf.mxu1 }
 0x3e2   :  { %v4262_v61 = vadd.f32 %v2422_v2, %v2358_v36 }
 0x3e4   :  { %v2313_v63 = vpop.f32.mrf.mxu3  ;;  %v2483_v6 = vmul.f32 %v4262_v61, %v4262_v61  ;;  %v2461_v29 = vadd.f32 %v2460_v40, %v4262_v61  ;;  %v2254_v20 = vpop.f32.mrf.mxu2 }
 0x3e5   :  { %v2314_v13 = vadd.f32 %v2313_v63, %v2249_v10  ;;  %v2255_v49 = vadd.f32 %v2254_v20, %v4239_v9 }
 0x3e9   :  { %v2425_v21 = vpop.f32.mrf.mxu1 }
 0x3ea   :  { %v4283_v55 = vadd.f32 %v2425_v21, %v2361_v38  ;;  %v2498_v21 = vadd.f32 %v2497_v59, %v2483_v6 }
 0x3ec   :  { %v2484_v16 = vmul.f32 %v4283_v55, %v4283_v55  ;;  %v2462_v45 = vadd.f32 %v2461_v29, %v4283_v55  ;;  %v2316_v8 = vpop.f32.mrf.mxu3  ;;  %v2257_v46 = vpop.f32.mrf.mxu2 }
 0x3ed   :  { %v2317_v51 = vadd.f32 %v2316_v8, %v2252_v5 }
 0x3ee   :  { %v2499_v15 = vadd.f32 %v2498_v21, %v2484_v16 }
 0x3ef   :  { %v2382_v27 = vadd.f32 %v2381_v50, %v2317_v51 }
 0x3f1   :  { %v2428_v18 = vpop.f32.mrf.mxu1 }
 0x3f2   :  { %v4288_v1 = vadd.f32 %v2428_v18, %v2364_v44  ;;  %v2376_v18 = vadd.f32 %v2375_v37, %v2311_v30  ;;  %v2379_v37 = vadd.f32 %v2378_v47, %v2314_v13  ;;  %v2258_v47 = vadd.f32 %v2257_v46, %v4243_v22 }
 0x3f4   :  { %v2485_v23 = vmul.f32 %v4288_v1, %v4288_v1  ;;  %v2463_v52 = vadd.f32 %v2462_v45, %v4288_v1  ;;  %v2319_v41 = vpop.f32.mrf.mxu3  ;;  %v2260_v45 = vpop.f32.mrf.mxu2 }
 0x3f5   :  { %v2320_v40 = vadd.f32 %v2319_v41, %v2255_v49 }
 0x3f6   :  { %v2500_v54 = vadd.f32 %v2499_v15, %v2485_v23 }
 0x3f9   :  { %v2431_v26 = vpop.f32.mrf.mxu1 }
 0x3fa   :  { %v4293_v2 = vadd.f32 %v2431_v26, %v2367_v17  ;;  %v2384_v17 = vpop.f32.mrf.mxu0 }
 0x3fb   :  { %v2385_v59 = vadd.f32 %v2384_v17, %v2320_v40 }
 0x3fc   :  { %v2486_v26 = vmul.f32 %v4293_v2, %v4293_v2  ;;  %v2464_v48 = vadd.f32 %v2463_v52, %v4293_v2  ;;  %v2322_v29 = vpop.f32.mrf.mxu3 }
 0x3fd   :  { %v2323_v9 = vadd.f32 %v2322_v29, %v2258_v47 }
 0x401   :  { %v2434_v36 = vpop.f32.mrf.mxu1 }
 0x402   :  { %v4299_v7 = vadd.f32 %v2434_v36, %v2370_v12  ;;  %v2501_v36 = vadd.f32 %v2500_v54, %v2486_v26  ;;  %v2387_v21 = vpop.f32.mrf.mxu0 }
 0x404   :  { %v2487_v32 = vmul.f32 %v4299_v7, %v4299_v7  ;;  %v2465_v35 = vadd.f32 %v2464_v48, %v4299_v7  ;;  %v2325_v15 = vpop.f32.mrf.mxu3 }
 0x406   :  { %v2502_v33 = vadd.f32 %v2501_v36, %v2487_v32 }
 0x409   :  { %v2437_v42 = vpop.f32.mrf.mxu1 }
 0x40a   :  { %v4304_v19 = vadd.f32 %v2437_v42, %v2373_v58  ;;  %v2390_v48 = vpop.f32.mrf.mxu0 }
 0x40c   :  { %v2488_v3 = vmul.f32 %v4304_v19, %v4304_v19  ;;  %v2466_v56 = vadd.f32 %v2465_v35, %v4304_v19 }
 0x40e   :  { %v2503_v24 = vadd.f32 %v2502_v33, %v2488_v3 }
 0x411   :  { %v2440_v39 = vpop.f32.mrf.mxu1 }
 0x412   :  { %v4309_v43 = vadd.f32 %v2440_v39, %v2376_v18  ;;  %v2261_v18 = vadd.f32 %v2260_v45, %v4250_v34  ;;  %v2388_v39 = vadd.f32 %v2387_v21, %v2323_v9 }
 0x414   :  { %v2489_v31 = vmul.f32 %v4309_v43, %v4309_v43  ;;  %v2467_v14 = vadd.f32 %v2466_v56, %v4309_v43  ;;  %v2326_v26 = vadd.f32 %v2325_v15, %v2261_v18 }
 0x416   :  { %v2504_v25 = vadd.f32 %v2503_v24, %v2489_v31  ;;  %v2391_v8 = vadd.f32 %v2390_v48, %v2326_v26 }
 0x419   :  { %v2443_v0 = vpop.f32.mrf.mxu1 }
 0x41a   :  { %v4319_v38 = vadd.f32 %v2443_v0, %v2379_v37 }
 0x41c   :  { %v2468_v44 = vadd.f32 %v2467_v14, %v4319_v38  ;;  %v2490_v53 = vmul.f32 %v4319_v38, %v4319_v38 }
 0x41e   :  { %v2505_v42 = vadd.f32 %v2504_v25, %v2490_v53 }
 0x421   :  { %v2446_v11 = vpop.f32.mrf.mxu1 }
 0x422   :  { %v4325_v63 = vadd.f32 %v2446_v11, %v2382_v27 }
 0x424   :  { %v2469_v6 = vadd.f32 %v2468_v44, %v4325_v63  ;;  %v2491_v30 = vmul.f32 %v4325_v63, %v4325_v63 }
 0x426   :  { %v2506_v12 = vadd.f32 %v2505_v42, %v2491_v30 }
 0x429   :  { %v2449_v16 = vpop.f32.mrf.mxu1 }
 0x42a   :  { %v4331_v10 = vadd.f32 %v2449_v16, %v2385_v59 }
 0x42c   :  { %v2470_v57 = vadd.f32 %v2469_v6, %v4331_v10  ;;  %v2492_v58 = vmul.f32 %v4331_v10, %v4331_v10 }
 0x42e   :  { %v2507_v23 = vadd.f32 %v2506_v12, %v2492_v58 }
 0x431   :  { %v2452_v52 = vpop.f32.mrf.mxu1 }
 0x432   :  { %v4337_v22 = vadd.f32 %v2452_v52, %v2388_v39 }
 0x434   :  { %v2471_v13 = vadd.f32 %v2470_v57, %v4337_v22  ;;  %v2493_v54 = vmul.f32 %v4337_v22, %v4337_v22 }
 0x436   :  { %v2508_v32 = vadd.f32 %v2507_v23, %v2493_v54 }
 0x439   :  { %v2455_v36 = vpop.f32.mrf.mxu1 }
 0x43a   :  { %v4342_v35 = vadd.f32 %v2455_v36, %v2391_v8 }
 0x43c   :  { %v2472_v3 = vadd.f32 %v2471_v13, %v4342_v35  ;;  %v2494_v34 = vmul.f32 %v4342_v35, %v4342_v35 }
 0x43e   :  { %v2473_v37 = vrot.slane %v2472_v3, 4  ;;  %v2509_v50 = vadd.f32 %v2508_v32, %v2494_v34 }
 0x440   :  { %v2474_v5 = vadd.f32 %v2473_v37, %v2472_v3  ;;  %v2510_v33 = vrot.slane %v2509_v50, 4 }
 0x442   :  { %v2475_v56 = vrot.slane %v2474_v5, 2  ;;  %v2511_v31 = vadd.f32 %v2510_v33, %v2509_v50 }
 0x444   :  { %v2476_v20 = vadd.f32 %v2475_v56, %v2474_v5  ;;  %v2512_v0 = vrot.slane %v2511_v31, 2 }
 0x446   :  { %v2477_v24 = vrot.slane %v2476_v20, 1  ;;  %v2513_v14 = vadd.f32 %v2512_v0, %v2511_v31 }
 0x448   :  { %v2478_v51 = vadd.f32 %v2477_v24, %v2476_v20  ;;  %v2514_v25 = vrot.slane %v2513_v14, 1 }
 0x44a   :  { %v2515_v44 = vadd.f32 %v2514_v25, %v2513_v14  ;;  %v2516_v53 = vmul.f32 0.0078125, %v2478_v51 }
 0x44c   :  { %v2517_v42 = vmul.f32 0.0078125, %v2515_v44  ;;  %v2518_v41 = vmul.f32 %v2516_v53, %v2516_v53  ;;  %v2533_v27 = vsub.f32 %v4309_v43, %v2516_v53  ;;  %v2534_v11 = vsub.f32 %v4319_v38, %v2516_v53 }
 0x44d   :  { %v2535_v17 = vsub.f32 %v4325_v63, %v2516_v53  ;;  %v2536_v40 = vsub.f32 %v4331_v10, %v2516_v53  ;;  %v2537_v6 = vsub.f32 %v4337_v22, %v2516_v53  ;;  %v2538_v30 = vsub.f32 %v4342_v35, %v2516_v53  ;;  %v2735_v35 = vld [vmem:[%s4388_s9] ss:$0 sm:$0xff] }
 0x44e   :  { %v2519_v49 = vsub.f32 %v2517_v42, %v2518_v41  ;;  %v2523_v43 = vsub.f32 %v4253_v62, %v2516_v53  ;;  %v2524_v38 = vsub.f32 %v4256_v28, %v2516_v53  ;;  %v2525_v63 = vsub.f32 %v4258_v60, %v2516_v53 }
 0x44f   :  { %v2526_v10 = vsub.f32 %v4260_v4, %v2516_v53  ;;  %v2527_v58 = vsub.f32 %v4262_v61, %v2516_v53  ;;  %v2528_v21 = vsub.f32 %v4283_v55, %v2516_v53  ;;  %v2529_v45 = vsub.f32 %v4288_v1, %v2516_v53 }
 0x450   :  { %v2520_v46 = vmax.f32 %v2519_v49, 0.0  ;;  %v2530_v23 = vsub.f32 %v4293_v2, %v2516_v53  ;;  %v2531_v18 = vsub.f32 %v4299_v7, %v2516_v53  ;;  %v2532_v62 = vsub.f32 %v4304_v19, %v2516_v53  ;;  %v2734_v7 = vld [vmem:[%s4387_s8] ss:$0 sm:$0xff]  ;;  %s2929_s8 = smov [#allocation14]  }
 0x451   :  { %s2672_s9 = sshll.u32 %s2929_s8, 4  ;;  %s2673_s9 = int_to_ptr.vmem [resolvable:$true] %s2672_s9 }
 0x452   :  { %v2539_v12 = vadd.f32 1e-05, %v2520_v46 }
 0x454   :  { %2738 = vrsqrt.f32 %v2539_v12  ;;  %vm2546_vm1 = vweird.f32 %v2539_v12 }
 0x45a   :  { %v2739_v47 = vpop.eup %2738 }
 0x45b   :  { %v2541_v59 = vmul.f32 %v2739_v47, %v2539_v12  ;;  %vm2547_vm0 = vweird.f32 %v2739_v47 }
 0x45c   :  { %vm2548_vm7 = vmor %vm2546_vm1, %vm2547_vm0 }
 0x45d   :  { %v2542_v29 = vmul.f32 %v2739_v47, %v2541_v59 }
 0x45f   :  { %v2543_v16 = vmul.f32 0.5, %v2542_v29 }
 0x461   :  { %v2544_v9 = vsub.f32 1.5, %v2543_v16 }
 0x463   :  { %v2545_v57 = vmul.f32 %v2739_v47, %v2544_v9 }
 0x465   :  { %v2549_v28 = vsel %vm2548_vm7, %v2739_v47, %v2545_v57 }
 0x466   :  { %v2550_v39 = vmul.f32 %v2549_v28, %v2523_v43  ;;  %v2551_v60 = vmul.f32 %v2549_v28, %v2524_v38  ;;  %v2552_v15 = vmul.f32 %v2549_v28, %v2525_v63  ;;  %v2553_v52 = vmul.f32 %v2549_v28, %v2526_v10 }
 0x467   :  { %v2554_v22 = vmul.f32 %v2549_v28, %v2527_v58  ;;  %v2555_v4 = vmul.f32 %v2549_v28, %v2528_v21  ;;  %v2556_v26 = vmul.f32 %v2549_v28, %v2529_v45  ;;  %v2557_v61 = vmul.f32 %v2549_v28, %v2530_v23 }
 0x468   :  { %v2558_v13 = vmul.f32 %v2549_v28, %v2531_v18  ;;  %v2559_v55 = vmul.f32 %v2549_v28, %v2532_v62  ;;  %v2560_v54 = vmul.f32 %v2549_v28, %v2533_v27  ;;  %v2561_v1 = vmul.f32 %v2549_v28, %v2534_v11 }
 0x469   :  { %v2562_v48 = vmul.f32 %v2549_v28, %v2535_v17  ;;  %v2563_v32 = vmul.f32 %v2549_v28, %v2536_v40  ;;  %v2564_v2 = vmul.f32 %v2549_v28, %v2537_v6  ;;  %v2565_v8 = vmul.f32 %v2549_v28, %v2538_v30 }
 0x46a   :  { %v2569_v19 = vmul.f32 %v2734_v7, %v2550_v39  ;;  %v2570_v3 = vmul.f32 %v2734_v7, %v2551_v60  ;;  %v2571_v34 = vmul.f32 %v2734_v7, %v2552_v15  ;;  %v2572_v37 = vmul.f32 %v2734_v7, %v2553_v52 }
 0x46b   :  { %v2584_v36 = vmul.f32 %v2734_v7, %v2565_v8  ;;  %v2573_v50 = vmul.f32 %v2734_v7, %v2554_v22  ;;  %v2574_v5 = vmul.f32 %v2734_v7, %v2555_v4  ;;  %v2575_v33 = vmul.f32 %v2734_v7, %v2556_v26 }
 0x46c   :  { %v2576_v56 = vmul.f32 %v2734_v7, %v2557_v61  ;;  %v2588_v31 = vadd.f32 %v2735_v35, %v2569_v19  ;;  %v2577_v0 = vmul.f32 %v2734_v7, %v2558_v13  ;;  %v2578_v24 = vmul.f32 %v2734_v7, %v2559_v55 }
 0x46d   :  { %v2603_v20 = vadd.f32 %v2735_v35, %v2584_v36  ;;  %v2589_v14 = vadd.f32 %v2735_v35, %v2570_v3  ;;  %v2590_v51 = vadd.f32 %v2735_v35, %v2571_v34  ;;  %v2579_v25 = vmul.f32 %v2734_v7, %v2560_v54 }
 0x46e   :  { %v2591_v44 = vadd.f32 %v2735_v35, %v2572_v37  ;;  %v2580_v42 = vmul.f32 %v2734_v7, %v2561_v1  ;;  %v2581_v41 = vmul.f32 %v2734_v7, %v2562_v48  ;;  %v2582_v49 = vmul.f32 %v2734_v7, %v2563_v32 }
 0x46f   :  { %vm2619_vm8 = vcmp.ge.f32.partialorder %v2603_v20, 0.0  ;;  %v2635_v53 = vmul.f32 0.1, %v2603_v20  ;;  %v2592_v27 = vadd.f32 %v2735_v35, %v2573_v50  ;;  %v2583_v11 = vmul.f32 %v2734_v7, %v2564_v2 }
 0x470   :  { %v2593_v17 = vadd.f32 %v2735_v35, %v2574_v5  ;;  %vm2604_vm9 = vcmp.ge.f32.partialorder %v2588_v31, 0.0  ;;  %v2594_v40 = vadd.f32 %v2735_v35, %v2575_v33  ;;  %vm2605_vm10 = vcmp.ge.f32.partialorder %v2589_v14, 0.0 }
 0x471   :  { %v2651_v46 = vsel %vm2619_vm8, %v2603_v20, %v2635_v53  ;;  %vm2606_vm11 = vcmp.ge.f32.partialorder %v2590_v51, 0.0  ;;  %v2620_v6 = vmul.f32 0.1, %v2588_v31  ;;  %v2595_v30 = vadd.f32 %v2735_v35, %v2576_v56 }
 0x472   :  { %2667 = vst [vmem:[#allocation14 + $0x78] sm:$0xff] %v2651_v46  ;;  %v2621_v12 = vmul.f32 0.1, %v2589_v14  ;;  %v2622_v47 = vmul.f32 0.1, %v2590_v51  ;;  %v2596_v29 = vadd.f32 %v2735_v35, %v2577_v0  ;;  %vm2607_vm12 = vcmp.ge.f32.partialorder %v2591_v44, 0.0 }
 0x473   :  { %v2623_v59 = vmul.f32 0.1, %v2591_v44  ;;  %v2624_v16 = vmul.f32 0.1, %v2592_v27  ;;  %v2636_v9 = vsel %vm2604_vm9, %v2588_v31, %v2620_v6  ;;  %v2597_v43 = vadd.f32 %v2735_v35, %v2578_v24 }
 0x474   :  { %vm2608_vm13 = vcmp.ge.f32.partialorder %v2592_v27, 0.0  ;;  %v2625_v38 = vmul.f32 0.1, %v2593_v17  ;;  %v2637_v63 = vsel %vm2605_vm10, %v2589_v14, %v2621_v12  ;;  %v2598_v57 = vadd.f32 %v2735_v35, %v2579_v25  ;;  %2652 = vst [vmem:[#allocation14] sm:$0xff] %v2636_v9 }
 0x475   :  { %vm2609_vm14 = vcmp.ge.f32.partialorder %v2593_v17, 0.0  ;;  %v2626_v10 = vmul.f32 0.1, %v2594_v40  ;;  %v2638_v58 = vsel %vm2606_vm11, %v2590_v51, %v2622_v47  ;;  %v2599_v21 = vadd.f32 %v2735_v35, %v2580_v42  ;;  %2653 = vst [vmem:[#allocation14 + $0x8] sm:$0xff] %v2637_v63 }
 0x476   :  { %vm2610_vm15 = vcmp.ge.f32.partialorder %v2594_v40, 0.0  ;;  %v2627_v45 = vmul.f32 0.1, %v2595_v30  ;;  %v2639_v23 = vsel %vm2607_vm12, %v2591_v44, %v2623_v59  ;;  %v2600_v18 = vadd.f32 %v2735_v35, %v2581_v41  ;;  %2654 = vst [vmem:[#allocation14 + $0x10] sm:$0xff] %v2638_v58 }
 0x477   :  { %vm2611_vm2 = vcmp.ge.f32.partialorder %v2595_v30, 0.0  ;;  %v2628_v62 = vmul.f32 0.1, %v2596_v29  ;;  %v2640_v28 = vsel %vm2608_vm13, %v2592_v27, %v2624_v16  ;;  %v2601_v39 = vadd.f32 %v2735_v35, %v2582_v49  ;;  %2655 = vst [vmem:[#allocation14 + $0x18] sm:$0xff] %v2639_v23 }
 0x478   :  { %vm2612_vm3 = vcmp.ge.f32.partialorder %v2596_v29, 0.0  ;;  %v2629_v60 = vmul.f32 0.1, %v2597_v43  ;;  %v2641_v15 = vsel %vm2609_vm14, %v2593_v17, %v2625_v38  ;;  %v2602_v52 = vadd.f32 %v2735_v35, %v2583_v11  ;;  %2656 = vst [vmem:[#allocation14 + $0x20] sm:$0xff] %v2640_v28 }
 0x479   :  { %vm2613_vm4 = vcmp.ge.f32.partialorder %v2597_v43, 0.0  ;;  %v2630_v22 = vmul.f32 0.1, %v2598_v57  ;;  %v2642_v4 = vsel %vm2610_vm15, %v2594_v40, %v2626_v10  ;;  %vm2614_vm5 = vcmp.ge.f32.partialorder %v2598_v57, 0.0  ;;  %2657 = vst [vmem:[#allocation14 + $0x28] sm:$0xff] %v2641_v15 }
 0x47a   :  { %v2631_v26 = vmul.f32 0.1, %v2599_v21  ;;  %v2643_v61 = vsel %vm2611_vm2, %v2595_v30, %v2627_v45  ;;  %vm2615_vm6 = vcmp.ge.f32.partialorder %v2599_v21, 0.0  ;;  %v2632_v13 = vmul.f32 0.1, %v2600_v18  ;;  %2658 = vst [vmem:[#allocation14 + $0x30] sm:$0xff] %v2642_v4 }
 0x47b   :  { %v2644_v55 = vsel %vm2612_vm3, %v2596_v29, %v2628_v62  ;;  %vm2616_vm0 = vcmp.ge.f32.partialorder %v2600_v18, 0.0  ;;  %v2633_v54 = vmul.f32 0.1, %v2601_v39  ;;  %v2645_v1 = vsel %vm2613_vm4, %v2597_v43, %v2629_v60  ;;  %2659 = vst [vmem:[#allocation14 + $0x38] sm:$0xff] %v2643_v61 }
 0x47c   :  { %vm2617_vm1 = vcmp.ge.f32.partialorder %v2601_v39, 0.0  ;;  %v2634_v48 = vmul.f32 0.1, %v2602_v52  ;;  %v2646_v32 = vsel %vm2614_vm5, %v2598_v57, %v2630_v22  ;;  %vm2618_vm7 = vcmp.ge.f32.partialorder %v2602_v52, 0.0  ;;  %2660 = vst [vmem:[#allocation14 + $0x40] sm:$0xff] %v2644_v55 }
 0x47d   :  { %v2647_v2 = vsel %vm2615_vm6, %v2599_v21, %v2631_v26  ;;  %v2648_v8 = vsel %vm2616_vm0, %v2600_v18, %v2632_v13  ;;  %2661 = vst [vmem:[#allocation14 + $0x48] sm:$0xff] %v2645_v1  ;;  %v2649_v7 = vsel %vm2617_vm1, %v2601_v39, %v2633_v54 }
 0x47e   :  { %2662 = vst [vmem:[#allocation14 + $0x50] sm:$0xff] %v2646_v32  ;;  %v2650_v19 = vsel %vm2618_vm7, %v2602_v52, %v2634_v48 }
 0x47f   :  { %2663 = vst [vmem:[#allocation14 + $0x58] sm:$0xff] %v2647_v2 }
 0x480   :  { %2664 = vst [vmem:[#allocation14 + $0x60] sm:$0xff] %v2648_v8 }
 0x481   :  { %2665 = vst [vmem:[#allocation14 + $0x68] sm:$0xff] %v2649_v7 }
 0x482   :  { %2666 = vst [vmem:[#allocation14 + $0x70] sm:$0xff] %v2650_v19 }
 0x483   :  { %2680 = dma.vmem_to_hbm [thread:$0]  %s2673_s9, 2048, %s2675_s27, [#allocation5], %s2921_s21, %s2921_s21, %s2922_s22  }
 0x484   :  { %2918 = dma.done.wait [#allocation5], 2048  }
 0x485   :  { %2919 = vsyncadd [#allocation5], 4294965248 }
 0x486   :  { %2685 = vsyncpa [#allocation4], 1 }
 0x487   :  { %2686 = vsyncpa [#allocation7], 1 }
 0x488   :  { %2687 = vsyncpa [#allocation10], 1 }
 0x489   :  { %2688 = vsyncpa [#allocation13], 1 }
 0x48a   :  { %2689 = vsyncpa [#allocation5], 1 }

</bundles_post_ra>
